<compile_context>
chip_gen: v5e
topology: v5e:2x2
jax: 0.10.0
libtpu: 0.0.40
codegen_flags: <defaults>
</compile_context>

<pallas_src>
import math
import functools

import jax
import jax.numpy as jnp
from jax import lax
from jax.experimental import pallas as pl
from jax.experimental.pallas import tpu as pltpu


def _attention_block_kernel(
    x_ref,       # (1, C, S) f32   input block (channels on sublanes, spatial on lanes)
    gn_w_ref,    # (C, 1)   f32    GroupNorm affine weight
    gn_b_ref,    # (C, 1)   f32    GroupNorm affine bias
    wqkv_ref,    # (3C, C)  bf16   W_QKV (PyTorch (out, in) layout), Q rows pre-scaled
    bqkv_ref,    # (3C, 1)  f32    b_QKV, Q entries pre-scaled
    wo_ref,      # (C, C)   bf16   W_O (PyTorch (out, in) layout)
    bo_ref,      # (C, 1)   f32    b_O
    out_ref,     # (1, C, S) f32   output block
    vals_ref,    # (C, S)   bf16   scratch: concatenated per-head attention values
    *,
    channels: int,
    num_heads: int,
    eps: float,
    q_tile: int,
):
    C = channels
    hs = C // num_heads
    S = x_ref.shape[2]
    num_q_tiles = S // q_tile

    x = x_ref[0]  # (C, S) f32

    # --- GroupNorm(num_groups=1): two-pass stats over all C*S elements ------
    inv_n = 1.0 / float(C * S)
    mean = jnp.sum(x) * inv_n
    xc = x - mean
    var = jnp.sum(xc * xc) * inv_n            # unbiased=False
    rstd = lax.rsqrt(var + eps)
    x_norm = xc * (gn_w_ref[...] * rstd) + gn_b_ref[...]   # per-channel affine

    # --- QKV projection: (3C, C) @ (C, S) -> (3C, S); bf16 operands, f32 acc -
    qkv = lax.dot_general(
        wqkv_ref[...],
        x_norm.astype(jnp.bfloat16),
        dimension_numbers=(((1,), (0,)), ((), ())),
        preferred_element_type=jnp.float32,
    )
    qkv = (qkv + bqkv_ref[...]).astype(jnp.bfloat16)        # (3C, S)

    # --- per-head, query-tiled attention ------------------------------------
    # Scores are computed as (S_keys, tq) so the softmax reductions produce
    # (1, tq) lane vectors and the deferred 1/denom scale broadcasts naturally
    # over the (hs, tq) head output -- no transposes anywhere.
    for h in range(num_heads):
        lo = h * hs
        kh = qkv[C + lo:C + lo + hs, :]          # (hs, S)
        vh = qkv[2 * C + lo:2 * C + lo + hs, :]  # (hs, S)
        for qt in range(num_q_tiles):
            q0 = qt * q_tile
            qh = qkv[lo:lo + hs, q0:q0 + q_tile]  # (hs, tq), 1/sqrt(hs) folded in

            # scores_t[k, q] = sum_d kh[d, k] * qh[d, q]
            scores_t = lax.dot_general(
                kh, qh,
                dimension_numbers=(((0,), (0,)), ((), ())),
                preferred_element_type=jnp.float32,
            )                                      # (S, tq)

            m = jnp.max(scores_t, axis=0, keepdims=True)       # (1, tq)
            p = jnp.exp(scores_t - m)                          # (S, tq), unnormalized
            denom = jnp.sum(p, axis=0, keepdims=True)          # (1, tq), f32

            # head_vals[d, q] = sum_k vh[d, k] * p[k, q]
            head_vals = lax.dot_general(
                vh, p.astype(jnp.bfloat16),
                dimension_numbers=(((1,), (0,)), ((), ())),
                preferred_element_type=jnp.float32,
            )                                      # (hs, tq)

            # Deferred softmax normalization on the small (hs, tq) slab.
            head_vals = head_vals * pl.reciprocal(denom, approx=False)
            vals_ref[lo:lo + hs, q0:q0 + q_tile] = head_vals.astype(jnp.bfloat16)

    # --- single output projection (K = C) + fused bias & residual -----------
    proj = lax.dot_general(
        wo_ref[...], vals_ref[...],
        dimension_numbers=(((1,), (0,)), ((), ())),
        preferred_element_type=jnp.float32,
    )                                              # (C, S)
    out_ref[0] = (x + bo_ref[...] + proj).astype(out_ref.dtype)


def _pick_q_tile(S: int) -> int:
    for cand in (512, 256, 128):
        if S % cand == 0:
            return cand
    return S


def attention_block_pallas(x_nchw, params, *, num_heads=4, eps=1e-5, q_tile=None):
    """x_nchw: (B, C, H, W) float32.  Returns (B, C, H, W)."""
    B, C, H, W = x_nchw.shape
    assert C % num_heads == 0
    S = H * W
    hs = C // num_heads
    scale = 1.0 / math.sqrt(hs)

    if q_tile is None:
        q_tile = _pick_q_tile(S)
    assert S % q_tile == 0

    # NCHW -> (B, C, S): pure reshape, no transposes needed in this layout.
    x_bcs = x_nchw.reshape(B, C, S)

    gn_w = params["gn_w"].reshape(C, 1).astype(jnp.float32)
    gn_b = params["gn_b"].reshape(C, 1).astype(jnp.float32)
    # Fold 1/sqrt(headsize) into the Q rows of W_QKV / b_QKV (zero runtime
    # cost), then pre-cast weights to bf16 so the kernel never re-casts them.
    wqkv = (params["wqkv"].astype(jnp.float32)
            .at[:C].multiply(scale).astype(jnp.bfloat16))          # (3C, C) bf16
    bqkv = (params["bqkv"].astype(jnp.float32)
            .at[:C].multiply(scale).reshape(3 * C, 1))             # (3C, 1) f32
    wo = params["wo"].astype(jnp.bfloat16)                         # (C, C) bf16
    bo = params["bo"].reshape(C, 1).astype(jnp.float32)            # (C, 1) f32

    kernel = functools.partial(
        _attention_block_kernel,
        channels=C, num_heads=num_heads, eps=eps, q_tile=q_tile,
    )

    out_bcs = pl.pallas_call(
        kernel,
        out_shape=jax.ShapeDtypeStruct((B, C, S), x_nchw.dtype),
        grid_spec=pltpu.PrefetchScalarGridSpec(
            num_scalar_prefetch=0,
            grid=(B,),
            in_specs=[
                pl.BlockSpec((1, C, S), lambda b: (b, 0, 0)),      # x
                pl.BlockSpec((C, 1), lambda b: (0, 0)),            # gn_w
                pl.BlockSpec((C, 1), lambda b: (0, 0)),            # gn_b
                pl.BlockSpec((3 * C, C), lambda b: (0, 0)),        # W_QKV (bf16)
                pl.BlockSpec((3 * C, 1), lambda b: (0, 0)),        # b_QKV
                pl.BlockSpec((C, C), lambda b: (0, 0)),            # W_O (bf16)
                pl.BlockSpec((C, 1), lambda b: (0, 0)),            # b_O
            ],
            out_specs=pl.BlockSpec((1, C, S), lambda b: (b, 0, 0)),
            scratch_shapes=[pltpu.VMEM((C, S), jnp.bfloat16)],     # head-vals slab
        ),
        # Default scoped VMEM limits are ample for these tile sizes; avoid
        # requesting v7x's entire physical VMEM.
        compiler_params=pltpu.CompilerParams(
            dimension_semantics=("parallel",),
        ),
    )(x_bcs, gn_w, gn_b, wqkv, bqkv, wo, bo)

    # (B, C, S) -> NCHW (pure reshape)
    return out_bcs.reshape(B, C, H, W)


def attention_block_ref(x_nchw, params, *, num_heads=4, eps=1e-5):
    """Pure-JAX f32 reference matching the PyTorch forward exactly."""
    B, C, H, W = x_nchw.shape
    S = H * W
    hs = C // num_heads

    mean = jnp.mean(x_nchw, axis=(1, 2, 3), keepdims=True)
    var = jnp.var(x_nchw, axis=(1, 2, 3), keepdims=True)
    xn = (x_nchw - mean) / jnp.sqrt(var + eps)
    xn = xn * params["gn_w"].reshape(1, C, 1, 1) + params["gn_b"].reshape(1, C, 1, 1)

    x_flat = jnp.transpose(xn, (0, 2, 3, 1)).reshape(B, S, C)
    qkv = x_flat @ params["wqkv"].T + params["bqkv"]
    q, k, v = qkv[..., :C], qkv[..., C:2 * C], qkv[..., 2 * C:]

    q = q.reshape(B, S, num_heads, hs)
    k = k.reshape(B, S, num_heads, hs)
    v = v.reshape(B, S, num_heads, hs)
    scores = jnp.einsum("bqnh,bknh->bnqk", q, k) / math.sqrt(hs)
    probs = jax.nn.softmax(scores, axis=-1)
    vals = jnp.einsum("bnqk,bknh->bqnh", probs, v).reshape(B, S, C)

    out = vals @ params["wo"].T + params["bo"]
    out = jnp.transpose(out.reshape(B, H, W, C), (0, 3, 1, 2))
    return x_nchw + out


def init_params(key, channels):
    """Deterministic parameter init (PyTorch-Linear-style uniform bounds)."""
    k1, k2, k3, k4 = jax.random.split(key, 4)
    bound = 1.0 / math.sqrt(channels)
    return {
        "gn_w": jnp.ones((channels,), jnp.float32),
        "gn_b": jnp.zeros((channels,), jnp.float32),
        "wqkv": jax.random.uniform(k1, (3 * channels, channels), jnp.float32, -bound, bound),
        "bqkv": jax.random.uniform(k2, (3 * channels,), jnp.float32, -bound, bound),
        "wo": jax.random.uniform(k3, (channels, channels), jnp.float32, -bound, bound),
        "bo": jax.random.uniform(k4, (channels,), jnp.float32, -bound, bound),
    }


if __name__ == "__main__":
    key = jax.random.PRNGKey(0)
    kx, kp = jax.random.split(key)

    # num_heads=4 -> hs=16 (bf16 sublane-pack aligned), S=256 (lane-dense).
    B, C, H, W = 2, 64, 16, 16
    x = jax.random.normal(kx, (B, C, H, W), dtype=jnp.float32)
    params = init_params(kp, C)

    out = attention_block_pallas(x, params)
    out = jax.block_until_ready(out)

    ref = attention_block_ref(x, params)
    ref = jax.block_until_ready(ref)

    assert out.shape == (B, C, H, W)
    # bf16 MXU operands => looser tolerance than pure f32.
    assert jnp.max(jnp.abs(out - ref)) < 5e-2, "Pallas output mismatch vs reference"

    print("KERNEL_OK")
</pallas_src>

<mosaic_0001>
module attributes {stable_mosaic.version = 11 : i64} {
  func.func @_attention_block_kernel(%arg0: i32, %arg1: memref<1x64x256xf32, #tpu.memory_space<vmem>>, %arg2: memref<64x1xf32, #tpu.memory_space<vmem>>, %arg3: memref<64x1xf32, #tpu.memory_space<vmem>>, %arg4: memref<192x64xbf16, #tpu.memory_space<vmem>>, %arg5: memref<192x1xf32, #tpu.memory_space<vmem>>, %arg6: memref<64x64xbf16, #tpu.memory_space<vmem>>, %arg7: memref<64x1xf32, #tpu.memory_space<vmem>>, %arg8: memref<1x64x256xf32, #tpu.memory_space<vmem>>, %arg9: memref<64x256xbf16, #tpu.memory_space<vmem>>) attributes {dimension_semantics = [#tpu.dimension_semantics<parallel>], iteration_bounds = array<i64: 2>, scalar_prefetch = 0 : i64, scratch_operands = 1 : i64, tpu.core_type = #tpu.core_type<tc>, window_params = [{transform_indices = @transform_0, window_bounds = array<i64: 1, 64, 256>}, {pipeline_mode = #tpu.pipeline_mode<synchronous>, transform_indices = @transform_1, window_bounds = array<i64: 64, 1>}, {pipeline_mode = #tpu.pipeline_mode<synchronous>, transform_indices = @transform_2, window_bounds = array<i64: 64, 1>}, {pipeline_mode = #tpu.pipeline_mode<synchronous>, transform_indices = @transform_3, window_bounds = array<i64: 192, 64>}, {pipeline_mode = #tpu.pipeline_mode<synchronous>, transform_indices = @transform_4, window_bounds = array<i64: 192, 1>}, {pipeline_mode = #tpu.pipeline_mode<synchronous>, transform_indices = @transform_5, window_bounds = array<i64: 64, 64>}, {pipeline_mode = #tpu.pipeline_mode<synchronous>, transform_indices = @transform_6, window_bounds = array<i64: 64, 1>}, {transform_indices = @transform_7, window_bounds = array<i64: 1, 64, 256>}]} {
    %c0 = arith.constant 0 : index
    %c0_0 = arith.constant 0 : index
    %c0_1 = arith.constant 0 : index
    %0 = vector.load %arg1[%c0, %c0_0, %c0_1] : memref<1x64x256xf32, #tpu.memory_space<vmem>>, vector<1x64x256xf32>
    %1 = vector.shape_cast %0 : vector<1x64x256xf32> to vector<64x256xf32>
    %2 = vector.shape_cast %1 : vector<64x256xf32> to vector<1x64x256xf32>
    %cst = arith.constant dense<0.000000e+00> : vector<1xf32>
    %3 = vector.multi_reduction <add>, %2, %cst [1, 2] : vector<1x64x256xf32> to vector<1xf32>
    %4 = vector.shape_cast %3 : vector<1xf32> to vector<1x1x1xf32>
    %5 = vector.extract %4[0, 0, 0] : f32 from vector<1x1x1xf32>
    %cst_2 = arith.constant 6.10351563E-5 : f32
    %6 = arith.mulf %5, %cst_2 : f32
    %7 = vector.broadcast %6 : f32 to vector<64x256xf32>
    %8 = arith.subf %1, %7 : vector<64x256xf32>
    %9 = arith.mulf %8, %8 : vector<64x256xf32>
    %10 = vector.shape_cast %9 : vector<64x256xf32> to vector<1x64x256xf32>
    %cst_3 = arith.constant dense<0.000000e+00> : vector<1xf32>
    %11 = vector.multi_reduction <add>, %10, %cst_3 [1, 2] : vector<1x64x256xf32> to vector<1xf32>
    %12 = vector.shape_cast %11 : vector<1xf32> to vector<1x1x1xf32>
    %13 = vector.extract %12[0, 0, 0] : f32 from vector<1x1x1xf32>
    %cst_4 = arith.constant 6.10351563E-5 : f32
    %14 = arith.mulf %13, %cst_4 : f32
    %cst_5 = arith.constant 9.99999974E-6 : f32
    %15 = arith.addf %14, %cst_5 : f32
    %16 = math.rsqrt %15 : f32
    %c0_6 = arith.constant 0 : index
    %c0_7 = arith.constant 0 : index
    %17 = vector.load %arg2[%c0_6, %c0_7] : memref<64x1xf32, #tpu.memory_space<vmem>>, vector<64x1xf32>
    %18 = vector.broadcast %16 : f32 to vector<64x1xf32>
    %19 = arith.mulf %17, %18 : vector<64x1xf32>
    %20 = vector.broadcast %19 : vector<64x1xf32> to vector<64x256xf32>
    %21 = arith.mulf %8, %20 : vector<64x256xf32>
    %c0_8 = arith.constant 0 : index
    %c0_9 = arith.constant 0 : index
    %22 = vector.load %arg3[%c0_8, %c0_9] : memref<64x1xf32, #tpu.memory_space<vmem>>, vector<64x1xf32>
    %23 = vector.broadcast %22 : vector<64x1xf32> to vector<64x256xf32>
    %24 = arith.addf %21, %23 : vector<64x256xf32>
    %c0_10 = arith.constant 0 : index
    %c0_11 = arith.constant 0 : index
    %25 = vector.load %arg4[%c0_10, %c0_11] : memref<192x64xbf16, #tpu.memory_space<vmem>>, vector<192x64xbf16>
    %26 = arith.truncf %24 : vector<64x256xf32> to vector<64x256xbf16>
    %cst_12 = arith.constant dense<0.000000e+00> : vector<192x256xf32>
    %27 = tpu.matmul %25, %26, %cst_12 {dimension_numbers = #tpu.dot_dimension_numbers<[1], [0], [0], [1], [0, 0, 1, 1], [], []>} : vector<192x64xbf16>, vector<64x256xbf16>, vector<192x256xf32> -> vector<192x256xf32>
    %c0_13 = arith.constant 0 : index
    %c0_14 = arith.constant 0 : index
    %28 = vector.load %arg5[%c0_13, %c0_14] : memref<192x1xf32, #tpu.memory_space<vmem>>, vector<192x1xf32>
    %29 = vector.broadcast %28 : vector<192x1xf32> to vector<192x256xf32>
    %30 = arith.addf %27, %29 : vector<192x256xf32>
    %31 = arith.truncf %30 : vector<192x256xf32> to vector<192x256xbf16>
    %32 = vector.extract_strided_slice %31 {offsets = [64, 0], sizes = [16, 256], strides = [1, 1]} : vector<192x256xbf16> to vector<16x256xbf16>
    %33 = vector.extract_strided_slice %31 {offsets = [128, 0], sizes = [16, 256], strides = [1, 1]} : vector<192x256xbf16> to vector<16x256xbf16>
    %34 = vector.extract_strided_slice %31 {offsets = [0, 0], sizes = [16, 256], strides = [1, 1]} : vector<192x256xbf16> to vector<16x256xbf16>
    %cst_15 = arith.constant dense<0.000000e+00> : vector<256x256xf32>
    %35 = tpu.matmul %32, %34, %cst_15 {dimension_numbers = #tpu.dot_dimension_numbers<[0], [0], [1], [1], [0, 1, 1, 1], [], []>} : vector<16x256xbf16>, vector<16x256xbf16>, vector<256x256xf32> -> vector<256x256xf32>
    %cst_16 = arith.constant dense<0xFF800000> : vector<256xf32>
    %36 = vector.multi_reduction <maximumf>, %35, %cst_16 [0] : vector<256x256xf32> to vector<256xf32>
    %37 = vector.shape_cast %36 : vector<256xf32> to vector<1x256xf32>
    %38 = vector.broadcast %37 : vector<1x256xf32> to vector<256x256xf32>
    %39 = arith.subf %35, %38 : vector<256x256xf32>
    %40 = math.exp %39 : vector<256x256xf32>
    %cst_17 = arith.constant dense<0.000000e+00> : vector<256xf32>
    %41 = vector.multi_reduction <add>, %40, %cst_17 [0] : vector<256x256xf32> to vector<256xf32>
    %42 = vector.shape_cast %41 : vector<256xf32> to vector<1x256xf32>
    %43 = arith.truncf %40 : vector<256x256xf32> to vector<256x256xbf16>
    %cst_18 = arith.constant dense<0.000000e+00> : vector<16x256xf32>
    %44 = tpu.matmul %33, %43, %cst_18 {dimension_numbers = #tpu.dot_dimension_numbers<[1], [0], [0], [1], [0, 0, 1, 1], [], []>} : vector<16x256xbf16>, vector<256x256xbf16>, vector<16x256xf32> -> vector<16x256xf32>
    %45 = tpu.reciprocal %42 : vector<1x256xf32> -> vector<1x256xf32>
    %46 = vector.broadcast %45 : vector<1x256xf32> to vector<16x256xf32>
    %47 = arith.mulf %44, %46 : vector<16x256xf32>
    %48 = arith.truncf %47 : vector<16x256xf32> to vector<16x256xbf16>
    %c0_19 = arith.constant 0 : index
    %c0_20 = arith.constant 0 : index
    %49 = vector.load %arg9[%c0_19, %c0_20] : memref<64x256xbf16, #tpu.memory_space<vmem>>, vector<16x256xbf16>
    tpu.vector_store %arg9[%c0_19, %c0_20], %48 {strides = array<i32>} : memref<64x256xbf16, #tpu.memory_space<vmem>>, vector<16x256xbf16>,
    %50 = vector.extract_strided_slice %31 {offsets = [80, 0], sizes = [16, 256], strides = [1, 1]} : vector<192x256xbf16> to vector<16x256xbf16>
    %51 = vector.extract_strided_slice %31 {offsets = [144, 0], sizes = [16, 256], strides = [1, 1]} : vector<192x256xbf16> to vector<16x256xbf16>
    %52 = vector.extract_strided_slice %31 {offsets = [16, 0], sizes = [16, 256], strides = [1, 1]} : vector<192x256xbf16> to vector<16x256xbf16>
    %cst_21 = arith.constant dense<0.000000e+00> : vector<256x256xf32>
    %53 = tpu.matmul %50, %52, %cst_21 {dimension_numbers = #tpu.dot_dimension_numbers<[0], [0], [1], [1], [0, 1, 1, 1], [], []>} : vector<16x256xbf16>, vector<16x256xbf16>, vector<256x256xf32> -> vector<256x256xf32>
    %cst_22 = arith.constant dense<0xFF800000> : vector<256xf32>
    %54 = vector.multi_reduction <maximumf>, %53, %cst_22 [0] : vector<256x256xf32> to vector<256xf32>
    %55 = vector.shape_cast %54 : vector<256xf32> to vector<1x256xf32>
    %56 = vector.broadcast %55 : vector<1x256xf32> to vector<256x256xf32>
    %57 = arith.subf %53, %56 : vector<256x256xf32>
    %58 = math.exp %57 : vector<256x256xf32>
    %cst_23 = arith.constant dense<0.000000e+00> : vector<256xf32>
    %59 = vector.multi_reduction <add>, %58, %cst_23 [0] : vector<256x256xf32> to vector<256xf32>
    %60 = vector.shape_cast %59 : vector<256xf32> to vector<1x256xf32>
    %61 = arith.truncf %58 : vector<256x256xf32> to vector<256x256xbf16>
    %cst_24 = arith.constant dense<0.000000e+00> : vector<16x256xf32>
    %62 = tpu.matmul %51, %61, %cst_24 {dimension_numbers = #tpu.dot_dimension_numbers<[1], [0], [0], [1], [0, 0, 1, 1], [], []>} : vector<16x256xbf16>, vector<256x256xbf16>, vector<16x256xf32> -> vector<16x256xf32>
    %63 = tpu.reciprocal %60 : vector<1x256xf32> -> vector<1x256xf32>
    %64 = vector.broadcast %63 : vector<1x256xf32> to vector<16x256xf32>
    %65 = arith.mulf %62, %64 : vector<16x256xf32>
    %66 = arith.truncf %65 : vector<16x256xf32> to vector<16x256xbf16>
    %c16 = arith.constant 16 : index
    %c0_25 = arith.constant 0 : index
    %67 = vector.load %arg9[%c16, %c0_25] : memref<64x256xbf16, #tpu.memory_space<vmem>>, vector<16x256xbf16>
    tpu.vector_store %arg9[%c16, %c0_25], %66 {strides = array<i32>} : memref<64x256xbf16, #tpu.memory_space<vmem>>, vector<16x256xbf16>,
    %68 = vector.extract_strided_slice %31 {offsets = [96, 0], sizes = [16, 256], strides = [1, 1]} : vector<192x256xbf16> to vector<16x256xbf16>
    %69 = vector.extract_strided_slice %31 {offsets = [160, 0], sizes = [16, 256], strides = [1, 1]} : vector<192x256xbf16> to vector<16x256xbf16>
    %70 = vector.extract_strided_slice %31 {offsets = [32, 0], sizes = [16, 256], strides = [1, 1]} : vector<192x256xbf16> to vector<16x256xbf16>
    %cst_26 = arith.constant dense<0.000000e+00> : vector<256x256xf32>
    %71 = tpu.matmul %68, %70, %cst_26 {dimension_numbers = #tpu.dot_dimension_numbers<[0], [0], [1], [1], [0, 1, 1, 1], [], []>} : vector<16x256xbf16>, vector<16x256xbf16>, vector<256x256xf32> -> vector<256x256xf32>
    %cst_27 = arith.constant dense<0xFF800000> : vector<256xf32>
    %72 = vector.multi_reduction <maximumf>, %71, %cst_27 [0] : vector<256x256xf32> to vector<256xf32>
    %73 = vector.shape_cast %72 : vector<256xf32> to vector<1x256xf32>
    %74 = vector.broadcast %73 : vector<1x256xf32> to vector<256x256xf32>
    %75 = arith.subf %71, %74 : vector<256x256xf32>
    %76 = math.exp %75 : vector<256x256xf32>
    %cst_28 = arith.constant dense<0.000000e+00> : vector<256xf32>
    %77 = vector.multi_reduction <add>, %76, %cst_28 [0] : vector<256x256xf32> to vector<256xf32>
    %78 = vector.shape_cast %77 : vector<256xf32> to vector<1x256xf32>
    %79 = arith.truncf %76 : vector<256x256xf32> to vector<256x256xbf16>
    %cst_29 = arith.constant dense<0.000000e+00> : vector<16x256xf32>
    %80 = tpu.matmul %69, %79, %cst_29 {dimension_numbers = #tpu.dot_dimension_numbers<[1], [0], [0], [1], [0, 0, 1, 1], [], []>} : vector<16x256xbf16>, vector<256x256xbf16>, vector<16x256xf32> -> vector<16x256xf32>
    %81 = tpu.reciprocal %78 : vector<1x256xf32> -> vector<1x256xf32>
    %82 = vector.broadcast %81 : vector<1x256xf32> to vector<16x256xf32>
    %83 = arith.mulf %80, %82 : vector<16x256xf32>
    %84 = arith.truncf %83 : vector<16x256xf32> to vector<16x256xbf16>
    %c32 = arith.constant 32 : index
    %c0_30 = arith.constant 0 : index
    %85 = vector.load %arg9[%c32, %c0_30] : memref<64x256xbf16, #tpu.memory_space<vmem>>, vector<16x256xbf16>
    tpu.vector_store %arg9[%c32, %c0_30], %84 {strides = array<i32>} : memref<64x256xbf16, #tpu.memory_space<vmem>>, vector<16x256xbf16>,
    %86 = vector.extract_strided_slice %31 {offsets = [112, 0], sizes = [16, 256], strides = [1, 1]} : vector<192x256xbf16> to vector<16x256xbf16>
    %87 = vector.extract_strided_slice %31 {offsets = [176, 0], sizes = [16, 256], strides = [1, 1]} : vector<192x256xbf16> to vector<16x256xbf16>
    %88 = vector.extract_strided_slice %31 {offsets = [48, 0], sizes = [16, 256], strides = [1, 1]} : vector<192x256xbf16> to vector<16x256xbf16>
    %cst_31 = arith.constant dense<0.000000e+00> : vector<256x256xf32>
    %89 = tpu.matmul %86, %88, %cst_31 {dimension_numbers = #tpu.dot_dimension_numbers<[0], [0], [1], [1], [0, 1, 1, 1], [], []>} : vector<16x256xbf16>, vector<16x256xbf16>, vector<256x256xf32> -> vector<256x256xf32>
    %cst_32 = arith.constant dense<0xFF800000> : vector<256xf32>
    %90 = vector.multi_reduction <maximumf>, %89, %cst_32 [0] : vector<256x256xf32> to vector<256xf32>
    %91 = vector.shape_cast %90 : vector<256xf32> to vector<1x256xf32>
    %92 = vector.broadcast %91 : vector<1x256xf32> to vector<256x256xf32>
    %93 = arith.subf %89, %92 : vector<256x256xf32>
    %94 = math.exp %93 : vector<256x256xf32>
    %cst_33 = arith.constant dense<0.000000e+00> : vector<256xf32>
    %95 = vector.multi_reduction <add>, %94, %cst_33 [0] : vector<256x256xf32> to vector<256xf32>
    %96 = vector.shape_cast %95 : vector<256xf32> to vector<1x256xf32>
    %97 = arith.truncf %94 : vector<256x256xf32> to vector<256x256xbf16>
    %cst_34 = arith.constant dense<0.000000e+00> : vector<16x256xf32>
    %98 = tpu.matmul %87, %97, %cst_34 {dimension_numbers = #tpu.dot_dimension_numbers<[1], [0], [0], [1], [0, 0, 1, 1], [], []>} : vector<16x256xbf16>, vector<256x256xbf16>, vector<16x256xf32> -> vector<16x256xf32>
    %99 = tpu.reciprocal %96 : vector<1x256xf32> -> vector<1x256xf32>
    %100 = vector.broadcast %99 : vector<1x256xf32> to vector<16x256xf32>
    %101 = arith.mulf %98, %100 : vector<16x256xf32>
    %102 = arith.truncf %101 : vector<16x256xf32> to vector<16x256xbf16>
    %c48 = arith.constant 48 : index
    %c0_35 = arith.constant 0 : index
    %103 = vector.load %arg9[%c48, %c0_35] : memref<64x256xbf16, #tpu.memory_space<vmem>>, vector<16x256xbf16>
    tpu.vector_store %arg9[%c48, %c0_35], %102 {strides = array<i32>} : memref<64x256xbf16, #tpu.memory_space<vmem>>, vector<16x256xbf16>,
    %c0_36 = arith.constant 0 : index
    %c0_37 = arith.constant 0 : index
    %104 = vector.load %arg6[%c0_36, %c0_37] : memref<64x64xbf16, #tpu.memory_space<vmem>>, vector<64x64xbf16>
    %c0_38 = arith.constant 0 : index
    %c0_39 = arith.constant 0 : index
    %105 = vector.load %arg9[%c0_38, %c0_39] : memref<64x256xbf16, #tpu.memory_space<vmem>>, vector<64x256xbf16>
    %cst_40 = arith.constant dense<0.000000e+00> : vector<64x256xf32>
    %106 = tpu.matmul %104, %105, %cst_40 {dimension_numbers = #tpu.dot_dimension_numbers<[1], [0], [0], [1], [0, 0, 1, 1], [], []>} : vector<64x64xbf16>, vector<64x256xbf16>, vector<64x256xf32> -> vector<64x256xf32>
    %c0_41 = arith.constant 0 : index
    %c0_42 = arith.constant 0 : index
    %107 = vector.load %arg7[%c0_41, %c0_42] : memref<64x1xf32, #tpu.memory_space<vmem>>, vector<64x1xf32>
    %108 = vector.broadcast %107 : vector<64x1xf32> to vector<64x256xf32>
    %109 = arith.addf %1, %108 : vector<64x256xf32>
    %110 = arith.addf %109, %106 : vector<64x256xf32>
    %c0_43 = arith.constant 0 : index
    %c0_44 = arith.constant 0 : index
    %c0_45 = arith.constant 0 : index
    %111 = vector.load %arg8[%c0_43, %c0_44, %c0_45] : memref<1x64x256xf32, #tpu.memory_space<vmem>>, vector<1x64x256xf32>
    %112 = vector.shape_cast %111 : vector<1x64x256xf32> to vector<64x256xf32>
    %113 = vector.shape_cast %110 : vector<64x256xf32> to vector<1x64x256xf32>
    tpu.vector_store %arg8[%c0_43, %c0_44, %c0_45], %113 {strides = array<i32>} : memref<1x64x256xf32, #tpu.memory_space<vmem>>, vector<1x64x256xf32>,
    return
  }
  func.func @transform_0(%arg0: i32) -> (i32, i32, i32) {
    %c0_i32 = arith.constant 0 : i32
    %c0_i32_0 = arith.constant 0 : i32
    %c0_i32_1 = arith.constant 0 : i32
    return %arg0, %c0_i32, %c0_i32_0 : i32, i32, i32
  }
  func.func @transform_1(%arg0: i32) -> (i32, i32) {
    %c0_i32 = arith.constant 0 : i32
    %c0_i32_0 = arith.constant 0 : i32
    %c0_i32_1 = arith.constant 0 : i32
    return %c0_i32, %c0_i32_0 : i32, i32
  }
  func.func @transform_2(%arg0: i32) -> (i32, i32) {
    %c0_i32 = arith.constant 0 : i32
    %c0_i32_0 = arith.constant 0 : i32
    %c0_i32_1 = arith.constant 0 : i32
    return %c0_i32, %c0_i32_0 : i32, i32
  }
  func.func @transform_3(%arg0: i32) -> (i32, i32) {
    %c0_i32 = arith.constant 0 : i32
    %c0_i32_0 = arith.constant 0 : i32
    %c0_i32_1 = arith.constant 0 : i32
    return %c0_i32, %c0_i32_0 : i32, i32
  }
  func.func @transform_4(%arg0: i32) -> (i32, i32) {
    %c0_i32 = arith.constant 0 : i32
    %c0_i32_0 = arith.constant 0 : i32
    %c0_i32_1 = arith.constant 0 : i32
    return %c0_i32, %c0_i32_0 : i32, i32
  }
  func.func @transform_5(%arg0: i32) -> (i32, i32) {
    %c0_i32 = arith.constant 0 : i32
    %c0_i32_0 = arith.constant 0 : i32
    %c0_i32_1 = arith.constant 0 : i32
    return %c0_i32, %c0_i32_0 : i32, i32
  }
  func.func @transform_6(%arg0: i32) -> (i32, i32) {
    %c0_i32 = arith.constant 0 : i32
    %c0_i32_0 = arith.constant 0 : i32
    %c0_i32_1 = arith.constant 0 : i32
    return %c0_i32, %c0_i32_0 : i32, i32
  }
  func.func @transform_7(%arg0: i32) -> (i32, i32, i32) {
    %c0_i32 = arith.constant 0 : i32
    %c0_i32_0 = arith.constant 0 : i32
    %c0_i32_1 = arith.constant 0 : i32
    return %arg0, %c0_i32, %c0_i32_0 : i32, i32, i32
  }
}

</mosaic_0001>

<bundles_post_ra>
// kernel: tpu_custom_call.1
= control target key start
LH: loop header
LB: loop body
LE: loop exit
PB: predicated region body
PF: predicated region fallthrough
CT: control target
= control target key end

     0   :  { %12 = vsyncpa [#allocation4], 0  ;;  %s8255_s0 = inlined_call_operand.vmem [shape: f32[2,64,256], index: 0, kind: input, shape index: {}]   ;;  %s8256_s1 = inlined_call_operand.vmem [shape: f32[64,1], index: 1, kind: input, shape index: {}]   ;;  %s8257_s2 = inlined_call_operand.vmem [shape: f32[64,1], index: 2, kind: input, shape index: {}]   ;;  %s8258_s3 = inlined_call_operand.vmem [shape: bf16[192,64], index: 3, kind: input, shape index: {}]   ;;  %s8259_s4 = inlined_call_operand.vmem [shape: f32[192,1], index: 4, kind: input, shape index: {}]   ;;  %s8260_s5 = inlined_call_operand.vmem [shape: bf16[64,64], index: 5, kind: input, shape index: {}]   ;;  %s8261_s6 = inlined_call_operand.vmem [shape: f32[64,1], index: 6, kind: input, shape index: {}]   ;;  %s8262_s7 = inlined_call_operand.hbm [shape: f32[2,64,256], index: 7, kind: output, shape index: {}]  }
   0x1   :  { %14 = vsyncpa [#allocation4 + $0x1], 0  ;;  %s5265_s24 = smov 0   ;;  %s5267_s25 = smov 0  }
   0x2   :  { %s5269_s26 = smov 0   ;;  %s5271_s27 = smov 0  }
   0x3 LB: > { %s5286_s28 = sadd.s32 4294967295, %s5220_s27   ;;  %s4259_s29 = sadd.s32 4294967294, %s5220_s27   ;;  %s5220_s27 = sphi %s5271_s27, %s8626_s27   ;;  %s5216_s26 = sphi %s5269_s26, %s8625_s26   ;;  %s5212_s25 = sphi %s5267_s25, %s8624_s25   ;;  %s5208_s24 = sphi %s5265_s24, %s8623_s24  }
   0x4   : > { %s5290_s30 = sadd.s32 1, %s5220_s27   ;;  %s179_s8 = sadd.s32 1, %s5216_s26 }
   0x5   : > { %s176_s9 = ssub.s32 %s5220_s27, %s5290_s30  ;;  %p189_p0 = scmp.ne.s32.totalorder %s5216_s26, %s5212_s25 }
   0x6   : > { %p177_p1 = scmp.eq.s32.totalorder %s176_s9, 0  ;;  %p190_p2 = scmp.eq.s32.totalorder %s5286_s28, 1 }
   0x7   : > { %p195_p3 = scmp.ne.s32.totalorder %s5212_s25, %s5208_s24  ;;  %p196_p4 = scmp.eq.s32.totalorder %s4259_s29, 1 }
   0x8   : > { %s5301_s10 = scalar_select %p177_p1, %s5216_s26, %s179_s8  }
   0x9   : > { %p5303_p5 = por %p190_p2, %p189_p0  ;;  %p5307_p6 = por %p196_p4, %p195_p3 }
   0xa   : > { %p4262_p7 = scmp.ge.s32.totalorder %s5220_s27, 1  ;;  %p240_p8 = scmp.lt.s32.totalorder %s5220_s27, 3 }
   0xc   : > { %p241_p9 = pnand %p4262_p7, %p240_p8 }
   0xe   : > { %244 = sbr.rel (%p241_p9) target bundleno = 3476 (0xd94), region = 48 }
  0x13   : > { %p272_p10 = scmp.lt.s32.totalorder %s5286_s28, 1  ;;  %vm763_vm3 = vcmask 523264   ;;  %vm1006_vm4 = vcmask 130048   ;;  %s269_s22 = sand.u32 1, %s5212_s25  }
  0x14   : > { %s4263_s23 = sshll.u32 %s269_s22, 7  ;;  %s5178_s21 = scalar_lea.hbm %s8262_s7, 256 }
  0x15   : > { %s273_s13 = scalar_select %p272_p10, %s5286_s28, 1 }
  0x17   : > { %s4527_s14 = sshll.u32 %s273_s13, 7 }
  0x18   : > { %s5318_s17 = scalar_lea.vmem %s8255_s0, %s4527_s14 }
  0x19   : > { %v278_v0 = vld [vmem:[%s5318_s17] sm:$0xff]  ;;  %v279_v1 = vld [vmem:[%s5318_s17 + $0x8] sm:$0xff]  ;;  %v280_v2 = vld [vmem:[%s5318_s17 + $0x10] sm:$0xff] }
  0x1a   : > { %v294_v3 = vadd.f32 %v279_v1, %v278_v0  ;;  %v281_v4 = vld [vmem:[%s5318_s17 + $0x18] sm:$0xff]  ;;  %v282_v6 = vld [vmem:[%s5318_s17 + $0x20] sm:$0xff]  ;;  %v283_v8 = vld [vmem:[%s5318_s17 + $0x28] sm:$0xff] }
  0x1b   : > { %v284_v10 = vld [vmem:[%s5318_s17 + $0x30] sm:$0xff]  ;;  %v285_v12 = vld [vmem:[%s5318_s17 + $0x38] sm:$0xff]  ;;  %v286_v14 = vld [vmem:[%s5318_s17 + $0x40] sm:$0xff] }
  0x1c   : > { %v295_v5 = vadd.f32 %v294_v3, %v280_v2  ;;  %v287_v16 = vld [vmem:[%s5318_s17 + $0x48] sm:$0xff]  ;;  %v288_v18 = vld [vmem:[%s5318_s17 + $0x50] sm:$0xff]  ;;  %v289_v20 = vld [vmem:[%s5318_s17 + $0x58] sm:$0xff] }
  0x1d   : > { %v290_v22 = vld [vmem:[%s5318_s17 + $0x60] sm:$0xff]  ;;  %v291_v24 = vld [vmem:[%s5318_s17 + $0x68] sm:$0xff]  ;;  %v292_v26 = vld [vmem:[%s5318_s17 + $0x70] sm:$0xff] }
  0x1e   : > { %v296_v7 = vadd.f32 %v295_v5, %v281_v4  ;;  %v293_v28 = vld [vmem:[%s5318_s17 + $0x78] sm:$0xff] }
  0x20   : > { %v297_v9 = vadd.f32 %v296_v7, %v282_v6 }
  0x22   : > { %v298_v11 = vadd.f32 %v297_v9, %v283_v8 }
  0x24   : > { %v299_v13 = vadd.f32 %v298_v11, %v284_v10 }
  0x26   : > { %v300_v15 = vadd.f32 %v299_v13, %v285_v12 }
  0x28   : > { %v301_v17 = vadd.f32 %v300_v15, %v286_v14 }
  0x2a   : > { %v302_v19 = vadd.f32 %v301_v17, %v287_v16 }
  0x2c   : > { %v303_v21 = vadd.f32 %v302_v19, %v288_v18 }
  0x2e   : > { %v304_v23 = vadd.f32 %v303_v21, %v289_v20 }
  0x30   : > { %v305_v25 = vadd.f32 %v304_v23, %v290_v22 }
  0x32   : > { %v306_v27 = vadd.f32 %v305_v25, %v291_v24 }
  0x34   : > { %v307_v29 = vadd.f32 %v306_v27, %v292_v26 }
  0x36   : > { %v308_v30 = vadd.f32 %v307_v29, %v293_v28  ;;  %v469_v29 = vld [vmem:[%s8257_s2 + $0x30] sm:$0xff] }
  0x38   : > { %309 = vadd.xlane.f32.xlu0 %v308_v30  ;;  %v5222_v30 = vmov 0  }
  0x39   : > { %4609 = vset.pattern.permute.xlu2 %v5222_v30  ;;  %4611 = vset.pattern.permute.xlu0 %v5222_v30 }
  0x3a   : > { %503 = vperm.xlu2 %4609, %v469_v29   ;;  %4610 = vset.pattern.permute.xlu1 %v5222_v30 }
  0xab   : > { %v310_v31 = vpop.xlane.xlu0 %309 }
  0xac   : > { %v311_v32 = vrot.slane %v310_v31, 4 }
  0xae   : > { %v312_v33 = vadd.f32 %v311_v32, %v310_v31  ;;  %v470_v31 = vld [vmem:[%s8257_s2 + $0x38] sm:$0xff] }
  0xaf   : > { %508 = vperm.xlu2 %4609, %v470_v31   ;;  %v563_v31 = vld [vmem:[%s8259_s4 + $0x20] sm:$0xff] }
  0xb0   : > { %v313_v34 = vrot.slane %v312_v33, 2 }
  0xb2   : > { %v314_v35 = vadd.f32 %v313_v34, %v312_v33  ;;  %v467_v33 = vld [vmem:[%s8257_s2 + $0x20] sm:$0xff] }
  0xb4   : > { %v315_v36 = vrot.slane %v314_v35, 1 }
  0xb6   : > { %v316_v37 = vadd.f32 %v315_v36, %v314_v35 }
  0xb7   : > { %493 = vperm.xlu2 %4609, %v467_v33  }
  0xb8   : > { %4561 = vpush %v316_v37  ;;  %v465_v37 = vld [vmem:[%s8257_s2 + $0x10] sm:$0xff] }
  0xbf   : > { %483 = vperm.xlu2 %4609, %v465_v37  }
  0xe9   : > { %s4562_s18 = spop %4561 }
  0xea   : > { %s318_s19 = smul.f32 6.1035156e-05, %s4562_s18 }
  0xec   : > { %v319_v38 = vstv %s318_s19 }
  0xed   : > { %v5336_v39 = vsub.f32 %v278_v0, %v319_v38  ;;  %v5338_v40 = vsub.f32 %v279_v1, %v319_v38  ;;  %v5340_v41 = vsub.f32 %v280_v2, %v319_v38  ;;  %v5346_v44 = vsub.f32 %v281_v4, %v319_v38 }
  0xee   : > { %v5348_v45 = vsub.f32 %v282_v6, %v319_v38  ;;  %v5352_v48 = vsub.f32 %v283_v8, %v319_v38  ;;  %v5356_v51 = vsub.f32 %v284_v10, %v319_v38  ;;  %v5360_v54 = vsub.f32 %v285_v12, %v319_v38 }
  0xef   : > { %v336_v42 = vmul.f32 %v5336_v39, %v5336_v39  ;;  %v337_v43 = vmul.f32 %v5338_v40, %v5338_v40  ;;  %v338_v46 = vmul.f32 %v5340_v41, %v5340_v41  ;;  %v339_v49 = vmul.f32 %v5346_v44, %v5346_v44 }
  0xf0   : > { %v340_v52 = vmul.f32 %v5348_v45, %v5348_v45  ;;  %v341_v55 = vmul.f32 %v5352_v48, %v5352_v48  ;;  %v5364_v57 = vsub.f32 %v286_v14, %v319_v38  ;;  %v342_v58 = vmul.f32 %v5356_v51, %v5356_v51 }
  0xf1   : > { %v352_v47 = vadd.f32 %v337_v43, %v336_v42  ;;  %v5368_v60 = vsub.f32 %v287_v16, %v319_v38  ;;  %v343_v61 = vmul.f32 %v5360_v54, %v5360_v54  ;;  %v5372_v63 = vsub.f32 %v288_v18, %v319_v38 }
  0xf2   : > { %v344_v0 = vmul.f32 %v5364_v57, %v5364_v57  ;;  %v5376_v2 = vsub.f32 %v289_v20, %v319_v38  ;;  %v5380_v5 = vsub.f32 %v290_v22, %v319_v38  ;;  %v5384_v8 = vsub.f32 %v291_v24, %v319_v38 }
  0xf3   : > { %v353_v50 = vadd.f32 %v352_v47, %v338_v46  ;;  %v345_v3 = vmul.f32 %v5368_v60, %v5368_v60  ;;  %v346_v6 = vmul.f32 %v5372_v63, %v5372_v63  ;;  %v5388_v11 = vsub.f32 %v292_v26, %v319_v38  ;;  %v396_v47 = vld [vmem:[%s8256_s1 + $0x30] sm:$0xff] }
  0xf4   : > { %v347_v9 = vmul.f32 %v5376_v2, %v5376_v2  ;;  %v348_v12 = vmul.f32 %v5380_v5, %v5380_v5  ;;  %v5392_v14 = vsub.f32 %v293_v28, %v319_v38  ;;  %v349_v15 = vmul.f32 %v5384_v8, %v5384_v8 }
  0xf5   : > { %v354_v53 = vadd.f32 %v353_v50, %v339_v49  ;;  %v350_v17 = vmul.f32 %v5388_v11, %v5388_v11  ;;  %v394_v49 = vld [vmem:[%s8256_s1 + $0x20] sm:$0xff]  ;;  %v392_v50 = vld [vmem:[%s8256_s1 + $0x10] sm:$0xff] }
  0xf6   : > { %v351_v19 = vmul.f32 %v5392_v14, %v5392_v14 }
  0xf7   : > { %v355_v56 = vadd.f32 %v354_v53, %v340_v52 }
  0xf9   : > { %v356_v59 = vadd.f32 %v355_v56, %v341_v55 }
  0xfb   : > { %v357_v62 = vadd.f32 %v356_v59, %v342_v58  ;;  %v397_v58 = vld [vmem:[%s8256_s1 + $0x38] sm:$0xff]  ;;  %v390_v59 = vld [vmem:[%s8256_s1] sm:$0xff] }
  0xfd   : > { %v358_v1 = vadd.f32 %v357_v62, %v343_v61  ;;  %v464_v61 = vld [vmem:[%s8257_s2 + $0x8] sm:$0xff] }
  0xff   : > { %v359_v4 = vadd.f32 %v358_v1, %v344_v0  ;;  %v468_v1 = vld [vmem:[%s8257_s2 + $0x28] sm:$0xff] }
 0x101   : > { %v360_v7 = vadd.f32 %v359_v4, %v345_v3  ;;  %v559_v3 = vld [vmem:[%s8259_s4] sm:$0xff] }
 0x102   : > { %v463_v4 = vld [vmem:[%s8257_s2] sm:$0xff] }
 0x103   : > { %v361_v10 = vadd.f32 %v360_v7, %v346_v6  ;;  %v466_v6 = vld [vmem:[%s8257_s2 + $0x18] sm:$0xff]  ;;  %v575_v7 = vld [vmem:[%s8259_s4 + $0x80] sm:$0xff] }
 0x105   : > { %v362_v13 = vadd.f32 %v361_v10, %v347_v9  ;;  %v568_v9 = vld [vmem:[%s8259_s4 + $0x48] sm:$0xff] }
 0x106   : > { %v395_v10 = vld [vmem:[%s8256_s1 + $0x28] sm:$0xff] }
 0x107   : > { %v363_v16 = vadd.f32 %v362_v13, %v348_v12  ;;  %v569_v12 = vld [vmem:[%s8259_s4 + $0x50] sm:$0xff] }
 0x109   : > { %v364_v18 = vadd.f32 %v363_v16, %v349_v15  ;;  %v393_v15 = vld [vmem:[%s8256_s1 + $0x18] sm:$0xff]  ;;  %v561_v16 = vld [vmem:[%s8259_s4 + $0x10] sm:$0xff] }
 0x10b   : > { %v365_v20 = vadd.f32 %v364_v18, %v350_v17  ;;  %v391_v18 = vld [vmem:[%s8256_s1 + $0x8] sm:$0xff] }
 0x10d   : > { %v366_v21 = vadd.f32 %v365_v20, %v351_v19  ;;  %v567_v20 = vld [vmem:[%s8259_s4 + $0x40] sm:$0xff] }
 0x10f   : > { %367 = vadd.xlane.f32.xlu0 %v366_v21  ;;  %v560_v21 = vld [vmem:[%s8259_s4 + $0x8] sm:$0xff] }
 0x182   : > { %v368_v22 = vpop.xlane.xlu0 %367 }
 0x183   : > { %v369_v23 = vrot.slane %v368_v22, 4 }
 0x185   : > { %v370_v24 = vadd.f32 %v369_v23, %v368_v22  ;;  %v576_v22 = vld [vmem:[%s8259_s4 + $0x88] sm:$0xff]  ;;  %v570_v23 = vld [vmem:[%s8259_s4 + $0x58] sm:$0xff] }
 0x187   : > { %v371_v25 = vrot.slane %v370_v24, 2 }
 0x189   : > { %v372_v26 = vadd.f32 %v371_v25, %v370_v24  ;;  %v562_v24 = vld [vmem:[%s8259_s4 + $0x18] sm:$0xff]  ;;  %v577_v25 = vld [vmem:[%s8259_s4 + $0x90] sm:$0xff] }
 0x18b   : > { %v373_v27 = vrot.slane %v372_v26, 1 }
 0x18d   : > { %v374_v28 = vadd.f32 %v373_v27, %v372_v26  ;;  %v571_v26 = vld [vmem:[%s8259_s4 + $0x60] sm:$0xff]  ;;  %v504_v27 = vpop.permute.xlu2 %503 }
 0x18f   : > { %4563 = vpush %v374_v28  ;;  %v572_v28 = vld [vmem:[%s8259_s4 + $0x68] sm:$0xff] }
 0x195   : > { %v509_v29 = vpop.permute.xlu2 %508 }
 0x1c0   : > { %s4564_s29 = spop %4563 }
 0x1c1   : > { %s376_s8 = smul.f32 6.1035156e-05, %s4564_s29 }
 0x1c3   : > { %s377_s9 = sadd.f32 1e-05, %s376_s8  ;;  %s4552_s8 = sshll.u32 %s5286_s28, 7 }
 0x1c4   : > { %s4193_s14 = scalar_lea.hbm %s8262_s7, %s4552_s8  ;;  %s4182_s28 = scalar_lea.sflag [#allocation4], %s269_s22 }
 0x1c5   : > { %v378_v32 = vstv %s377_s9  ;;  %s4196_s16 = sshll.u32 %s4193_s14, 4  ;;  %s4197_s16 = int_to_ptr.hbm [resolvable:$true] %s4196_s16 }
 0x1c6   : > { %4612 = vrsqrt.f32 %v378_v32  ;;  %vm385_vm1 = vweird.f32 %v378_v32  ;;  %s5172_s18 = sshra.s32 %s4197_s16, 4  ;;  %s5173_s18 = int_to_ptr.hbm [resolvable:$true] %s5172_s18 }
 0x1c7   : > { %s5174_s19 = scalar_lea.hbm %s5173_s18, 128  ;;  %p5179_p0 = scmp.lt.s32.totalorder %s5173_s18, %s8262_s7 }
 0x1c8   : > { %p5175_p11 = scmp.ne.s32.totalorder %s5173_s18, %s5174_s19  ;;  %p5180_p1 = scmp.lt.s32.totalorder %s5178_s21, %s5174_s19 }
 0x1ca   : > { %p5176_p12 = pnand %p5175_p11, %p5303_p5  ;;  %p5181_p2 = por %p5180_p1, %p5179_p0 }
 0x1cc   : > { %v4613_v34 = vpop.eup %4612  ;;  %p5177_p13 = pneg %p5176_p12 }
 0x1cd   : > { %v380_v35 = vmul.f32 %v4613_v34, %v378_v32  ;;  %vm386_vm0 = vweird.f32 %v4613_v34 }
 0x1ce   : > { %vm387_vm2 = vmor %vm385_vm1, %vm386_vm0  ;;  %p5182_p3 = pnand %p5181_p2, %p5177_p13 }
 0x1cf   : > { %v381_v36 = vmul.f32 %v4613_v34, %v380_v35 }
 0x1d1   : > { %v382_v38 = vmul.f32 0.5, %v381_v36 }
 0x1d3   : > { %v383_v42 = vsub.f32 1.5, %v382_v38  ;;  %v564_v38 = vld [vmem:[%s8259_s4 + $0x28] sm:$0xff] }
 0x1d5   : > { %v384_v43 = vmul.f32 %v4613_v34, %v383_v42 }
 0x1d7   : > { %v388_v46 = vsel %vm387_vm2, %v4613_v34, %v384_v43  ;;  %v494_v34 = vpop.permute.xlu2 %493 }
 0x1d8   : > { %4565 = vpush %v388_v46 }
 0x209   : > { %s4566_s29 = spop %4565 }
 0x20a   : > { %v398_v52 = vstv %s4566_s29  ;;  %s8189_s29 = scalar_lea.vmem [#allocation3], %s4263_s23 }
 0x20b   : > { %v405_v53 = vmul.f32 %v398_v52, %v396_v47  ;;  %v403_v55 = vmul.f32 %v398_v52, %v394_v49  ;;  %v401_v56 = vmul.f32 %v398_v52, %v392_v50  ;;  %v406_v62 = vmul.f32 %v398_v52, %v397_v58  ;;  %s4194_s15 = sshll.u32 %s8189_s29, 4  ;;  %s4195_s15 = int_to_ptr.vmem [resolvable:$true] %s4194_s15 }
 0x20c   : > { %v399_v0 = vmul.f32 %v398_v52, %v390_v59  ;;  %v404_v13 = vmul.f32 %v398_v52, %v395_v10  ;;  %v402_v17 = vmul.f32 %v398_v52, %v393_v15  ;;  %v400_v19 = vmul.f32 %v398_v52, %v391_v18  ;;  %v580_v52 = vld [vmem:[%s8259_s4 + $0xa8] sm:$0xff] }
 0x20d   : > { %439 = vperm.xlu1 %4610, %v405_v53   ;;  %429 = vperm.xlu0 %4611, %v403_v55  }
 0x20e   : > { %419 = vperm.xlu2 %4609, %v401_v56  }
 0x215   : > { %444 = vperm.xlu1 %4610, %v406_v62   ;;  %478 = vperm.xlu0 %4611, %v464_v61  }
 0x216   : > { %409 = vperm.xlu2 %4609, %v399_v0   ;;  %v573_v0 = vld [vmem:[%s8259_s4 + $0x70] sm:$0xff] }
 0x21d   : > { %498 = vperm.xlu1 %4610, %v468_v1   ;;  %585 = vperm.xlu0 %4611, %v559_v3  }
 0x21e   : > { %473 = vperm.xlu2 %4609, %v463_v4  }
 0x225   : > { %488 = vperm.xlu1 %4610, %v466_v6   ;;  %665 = vperm.xlu0 %4611, %v575_v7  }
 0x226   : > { %630 = vperm.xlu2 %4609, %v568_v9  }
 0x22d   : > { %434 = vperm.xlu1 %4610, %v404_v13   ;;  %635 = vperm.xlu0 %4611, %v569_v12   ;;  %v574_v13 = vld [vmem:[%s8259_s4 + $0x78] sm:$0xff] }
 0x235   : > { %595 = vperm.xlu0 %4611, %v561_v16   ;;  %424 = vperm.xlu1 %4610, %v402_v17  }
 0x23d   : > { %414 = vperm.xlu1 %4610, %v400_v19  }
 0x245   : > { %625 = vperm.xlu1 %4610, %v567_v20  }
 0x24d   : > { %590 = vperm.xlu1 %4610, %v560_v21  }
 0x255   : > { %670 = vperm.xlu1 %4610, %v576_v22  }
 0x25d   : > { %640 = vperm.xlu1 %4610, %v570_v23  }
 0x265   : > { %600 = vperm.xlu1 %4610, %v562_v24  }
 0x26d   : > { %675 = vperm.xlu1 %4610, %v577_v25  }
 0x275   : > { %645 = vperm.xlu1 %4610, %v571_v26   ;;  %v565_v26 = vld [vmem:[%s8259_s4 + $0x30] sm:$0xff] }
 0x27d   : > { %650 = vperm.xlu1 %4610, %v572_v28  }
 0x27f   : > { %v440_v30 = vpop.permute.xlu1 %439  ;;  %v430_v55 = vpop.permute.xlu0 %429 }
 0x280   : > { %v459_v32 = vmul.f32 %v440_v30, %v5380_v5  ;;  %v460_v33 = vmul.f32 %v440_v30, %v5384_v8  ;;  %v484_v8 = vpop.permute.xlu2 %483  ;;  %v455_v56 = vmul.f32 %v430_v55, %v5364_v57  ;;  %v456_v58 = vmul.f32 %v430_v55, %v5368_v60 }
 0x282   : > { %v523_v42 = vadd.f32 %v504_v27, %v459_v32  ;;  %v524_v46 = vadd.f32 %v504_v27, %v460_v33  ;;  %v519_v1 = vadd.f32 %v494_v34, %v455_v56  ;;  %v520_v4 = vadd.f32 %v494_v34, %v456_v58  ;;  %v4530_v32 = vld [vmem:[%s8258_s3 + $0x10] sm:$0xff] }
 0x283   : > { %v4538_v33 = vld [vmem:[%s8258_s3 + $0x50] sm:$0xff] }
 0x285   : > { %605 = vperm.xlu1 %4610, %v563_v31   ;;  %v4537_v31 = vld [vmem:[%s8258_s3 + $0x48] sm:$0xff] }
 0x287   : > { %v445_v35 = vpop.permute.xlu1 %444  ;;  %v479_v23 = vpop.permute.xlu0 %478 }
 0x288   : > { %v461_v36 = vmul.f32 %v445_v35, %v5388_v11  ;;  %v462_v37 = vmul.f32 %v445_v35, %v5392_v14  ;;  %v579_v11 = vld [vmem:[%s8259_s4 + $0xa0] sm:$0xff]  ;;  %v420_v53 = vpop.permute.xlu2 %419 }
 0x289   : > { %v451_v57 = vmul.f32 %v420_v53, %v5348_v45  ;;  %v452_v60 = vmul.f32 %v420_v53, %v5352_v48 }
 0x28a   : > { %v525_v43 = vadd.f32 %v509_v29, %v461_v36  ;;  %v526_v47 = vadd.f32 %v509_v29, %v462_v37  ;;  %v4531_v36 = vld [vmem:[%s8258_s3 + $0x18] sm:$0xff] }
 0x28b   : > { %v515_v15 = vadd.f32 %v484_v8, %v451_v57  ;;  %v516_v17 = vadd.f32 %v484_v8, %v452_v60  ;;  %v4535_v8 = vld [vmem:[%s8258_s3 + $0x38] sm:$0xff] }
 0x28c   : > { %v557_v49 = vpack.c.bf16 %v525_v43, %v523_v42  ;;  %v558_v50 = vpack.c.bf16 %v526_v47, %v524_v46  ;;  %v4533_v46 = vld [vmem:[%s8258_s3 + $0x28] sm:$0xff] }
 0x28d   : > { %610 = vperm.xlu1 %4610, %v564_v38   ;;  %v4532_v38 = vld [vmem:[%s8258_s3 + $0x20] sm:$0xff] }
 0x28e   : > { %804 = vmatpush.bf16.msra.mxu0 %v557_v49  ;;  %4553 = vmatpush.bf16.msra.mxu2 %v557_v49  ;;  %v4534_v49 = vld [vmem:[%s8258_s3 + $0x30] sm:$0xff] }
 0x28f   : > { %873 = vmatpush.bf16.msra.mxu1 %v558_v50  ;;  %4557 = vmatpush.bf16.msra.mxu3 %v558_v50  ;;  %v499_v5 = vpop.permute.xlu1 %498 }
 0x290   : > { %v410_v10 = vpop.permute.xlu2 %409 }
 0x295   : > { %685 = vperm.xlu1 %4610, %v579_v11   ;;  %v586_v11 = vpop.permute.xlu0 %585 }
 0x297   : > { %v489_v14 = vpop.permute.xlu1 %488 }
 0x298   : > { %v474_v48 = vpop.permute.xlu2 %473 }
 0x29d   : > { %690 = vperm.xlu1 %4610, %v580_v52   ;;  %v666_v52 = vpop.permute.xlu0 %665 }
 0x29f   : > { %v435_v59 = vpop.permute.xlu1 %434 }
 0x2a0   : > { %v457_v61 = vmul.f32 %v435_v59, %v5372_v63  ;;  %v458_v62 = vmul.f32 %v435_v59, %v5376_v2 }
 0x2a2   : > { %v521_v3 = vadd.f32 %v499_v5, %v457_v61  ;;  %v522_v6 = vadd.f32 %v499_v5, %v458_v62 }
 0x2a4   : > { %v555_v7 = vpack.c.bf16 %v521_v3, %v519_v1  ;;  %v556_v9 = vpack.c.bf16 %v522_v6, %v520_v4 }
 0x2a5   : > { %655 = vperm.xlu1 %4610, %v573_v0   ;;  %v5596_v58 = vpop.permute.xlu0 %635 }
 0x2a6   : > { %805 = vmatpush.bf16.msra.mxu0 %v555_v7  ;;  %4554 = vmatpush.bf16.msra.mxu2 %v555_v7 }
 0x2a7   : > { %874 = vmatpush.bf16.msra.mxu1 %v556_v9  ;;  %4558 = vmatpush.bf16.msra.mxu3 %v556_v9  ;;  %v425_v63 = vpop.permute.xlu1 %424 }
 0x2a8   : > { %v453_v2 = vmul.f32 %v425_v63, %v5356_v51  ;;  %v454_v12 = vmul.f32 %v425_v63, %v5360_v54  ;;  %v447_v51 = vmul.f32 %v410_v10, %v5336_v39  ;;  %v448_v54 = vmul.f32 %v410_v10, %v5338_v40  ;;  %v4528_v39 = vld [vmem:[%s8258_s3] sm:$0xff] }
 0x2a9   : > { %v4536_v40 = vld [vmem:[%s8258_s3 + $0x40] sm:$0xff] }
 0x2aa   : > { %v517_v16 = vadd.f32 %v489_v14, %v453_v2  ;;  %v518_v18 = vadd.f32 %v489_v14, %v454_v12  ;;  %v511_v24 = vadd.f32 %v474_v48, %v447_v51  ;;  %v512_v25 = vadd.f32 %v474_v48, %v448_v54 }
 0x2ac   : > { %v553_v45 = vpack.c.bf16 %v517_v16, %v515_v15  ;;  %v554_v19 = vpack.c.bf16 %v518_v18, %v516_v17 }
 0x2ad   : > { %660 = vperm.xlu1 %4610, %v574_v13   ;;  %v596_v18 = vpop.permute.xlu0 %595 }
 0x2ae   : > { %806 = vmatpush.bf16.msra.mxu0 %v553_v45  ;;  %4555 = vmatpush.bf16.msra.mxu2 %v553_v45 }
 0x2af   : > { %875 = vmatpush.bf16.msra.mxu1 %v554_v19  ;;  %4559 = vmatpush.bf16.msra.mxu3 %v554_v19  ;;  %v415_v20 = vpop.permute.xlu1 %414 }
 0x2b0   : > { %v449_v21 = vmul.f32 %v415_v20, %v5340_v41  ;;  %v450_v22 = vmul.f32 %v415_v20, %v5346_v44  ;;  %v566_v41 = vld [vmem:[%s8259_s4 + $0x38] sm:$0xff]  ;;  %v4529_v44 = vld [vmem:[%s8258_s3 + $0x8] sm:$0xff] }
 0x2b2   : > { %v513_v27 = vadd.f32 %v479_v23, %v449_v21  ;;  %v514_v28 = vadd.f32 %v479_v23, %v450_v22 }
 0x2b4   : > { %v551_v29 = vpack.c.bf16 %v513_v27, %v511_v24  ;;  %v552_v30 = vpack.c.bf16 %v514_v28, %v512_v25 }
 0x2b5   : > { %615 = vperm.xlu1 %4610, %v565_v26  }
 0x2b6   : > { %807 = vmatpush.bf16.msra.mxu0 %v551_v29  ;;  %4556 = vmatpush.bf16.msra.mxu2 %v551_v29 }
 0x2b7   : > { %876 = vmatpush.bf16.msra.mxu1 %v552_v30  ;;  %4560 = vmatpush.bf16.msra.mxu3 %v552_v30  ;;  %v5555_v34 = vpop.permute.xlu1 %625 }
 0x2b9   : > { %4314 = vmatmul.msk.bf16.vlgmr.msra.gmra.mxu0 %vm763_vm3, %v4528_v39  ;;  %4322 = vmatmul.msk.bf16.vlgmr.msra.gmra.mxu2 %vm763_vm3, %v4536_v40 }
 0x2ba   : > { %4326 = vmatmul.msk.bf16.vlgmr.msra.gmra.mxu1 %vm763_vm3, %v4528_v39  ;;  %4334 = vmatmul.msk.bf16.vlgmr.msra.gmra.mxu3 %vm763_vm3, %v4536_v40 }
 0x2bd   : > { %620 = vperm.xlu1 %4610, %v566_v41  }
 0x2bf   : > { %v591_v35 = vpop.permute.xlu1 %590 }
 0x2c7   : > { %v5564_v37 = vpop.permute.xlu1 %670 }
 0x2c8   : > { %8367 = vst [vmem:[#allocation6_spill] sm:$0xff] %v5564_v37 }
 0x2c9   : > { %4315 = vmatmul.msk.bf16.gmra.mxu0 %vm763_vm3, %v4529_v44  ;;  %4323 = vmatmul.msk.bf16.gmra.mxu2 %vm763_vm3, %v4537_v31 }
 0x2ca   : > { %4327 = vmatmul.msk.bf16.gmra.mxu1 %vm763_vm3, %v4529_v44  ;;  %4335 = vmatmul.msk.bf16.gmra.mxu3 %vm763_vm3, %v4537_v31 }
 0x2cf   : > { %v5569_v42 = vpop.permute.xlu1 %640 }
 0x2d7   : > { %v5573_v43 = vpop.permute.xlu1 %600 }
 0x2d8   : > { %8368 = vst [vmem:[#allocation7_spill] sm:$0xff] %v5573_v43 }
 0x2d9   : > { %4316 = vmatmul.msk.bf16.gmra.mxu0 %vm763_vm3, %v4530_v32  ;;  %4324 = vmatmul.msk.bf16.gmra.mxu2 %vm763_vm3, %v4538_v33 }
 0x2da   : > { %4328 = vmatmul.msk.bf16.gmra.mxu1 %vm763_vm3, %v4530_v32  ;;  %4336 = vmatmul.msk.bf16.gmra.mxu3 %vm763_vm3, %v4538_v33 }
 0x2df   : > { %v676_v47 = vpop.permute.xlu1 %675 }
 0x2e7   : > { %v5583_v50 = vpop.permute.xlu1 %645 }
 0x2e9   : > { %4317 = vmatmul.msk.bf16.gmra.mxu0 %vm763_vm3, %v4531_v36 }
 0x2ea   : > { %4329 = vmatmul.msk.bf16.gmra.mxu1 %vm763_vm3, %v4531_v36 }
 0x2ef   : > { %v5587_v5 = vpop.permute.xlu1 %650 }
 0x2f7   : > { %v606_v14 = vpop.permute.xlu1 %605 }
 0x2f9   : > { %4318 = vmatmul.msk.bf16.gmra.mxu0 %vm763_vm3, %v4532_v38 }
 0x2fa   : > { %4330 = vmatmul.msk.bf16.gmra.mxu1 %vm763_vm3, %v4532_v38 }
 0x2ff   : > { %v5594_v53 = vpop.permute.xlu1 %610 }
 0x300   : > { %8369 = vst [vmem:[#allocation8_spill] sm:$0xff] %v5594_v53 }
 0x307   : > { %v686_v3 = vpop.permute.xlu1 %685 }
 0x309   : > { %4319 = vmatmul.msk.bf16.gmra.mxu0 %vm763_vm3, %v4533_v46 }
 0x30a   : > { %4331 = vmatmul.msk.bf16.gmra.mxu1 %vm763_vm3, %v4533_v46 }
 0x30f   : > { %v5604_v54 = vpop.permute.xlu1 %690 }
 0x310   : > { %8373 = vst [vmem:[#allocation12_spill] sm:$0xff] %v5604_v54 }
 0x317   : > { %v5614_v30 = vpop.permute.xlu1 %655 }
 0x319   : > { %4320 = vmatmul.msk.bf16.gmra.mxu0 %vm763_vm3, %v4534_v49 }
 0x31a   : > { %4332 = vmatmul.msk.bf16.gmra.mxu1 %vm763_vm3, %v4534_v49 }
 0x329   : > { %4321 = vmatmul.msk.bf16.gmra.mxu0 %vm763_vm3, %v4535_v8 }
 0x32a   : > { %4333 = vmatmul.msk.bf16.gmra.mxu1 %vm763_vm3, %v4535_v8 }
 0x336   : > { %v809_v55 = vpop.f32.mrf.mxu0 }
 0x337   : > { %v878_v56 = vpop.f32.mrf.mxu1  ;;  %v810_v59 = vadd.f32 %v809_v55, %v586_v11 }
 0x338   : > { %v879_v61 = vadd.f32 %v878_v56, %v586_v11 }
 0x33a   : > { %v938_v10 = vpack.c.bf16 %v879_v61, %v810_v59 }
 0x33c   : > { %v849_v62 = vpop.f32.mrf.mxu2  ;;  %v998_v12 = vunpack.c.l.b16 %v938_v10  ;;  %v999_v15 = vunpack.c.h.b16 %v938_v10 }
 0x33d   : > { %v850_v0 = vadd.f32 %v849_v62, %v666_v52  ;;  %v918_v1 = vpop.f32.mrf.mxu3 }
 0x33e   : > { %v919_v4 = vadd.f32 %v918_v1, %v666_v52  ;;  %v811_v6 = vpop.f32.mrf.mxu0 }
 0x33f   : > { %v812_v7 = vadd.f32 %v811_v6, %v591_v35  ;;  %v880_v9 = vpop.f32.mrf.mxu1 }
 0x340   : > { %v5598_v57 = vpack.c.bf16 %v919_v4, %v850_v0  ;;  %v881_v60 = vadd.f32 %v880_v9, %v591_v35  ;;  %v5622_v35 = vpop.permute.xlu1 %660 }
 0x342   : > { %8370 = vst [vmem:[#allocation9_spill] sm:$0xff] %v5598_v57  ;;  %v939_v63 = vpack.c.bf16 %v881_v60, %v812_v7  ;;  %v631_v7 = vpop.permute.xlu2 %630 }
 0x344   : > { %v5600_v2 = vpop.f32.mrf.mxu2  ;;  %v1000_v13 = vunpack.c.l.b16 %v939_v63  ;;  %v1001_v16 = vunpack.c.h.b16 %v939_v63 }
 0x345   : > { %8371 = vst [vmem:[#allocation10_spill] sm:$0xff] %v5600_v2  ;;  %v5602_v17 = vpop.f32.mrf.mxu3 }
 0x346   : > { %8372 = vst [vmem:[#allocation11_spill] sm:$0xff] %v5602_v17  ;;  %v814_v45 = vpop.f32.mrf.mxu0  ;;  %v1002_v19 = vpack.c.b16 %v1000_v13, %v998_v12  ;;  %v1003_v48 = vpack.c.b16 %v1001_v16, %v999_v15 }
 0x347   : > { %v815_v20 = vadd.f32 %v814_v45, %v596_v18  ;;  %v883_v51 = vpop.f32.mrf.mxu1 }
 0x348   : > { %v884_v21 = vadd.f32 %v883_v51, %v596_v18  ;;  %1062 = vmatpush.bf16.msrb.mxu2 %v1002_v19  ;;  %1151 = vmatpush.bf16.msrb.mxu3 %v1003_v48  ;;  %v616_v52 = vpop.permute.xlu1 %615 }
 0x34a   : > { %v5606_v22 = vpack.c.bf16 %v884_v21, %v815_v20 }
 0x34c   : > { %8374 = vst [vmem:[#allocation13_spill] sm:$0xff] %v5606_v22  ;;  %v854_v23 = vpop.f32.mrf.mxu2 }
 0x34d   : > { %v855_v24 = vadd.f32 %v854_v23, %v676_v47  ;;  %v923_v25 = vpop.f32.mrf.mxu3 }
 0x34e   : > { %v924_v26 = vadd.f32 %v923_v25, %v676_v47  ;;  %v5608_v27 = vpop.f32.mrf.mxu0 }
 0x34f   : > { %8375 = vst [vmem:[#allocation14_spill] sm:$0xff] %v5608_v27  ;;  %v5610_v28 = vpop.f32.mrf.mxu1 }
 0x350   : > { %8376 = vst [vmem:[#allocation15_spill] sm:$0xff] %v5610_v28  ;;  %v5612_v29 = vpack.c.bf16 %v924_v26, %v855_v24 }
 0x352   : > { %8377 = vst [vmem:[#allocation16_spill] sm:$0xff] %v5612_v29 }
 0x354   : > { %v5616_v39 = vpop.f32.mrf.mxu2 }
 0x355   : > { %8378 = vst [vmem:[#allocation17_spill] sm:$0xff] %v5616_v39  ;;  %v5618_v40 = vpop.f32.mrf.mxu3 }
 0x356   : > { %8379 = vst [vmem:[#allocation18_spill] sm:$0xff] %v5618_v40  ;;  %v819_v41 = vpop.f32.mrf.mxu0 }
 0x357   : > { %v820_v44 = vadd.f32 %v819_v41, %v606_v14  ;;  %v888_v31 = vpop.f32.mrf.mxu1 }
 0x358   : > { %v889_v32 = vadd.f32 %v888_v31, %v606_v14 }
 0x35a   : > { %v5620_v33 = vpack.c.bf16 %v889_v32, %v820_v44 }
 0x35c   : > { %8380 = vst [vmem:[#allocation19_spill] sm:$0xff] %v5620_v33  ;;  %v859_v36 = vpop.f32.mrf.mxu2 }
 0x35d   : > { %v860_v38 = vadd.f32 %v859_v36, %v686_v3  ;;  %v928_v46 = vpop.f32.mrf.mxu3 }
 0x35e   : > { %v929_v47 = vadd.f32 %v928_v46, %v686_v3  ;;  %v5624_v49 = vpop.f32.mrf.mxu0 }
 0x35f   : > { %8381 = vst [vmem:[#allocation20_spill] sm:$0xff] %v5624_v49  ;;  %v5626_v8 = vpop.f32.mrf.mxu1 }
 0x360   : > { %8382 = vst [vmem:[#allocation21_spill] sm:$0xff] %v5626_v8  ;;  %v5628_v11 = vpack.c.bf16 %v929_v47, %v860_v38 }
 0x362   : > { %8383 = vst [vmem:[#allocation22_spill] sm:$0xff] %v5628_v11 }
 0x366   : > { %v824_v55 = vpop.f32.mrf.mxu0 }
 0x367   : > { %v825_v56 = vadd.f32 %v824_v55, %v616_v52  ;;  %v893_v59 = vpop.f32.mrf.mxu1 }
 0x368   : > { %v894_v61 = vadd.f32 %v893_v59, %v616_v52  ;;  %v4539_v59 = vld [vmem:[%s8258_s3 + $0x58] sm:$0xff] }
 0x369   : > { %4325 = vmatmul.msk.bf16.gmra.mxu2 %vm763_vm3, %v4539_v59  ;;  %4337 = vmatmul.msk.bf16.gmra.mxu3 %vm763_vm3, %v4539_v59  ;;  %v4088_v59 = vld [vmem:[%s8261_s6 + $0x18] sm:$0xff] }
 0x36a   : > { %v5630_v14 = vpack.c.bf16 %v894_v61, %v825_v56 }
 0x36c   : > { %8384 = vst [vmem:[#allocation23_spill] sm:$0xff] %v5630_v14 }
 0x36e   : > { %v5632_v62 = vpop.f32.mrf.mxu0 }
 0x36f   : > { %8385 = vst [vmem:[#allocation24_spill] sm:$0xff] %v5632_v62  ;;  %v5634_v0 = vpop.f32.mrf.mxu1 }
 0x370   : > { %8386 = vst [vmem:[#allocation25_spill] sm:$0xff] %v5634_v0 }
 0x376   : > { %v829_v1 = vpop.f32.mrf.mxu0 }
 0x377   : > { %v898_v4 = vpop.f32.mrf.mxu1  ;;  %v830_v3 = vadd.f32 %v829_v1, %v5555_v34 }
 0x378   : > { %v899_v6 = vadd.f32 %v898_v4, %v5555_v34 }
 0x37a   : > { %v946_v63 = vpack.c.bf16 %v899_v6, %v830_v3 }
 0x37c   : > { %v964_v15 = vunpack.c.l.b16 %v946_v63  ;;  %v965_v16 = vunpack.c.h.b16 %v946_v63 }
 0x37e   : > { %v831_v9 = vpop.f32.mrf.mxu0 }
 0x37f   : > { %v832_v10 = vadd.f32 %v831_v9, %v631_v7  ;;  %v900_v60 = vpop.f32.mrf.mxu1 }
 0x380   : > { %v901_v12 = vadd.f32 %v900_v60, %v631_v7 }
 0x382   : > { %v947_v13 = vpack.c.bf16 %v901_v12, %v832_v10 }
 0x384   : > { %v966_v18 = vunpack.c.l.b16 %v947_v13  ;;  %v967_v45 = vunpack.c.h.b16 %v947_v13 }
 0x386   : > { %v834_v19 = vpop.f32.mrf.mxu0  ;;  %v968_v48 = vpack.c.b16 %v966_v18, %v964_v15  ;;  %v969_v20 = vpack.c.b16 %v967_v45, %v965_v16 }
 0x387   : > { %v903_v51 = vpop.f32.mrf.mxu1  ;;  %v835_v21 = vadd.f32 %v834_v19, %v5596_v58 }
 0x388   : > { %972 = vxpose.binary.xlu2.c.b16.start.end [1/2] (short) %v969_v20, %v968_v48, 128  ;;  %v904_v34 = vadd.f32 %v903_v51, %v5596_v58 }
 0x38a   : > { %v948_v26 = vpack.c.bf16 %v904_v34, %v835_v21 }
 0x38c   : > { %v1709_v31 = vunpack.c.l.b16 %v948_v26  ;;  %v1710_v32 = vunpack.c.h.b16 %v948_v26 }
 0x38e   : > { %v836_v23 = vpop.f32.mrf.mxu0 }
 0x38f   : > { %v837_v24 = vadd.f32 %v836_v23, %v5569_v42  ;;  %v905_v25 = vpop.f32.mrf.mxu1 }
 0x390   : > { %v906_v41 = vadd.f32 %v905_v25, %v5569_v42 }
 0x392   : > { %v949_v44 = vpack.c.bf16 %v906_v41, %v837_v24 }
 0x394   : > { %v1711_v36 = vunpack.c.l.b16 %v949_v44  ;;  %v1712_v38 = vunpack.c.h.b16 %v949_v44 }
 0x396   : > { %v839_v46 = vpop.f32.mrf.mxu0  ;;  %v1713_v47 = vpack.c.b16 %v1711_v36, %v1709_v31  ;;  %v1714_v52 = vpack.c.b16 %v1712_v38, %v1710_v32  ;;  %v578_v36 = vld [vmem:[%s8259_s4 + $0x98] sm:$0xff] }
 0x397   : > { %v840_v55 = vadd.f32 %v839_v46, %v5583_v50  ;;  %v908_v56 = vpop.f32.mrf.mxu1  ;;  %v4085_v46 = vld [vmem:[%s8261_s6] sm:$0xff] }
 0x398   : > { %v909_v58 = vadd.f32 %v908_v56, %v5583_v50  ;;  %1717 = vxpose.binary.xlu0.c.b16.start.end [1/2] (short) %v1714_v52, %v1713_v47, 128  ;;  %v4086_v52 = vld [vmem:[%s8261_s6 + $0x8] sm:$0xff]  ;;  %v4087_v56 = vld [vmem:[%s8261_s6 + $0x10] sm:$0xff] }
 0x39a   : > { %v950_v61 = vpack.c.bf16 %v909_v58, %v840_v55 }
 0x39c   : > { %v2453_v34 = vunpack.c.l.b16 %v950_v61  ;;  %v2454_v23 = vunpack.c.h.b16 %v950_v61  ;;  %v581_v61 = vld [vmem:[%s8259_s4 + $0xb0] sm:$0xff] }
 0x39e   : > { %v841_v42 = vpop.f32.mrf.mxu0 }
 0x39f   : > { %v910_v1 = vpop.f32.mrf.mxu1  ;;  %v842_v48 = vadd.f32 %v841_v42, %v5587_v5 }
 0x3a0   : > { %v911_v20 = vadd.f32 %v910_v1, %v5587_v5  ;;  %v4089_v1 = vld [vmem:[%s8261_s6 + $0x20] sm:$0xff] }
 0x3a6   : > { %v844_v4 = vpop.f32.mrf.mxu0 }
 0x3a7   : > { %v913_v3 = vpop.f32.mrf.mxu1  ;;  %v845_v6 = vadd.f32 %v844_v4, %v5614_v30 }
 0x3a8   : > { %v914_v7 = vadd.f32 %v913_v3, %v5614_v30  ;;  %v951_v30 = vpack.c.bf16 %v911_v20, %v842_v48  ;;  %v4090_v3 = vld [vmem:[%s8261_s6 + $0x28] sm:$0xff] }
 0x3aa   : > { %v952_v60 = vpack.c.bf16 %v914_v7, %v845_v6  ;;  %v2455_v51 = vunpack.c.l.b16 %v951_v30  ;;  %v2456_v21 = vunpack.c.h.b16 %v951_v30  ;;  %v5693_v6 = vpop.f32.mrf.mxu3 }
 0x3ab   : > { %8387 = vst [vmem:[#allocation26_spill] sm:$0xff] %v5693_v6 }
 0x3ac   : > { %v3197_v13 = vunpack.c.l.b16 %v952_v60  ;;  %v3198_v15 = vunpack.c.h.b16 %v952_v60  ;;  %v2457_v24 = vpack.c.b16 %v2455_v51, %v2453_v34  ;;  %v2458_v25 = vpack.c.b16 %v2456_v21, %v2454_v23 }
 0x3ae   : > { %v846_v9 = vpop.f32.mrf.mxu0 }
 0x3af   : > { %v847_v50 = vadd.f32 %v846_v9, %v5622_v35  ;;  %v915_v10 = vpop.f32.mrf.mxu1  ;;  %v5695_v9 = vpop.f32.mrf.mxu2 }
 0x3b0   : > { %v916_v63 = vadd.f32 %v915_v10, %v5622_v35  ;;  %8388 = vst [vmem:[#allocation27_spill] sm:$0xff] %v5695_v9 }
 0x3b2   : > { %v953_v12 = vpack.c.bf16 %v916_v63, %v847_v50  ;;  %v4091_v50 = vld [vmem:[%s8261_s6 + $0x30] sm:$0xff] }
 0x3b4   : > { %v3199_v16 = vunpack.c.l.b16 %v953_v12  ;;  %v3200_v18 = vunpack.c.h.b16 %v953_v12  ;;  %v4092_v12 = vld [vmem:[%s8261_s6 + $0x38] sm:$0xff] }
 0x3b6   : > { %v3201_v45 = vpack.c.b16 %v3199_v16, %v3197_v13  ;;  %v3202_v19 = vpack.c.b16 %v3200_v18, %v3198_v15 }
 0x3b8   : > { %3205 = vxpose.binary.xlu1.c.b16.start.end [1/2] (short) %v3202_v19, %v3201_v45, 128 }
 0x3ec   : > { %v5700_v60 = vpop.f32.mrf.mxu3  ;;  %v5704_v63 = vpop.f32.mrf.mxu2 }
 0x3ed   : > { %8389 = vst [vmem:[#allocation28_spill] sm:$0xff] %v5700_v60 }
 0x3ee   : > { %8390 = vst [vmem:[#allocation29_spill] sm:$0xff] %v5704_v63 }
 0x3f4   : > { %v5709_v13 = vpop.f32.mrf.mxu3  ;;  %v5711_v15 = vpop.f32.mrf.mxu2 }
 0x3f5   : > { %8391 = vst [vmem:[#allocation30_spill] sm:$0xff] %v5709_v13 }
 0x3f6   : > { %8392 = vst [vmem:[#allocation31_spill] sm:$0xff] %v5711_v15 }
 0x418   : > { %2461 = vxpose.binary.xlu0.c.b16.start.end [1/2] (short) %v2458_v25, %v2457_v24, 128 }
 0x429   : > { %v980_v35 = vpop.trf.xlu2 }
 0x42a   : > { %4338 = vmatmul.msk.bf16.vlgmr.msrb.gmra.mxu2 %vm1006_vm4, %v980_v35  ;;  %4354 = vmatmul.msk.bf16.vlgmr.msrb.gmra.mxu3 %vm1006_vm4, %v980_v35 }
 0x431   : > { %v981_v26 = vpop.trf.xlu2 }
 0x439   : > { %v982_v41 = vpop.trf.xlu2 }
 0x43a   : > { %4339 = vmatmul.msk.bf16.gmra.mxu2 %vm1006_vm4, %v982_v41  ;;  %4355 = vmatmul.msk.bf16.gmra.mxu3 %vm1006_vm4, %v982_v41 }
 0x441   : > { %v983_v5 = vpop.trf.xlu2 }
 0x449   : > { %v984_v44 = vpop.trf.xlu2 }
 0x44a   : > { %4340 = vmatmul.msk.bf16.gmra.mxu2 %vm1006_vm4, %v984_v44  ;;  %4356 = vmatmul.msk.bf16.gmra.mxu3 %vm1006_vm4, %v984_v44 }
 0x451   : > { %v985_v31 = vpop.trf.xlu2 }
 0x459   : > { %v986_v32 = vpop.trf.xlu2 }
 0x45a   : > { %4341 = vmatmul.msk.bf16.gmra.mxu2 %vm1006_vm4, %v986_v32  ;;  %4357 = vmatmul.msk.bf16.gmra.mxu3 %vm1006_vm4, %v986_v32 }
 0x461   : > { %680 = vperm.xlu2 %4609, %v578_v36   ;;  %v987_v38 = vpop.trf.xlu2 }
 0x469   : > { %4095 = vperm.xlu2 %4609, %v4085_v46   ;;  %v988_v47 = vpop.trf.xlu2 }
 0x46a   : > { %4342 = vmatmul.msk.bf16.gmra.mxu2 %vm1006_vm4, %v988_v47  ;;  %4358 = vmatmul.msk.bf16.gmra.mxu3 %vm1006_vm4, %v988_v47 }
 0x471   : > { %4100 = vperm.xlu2 %4609, %v4086_v52   ;;  %v989_v55 = vpop.trf.xlu2 }
 0x479   : > { %4105 = vperm.xlu2 %4609, %v4087_v56   ;;  %v990_v58 = vpop.trf.xlu2 }
 0x47a   : > { %4343 = vmatmul.msk.bf16.gmra.mxu2 %vm1006_vm4, %v990_v58  ;;  %4359 = vmatmul.msk.bf16.gmra.mxu3 %vm1006_vm4, %v990_v58 }
 0x481   : > { %4110 = vperm.xlu2 %4609, %v4088_v59   ;;  %v991_v42 = vpop.trf.xlu2 }
 0x482   : > { %695 = vperm.xlu1 %4610, %v581_v61  }
 0x489   : > { %4115 = vperm.xlu2 %4609, %v4089_v1   ;;  %v992_v4 = vpop.trf.xlu2 }
 0x48a   : > { %4344 = vmatmul.msk.bf16.gmra.mxu2 %vm1006_vm4, %v992_v4  ;;  %4360 = vmatmul.msk.bf16.gmra.mxu3 %vm1006_vm4, %v992_v4 }
 0x491   : > { %4120 = vperm.xlu2 %4609, %v4090_v3   ;;  %v993_v7 = vpop.trf.xlu2 }
 0x499   : > { %4125 = vperm.xlu2 %4609, %v4091_v50   ;;  %v994_v10 = vpop.trf.xlu2 }
 0x49a   : > { %4345 = vmatmul.msk.bf16.gmra.mxu2 %vm1006_vm4, %v994_v10  ;;  %4361 = vmatmul.msk.bf16.gmra.mxu3 %vm1006_vm4, %v994_v10 }
 0x4a1   : > { %4130 = vperm.xlu2 %4609, %v4092_v12   ;;  %v995_v61 = vpop.trf.xlu2 }
 0x4aa   : > { %4346 = vmatmul.msk.bf16.gmra.mxu2 %vm1006_vm4, %v981_v26  ;;  %4362 = vmatmul.msk.bf16.gmra.mxu3 %vm1006_vm4, %v981_v26 }
 0x4ad   : > { %v5715_v16 = vpop.f32.mrf.mxu2  ;;  %v5717_v18 = vpop.f32.mrf.mxu3 }
 0x4b5   : > { %v5719_v45 = vpop.f32.mrf.mxu2  ;;  %v5721_v19 = vpop.f32.mrf.mxu3 }
 0x4b6   : > { %8393 = vst [vmem:[#allocation32_spill] sm:$0xff] %v5721_v19 }
 0x4ba   : > { %4347 = vmatmul.msk.bf16.gmra.mxu2 %vm1006_vm4, %v983_v5  ;;  %4363 = vmatmul.msk.bf16.gmra.mxu3 %vm1006_vm4, %v983_v5 }
 0x4bd   : > { %v5725_v48 = vpop.f32.mrf.mxu2  ;;  %v5727_v20 = vpop.f32.mrf.mxu3 }
 0x4be   : > { %8394 = vst [vmem:[#allocation33_spill] sm:$0xff] %v5725_v48  ;;  %v1233_v39 = vmax.f32 %v5715_v16, %v5725_v48 }
 0x4bf   : > { %8395 = vst [vmem:[#allocation34_spill] sm:$0xff] %v5727_v20 }
 0x4c5   : > { %v5729_v30 = vpop.f32.mrf.mxu2  ;;  %v5731_v51 = vpop.f32.mrf.mxu3 }
 0x4c6   : > { %8396 = vst [vmem:[#allocation35_spill] sm:$0xff] %v5729_v30  ;;  %v1234_v22 = vmax.f32 %v5719_v45, %v5729_v30 }
 0x4c7   : > { %8397 = vst [vmem:[#allocation36_spill] sm:$0xff] %v5731_v51 }
 0x4ca   : > { %4348 = vmatmul.msk.bf16.gmra.mxu2 %vm1006_vm4, %v985_v31  ;;  %4364 = vmatmul.msk.bf16.gmra.mxu3 %vm1006_vm4, %v985_v31  ;;  %v582_v31 = vld [vmem:[%s8259_s4 + $0xb8] sm:$0xff] }
 0x4cd   : > { %v5735_v21 = vpop.f32.mrf.mxu2  ;;  %v5737_v34 = vpop.f32.mrf.mxu3 }
 0x4ce   : > { %8398 = vst [vmem:[#allocation37_spill] sm:$0xff] %v5735_v21  ;;  %v1235_v28 = vmax.f32 %v1233_v39, %v5735_v21 }
 0x4d5   : > { %v5739_v23 = vpop.f32.mrf.mxu2  ;;  %v5741_v24 = vpop.f32.mrf.mxu3 }
 0x4d6   : > { %8399 = vst [vmem:[#allocation38_spill] sm:$0xff] %v5739_v23  ;;  %v1236_v27 = vmax.f32 %v1234_v22, %v5739_v23 }
 0x4da   : > { %4349 = vmatmul.msk.bf16.gmra.mxu2 %vm1006_vm4, %v987_v38  ;;  %4365 = vmatmul.msk.bf16.gmra.mxu3 %vm1006_vm4, %v987_v38 }
 0x4dd   : > { %v5745_v25 = vpop.f32.mrf.mxu2  ;;  %v5747_v35 = vpop.f32.mrf.mxu3 }
 0x4de   : > { %8400 = vst [vmem:[#allocation39_spill] sm:$0xff] %v5745_v25  ;;  %v1237_v17 = vmax.f32 %v1235_v28, %v5745_v25 }
 0x4e5   : > { %v5749_v26 = vpop.f32.mrf.mxu2  ;;  %v5751_v41 = vpop.f32.mrf.mxu3 }
 0x4e6   : > { %8401 = vst [vmem:[#allocation40_spill] sm:$0xff] %v5751_v41  ;;  %v1238_v2 = vmax.f32 %v1236_v27, %v5749_v26 }
 0x4ea   : > { %4350 = vmatmul.msk.bf16.gmra.mxu2 %vm1006_vm4, %v989_v55  ;;  %4366 = vmatmul.msk.bf16.gmra.mxu3 %vm1006_vm4, %v989_v55 }
 0x4ed   : > { %v5755_v5 = vpop.f32.mrf.mxu2  ;;  %v5757_v44 = vpop.f32.mrf.mxu3 }
 0x4ee   : > { %v1239_v37 = vmax.f32 %v1237_v17, %v5755_v5 }
 0x4f5   : > { %v5762_v32 = vpop.f32.mrf.mxu2  ;;  %v5764_v36 = vpop.f32.mrf.mxu3 }
 0x4f6   : > { %8402 = vst [vmem:[#allocation41_spill] sm:$0xff] %v5764_v36  ;;  %700 = vperm.xlu0 %4611, %v582_v31  }
 0x4fa   : > { %4351 = vmatmul.msk.bf16.gmra.mxu2 %vm1006_vm4, %v991_v42  ;;  %4367 = vmatmul.msk.bf16.gmra.mxu3 %vm1006_vm4, %v991_v42 }
 0x4fd   : > { %v5768_v38 = vpop.f32.mrf.mxu2  ;;  %v5770_v46 = vpop.f32.mrf.mxu3 }
 0x4fe   : > { %v1241_v48 = vmax.f32 %v1239_v37, %v5768_v38 }
 0x505   : > { %v5772_v47 = vpop.f32.mrf.mxu2  ;;  %v5774_v52 = vpop.f32.mrf.mxu3 }
 0x506   : > { %8403 = vst [vmem:[#allocation42_spill] sm:$0xff] %v5774_v52 }
 0x50a   : > { %4352 = vmatmul.msk.bf16.gmra.mxu2 %vm1006_vm4, %v993_v7  ;;  %4368 = vmatmul.msk.bf16.gmra.mxu3 %vm1006_vm4, %v993_v7 }
 0x50d   : > { %v5778_v55 = vpop.f32.mrf.mxu2  ;;  %v5780_v56 = vpop.f32.mrf.mxu3 }
 0x50e   : > { %v1243_v39 = vmax.f32 %v1241_v48, %v5778_v55 }
 0x515   : > { %v5782_v58 = vpop.f32.mrf.mxu2  ;;  %v5784_v59 = vpop.f32.mrf.mxu3 }
 0x516   : > { %8404 = vst [vmem:[#allocation43_spill] sm:$0xff] %v5784_v59 }
 0x51a   : > { %4353 = vmatmul.msk.bf16.gmra.mxu2 %vm1006_vm4, %v995_v61  ;;  %4369 = vmatmul.msk.bf16.gmra.mxu3 %vm1006_vm4, %v995_v61 }
 0x51d   : > { %v5788_v42 = vpop.f32.mrf.mxu2  ;;  %v5790_v1 = vpop.f32.mrf.mxu3 }
 0x51e   : > { %v1245_v21 = vmax.f32 %v1243_v39, %v5788_v42 }
 0x525   : > { %v5792_v4 = vpop.f32.mrf.mxu2  ;;  %v5794_v3 = vpop.f32.mrf.mxu3 }
 0x52d   : > { %v5796_v7 = vpop.f32.mrf.mxu2  ;;  %v5798_v50 = vpop.f32.mrf.mxu3 }
 0x52e   : > { %v1247_v17 = vmax.f32 %v1245_v21, %v5796_v7 }
 0x535   : > { %v5800_v10 = vpop.f32.mrf.mxu2  ;;  %v5802_v12 = vpop.f32.mrf.mxu3 }
 0x536   : > { %8405 = vst [vmem:[#allocation44_spill] sm:$0xff] %v5802_v12 }
 0x53d   : > { %v5804_v31 = vpop.f32.mrf.mxu2  ;;  %v5806_v13 = vpop.f32.mrf.mxu3 }
 0x53e   : > { %v1249_v37 = vmax.f32 %v1247_v17, %v5804_v31 }
 0x545   : > { %v5808_v61 = vpop.f32.mrf.mxu2  ;;  %v5810_v15 = vpop.f32.mrf.mxu3 }
 0x546   : > { %8406 = vst [vmem:[#allocation45_spill] sm:$0xff] %v5808_v61 }
 0x54d   : > { %v5812_v60 = vpop.f32.mrf.mxu2  ;;  %v5814_v63 = vpop.f32.mrf.mxu3 }
 0x54e   : > { %v1251_v48 = vmax.f32 %v1249_v37, %v5812_v60 }
 0x555   : > { %v5816_v14 = vpop.f32.mrf.mxu2  ;;  %v5818_v0 = vpop.f32.mrf.mxu3 }
 0x556   : > { %8407 = vst [vmem:[#allocation46_spill] sm:$0xff] %v5818_v0 }
 0x55d   : > { %v5820_v62 = vpop.f32.mrf.mxu2  ;;  %v5822_v11 = vpop.f32.mrf.mxu3 }
 0x565   : > { %v5824_v6 = vpop.f32.mrf.mxu2  ;;  %v5826_v9 = vpop.f32.mrf.mxu3 }
 0x566   : > { %8408 = vst [vmem:[#allocation47_spill] sm:$0xff] %v5826_v9 }
 0x56d   : > { %v5828_v54 = vpop.f32.mrf.mxu2  ;;  %v5830_v33 = vpop.f32.mrf.mxu3 }
 0x56e   : > { %8409 = vst [vmem:[#allocation48_spill] sm:$0xff] %v5830_v33 }
 0x575   : > { %v5832_v8 = vpop.f32.mrf.mxu2  ;;  %v5834_v49 = vpop.f32.mrf.mxu3 }
 0x576   : > { %8410 = vst [vmem:[#allocation49_spill] sm:$0xff] %v5834_v49 }
 0x57d   : > { %v5836_v53 = vpop.f32.mrf.mxu2  ;;  %v5838_v29 = vpop.f32.mrf.mxu3 }
 0x57e   : > { %8411 = vst [vmem:[#allocation50_spill] sm:$0xff] %v5838_v29  ;;  %v1240_v29 = vmax.f32 %v1238_v2, %v5762_v32 }
 0x580   : > { %v1242_v30 = vmax.f32 %v1240_v29, %v5772_v47  ;;  %v1271_v29 = vmax.f32 %v5721_v19, %v5731_v51 }
 0x582   : > { %v1244_v22 = vmax.f32 %v1242_v30, %v5782_v58  ;;  %v1273_v21 = vmax.f32 %v1271_v29, %v5741_v24 }
 0x584   : > { %v1246_v28 = vmax.f32 %v1244_v22, %v5792_v4  ;;  %v1270_v22 = vmax.f32 %v5717_v18, %v5727_v20 }
 0x585   : > { %v5840_v40 = vpop.f32.mrf.mxu2  ;;  %v5848_v43 = vpop.f32.mrf.mxu3 }
 0x586   : > { %v1248_v2 = vmax.f32 %v1246_v28, %v5800_v10  ;;  %v1253_v28 = vmax.f32 %v1251_v48, %v5820_v62 }
 0x588   : > { %v1250_v27 = vmax.f32 %v1248_v2, %v5808_v61  ;;  %v1272_v2 = vmax.f32 %v1270_v22, %v5737_v34  ;;  %v1275_v61 = vmax.f32 %v1273_v21, %v5751_v41  ;;  %v1255_v51 = vmax.f32 %v1253_v28, %v5828_v54 }
 0x58a   : > { %v1252_v30 = vmax.f32 %v1250_v27, %v5816_v14  ;;  %v1274_v19 = vmax.f32 %v1272_v2, %v5747_v35  ;;  %v1277_v20 = vmax.f32 %v1275_v61, %v5764_v36  ;;  %v1257_v29 = vmax.f32 %v1255_v51, %v5836_v53 }
 0x58c   : > { %v1254_v17 = vmax.f32 %v1252_v30, %v5824_v6  ;;  %v1276_v30 = vmax.f32 %v1274_v19, %v5757_v44  ;;  %v1279_v22 = vmax.f32 %v1277_v20, %v5774_v52 }
 0x58d   : > { %v5850_v57 = vpop.f32.mrf.mxu2  ;;  %v5864_v25 = vpop.f32.mrf.mxu3 }
 0x58e   : > { %v1256_v37 = vmax.f32 %v1254_v17, %v5832_v8  ;;  %v1259_v21 = vmax.f32 %v1257_v29, %v5850_v57  ;;  %v1278_v17 = vmax.f32 %v1276_v30, %v5770_v46  ;;  %v1281_v2 = vmax.f32 %v1279_v22, %v5784_v59 }
 0x590   : > { %v1258_v48 = vmax.f32 %v1256_v37, %v5840_v40  ;;  %v1280_v37 = vmax.f32 %v1278_v17, %v5780_v56  ;;  %v1283_v19 = vmax.f32 %v1281_v2, %v5794_v3 }
 0x592   : > { %v1282_v20 = vmax.f32 %v1280_v37, %v5790_v1  ;;  %v1285_v29 = vmax.f32 %v1283_v19, %v5802_v12 }
 0x594   : > { %v1284_v30 = vmax.f32 %v1282_v20, %v5798_v50  ;;  %v1287_v22 = vmax.f32 %v1285_v29, %v5810_v15 }
 0x595   : > { %v5860_v23 = vpop.f32.mrf.mxu2  ;;  %v5885_v27 = vpop.f32.mrf.mxu3 }
 0x596   : > { %v1260_v28 = vmax.f32 %v1258_v48, %v5860_v23 }
 0x59d   : > { %v5874_v39 = vpop.f32.mrf.mxu2  ;;  %v5905_v52 = vpop.f32.mrf.mxu3 }
 0x59e   : > { %v1261_v61 = vmax.f32 %v1259_v21, %v5874_v39  ;;  %v1286_v21 = vmax.f32 %v1284_v30, %v5806_v13 }
 0x5a0   : > { %v1288_v2 = vmax.f32 %v1286_v21, %v5814_v63 }
 0x5a2   : > { %v1290_v37 = vmax.f32 %v1288_v2, %v5822_v11 }
 0x5a4   : > { %v1292_v20 = vmax.f32 %v1290_v37, %v5830_v33  ;;  %v8417_v33 = vld [vmem:[#allocation39_spill] sm:$0xff] }
 0x5a5   : > { %v5895_v41 = vpop.f32.mrf.mxu2 }
 0x5a6   : > { %v1262_v51 = vmax.f32 %v1260_v28, %v5895_v41  ;;  %v1289_v28 = vmax.f32 %v1287_v22, %v5818_v0 }
 0x5a8   : > { %v1263_v36 = vmax.f32 %v1261_v61, %v1262_v51  ;;  %v1291_v61 = vmax.f32 %v1289_v28, %v5826_v9 }
 0x5aa   : > { %v1264_v48 = vrot.slane %v1263_v36, 4  ;;  %v1293_v19 = vmax.f32 %v1291_v61, %v5834_v49  ;;  %v8413_v61 = vld [vmem:[#allocation33_spill] sm:$0xff] }
 0x5ac   : > { %v1265_v59 = vmax.f32 %v1263_v36, %v1264_v48  ;;  %v1295_v29 = vmax.f32 %v1293_v19, %v5848_v43  ;;  %v5917_v36 = vpop.f32.mrf.mxu3  ;;  %v8412_v48 = vld [vmem:[#allocation50_spill] sm:$0xff] }
 0x5ad   : > { %v1294_v30 = vmax.f32 %v1292_v20, %v8412_v48  ;;  %v8414_v20 = vld [vmem:[#allocation35_spill] sm:$0xff] }
 0x5ae   : > { %v1266_v17 = vrot.slane %v1265_v59, 2  ;;  %v1297_v22 = vmax.f32 %v1295_v29, %v5885_v27 }
 0x5af   : > { %v1296_v21 = vmax.f32 %v1294_v30, %v5864_v25  ;;  %v8415_v30 = vld [vmem:[#allocation37_spill] sm:$0xff] }
 0x5b0   : > { %v1267_v51 = vmax.f32 %v1265_v59, %v1266_v17  ;;  %v1299_v59 = vmax.f32 %v1297_v22, %v5917_v36 }
 0x5b1   : > { %v1298_v28 = vmax.f32 %v1296_v21, %v5905_v52 }
 0x5b2   : > { %v1268_v12 = vrot.slane %v1267_v51, 1 }
 0x5b3   : > { %v1300_v19 = vmax.f32 %v1298_v28, %v1299_v59 }
 0x5b4   : > { %v5921_v0 = vmax.f32 %v1267_v51, %v1268_v12 }
 0x5b5   : > { %v1301_v21 = vrot.slane %v1300_v19, 4 }
 0x5b6   : > { %v1307_v17 = vsub.f32 %v5715_v16, %v5921_v0  ;;  %v1309_v2 = vsub.f32 %v5719_v45, %v5921_v0  ;;  %v1311_v37 = vsub.f32 %v8413_v61, %v5921_v0  ;;  %v1313_v12 = vsub.f32 %v8414_v20, %v5921_v0  ;;  %v8416_v16 = vld [vmem:[#allocation38_spill] sm:$0xff] }
 0x5b7   : > { %v1315_v22 = vsub.f32 %v8415_v30, %v5921_v0  ;;  %v1317_v49 = vsub.f32 %v8416_v16, %v5921_v0  ;;  %v1319_v61 = vsub.f32 %v8417_v33, %v5921_v0  ;;  %v1302_v28 = vmax.f32 %v1300_v19, %v1301_v21 }
 0x5b8   : > { %v1371_v51 = vmul.f32 1.442695, %v1307_v17  ;;  %v1375_v29 = vmul.f32 1.442695, %v1309_v2  ;;  %v1379_v9 = vmul.f32 1.442695, %v1311_v37  ;;  %v1321_v17 = vsub.f32 %v5749_v26, %v5921_v0 }
 0x5b9   : > { %v1383_v45 = vmul.f32 1.442695, %v1313_v12  ;;  %v1387_v59 = vmul.f32 1.442695, %v1315_v22  ;;  %v1391_v2 = vmul.f32 1.442695, %v1317_v49  ;;  %v1323_v37 = vsub.f32 %v5755_v5, %v5921_v0 }
 0x5ba   : > { %4614 = vpow2.f32 %v1371_v51  ;;  %v1325_v12 = vsub.f32 %v5762_v32, %v5921_v0  ;;  %v1395_v33 = vmul.f32 1.442695, %v1319_v61  ;;  %v1303_v19 = vrot.slane %v1302_v28, 2 }
 0x5bb   : > { %4616 = vpow2.f32 %v1375_v29  ;;  %v1329_v29 = vsub.f32 %v5772_v47, %v5921_v0  ;;  %v1399_v5 = vmul.f32 1.442695, %v1321_v17  ;;  %v1331_v30 = vsub.f32 %v5778_v55, %v5921_v0 }
 0x5bc   : > { %4618 = vpow2.f32 %v1379_v9  ;;  %v1327_v9 = vsub.f32 %v5768_v38, %v5921_v0  ;;  %v1403_v32 = vmul.f32 1.442695, %v1323_v37  ;;  %v1333_v38 = vsub.f32 %v5782_v58, %v5921_v0 }
 0x5bd   : > { %4620 = vpow2.f32 %v1383_v45  ;;  %v1407_v16 = vmul.f32 1.442695, %v1325_v12  ;;  %v1335_v45 = vsub.f32 %v5788_v42, %v5921_v0  ;;  %v1337_v55 = vsub.f32 %v5792_v4, %v5921_v0 }
 0x5be   : > { %4622 = vpow2.f32 %v1387_v59  ;;  %v1411_v61 = vmul.f32 1.442695, %v1327_v9  ;;  %v1304_v59 = vmax.f32 %v1302_v28, %v1303_v19  ;;  %v1339_v37 = vsub.f32 %v5796_v7, %v5921_v0 }
 0x5bf   : > { %4624 = vpow2.f32 %v1391_v2  ;;  %v1415_v2 = vmul.f32 1.442695, %v1329_v29  ;;  %v1419_v58 = vmul.f32 1.442695, %v1331_v30  ;;  %v1341_v42 = vsub.f32 %v5800_v10, %v5921_v0  ;;  %v8421_v29 = vld [vmem:[#allocation45_spill] sm:$0xff] }
 0x5c0   : > { %v5942_v20 = vpop.eup %4614  ;;  %4626 = vpow2.f32 %v1395_v33  ;;  %v1343_v28 = vsub.f32 %v5804_v31, %v5921_v0  ;;  %v1423_v9 = vmul.f32 1.442695, %v1333_v38  ;;  %v1427_v4 = vmul.f32 1.442695, %v1335_v45 }
 0x5c1   : > { %8418 = vst [vmem:[#allocation50_spill] sm:$0xff] %v5942_v20  ;;  %v5946_v51 = vpop.eup %4616  ;;  %4628 = vpow2.f32 %v1399_v5  ;;  %v1305_v19 = vrot.slane %v1304_v59, 1  ;;  %v1345_v5 = vsub.f32 %v8421_v29, %v5921_v0  ;;  %v1431_v30 = vmul.f32 1.442695, %v1337_v55 }
 0x5c2   : > { %8419 = vst [vmem:[#allocation33_spill] sm:$0xff] %v5946_v51  ;;  %v1499_v26 = vadd.f32 %v5946_v51, %v5942_v20  ;;  %v5954_v49 = vpop.eup %4618  ;;  %4630 = vpow2.f32 %v1403_v32  ;;  %v1347_v10 = vsub.f32 %v5812_v60, %v5921_v0  ;;  %v1435_v32 = vmul.f32 1.442695, %v1339_v37 }
 0x5c3   : > { %v5961_v21 = vpop.eup %4620  ;;  %4632 = vpow2.f32 %v1407_v16  ;;  %v1349_v38 = vsub.f32 %v5816_v14, %v5921_v0  ;;  %v1351_v16 = vsub.f32 %v5820_v62, %v5921_v0  ;;  %v1439_v45 = vmul.f32 1.442695, %v1341_v42 }
 0x5c4   : > { %v1500_v22 = vadd.f32 %v5954_v49, %v1499_v26  ;;  %8420 = vst [vmem:[#allocation35_spill] sm:$0xff] %v5961_v21  ;;  %v5968_v17 = vpop.eup %4622  ;;  %4634 = vpow2.f32 %v1411_v61  ;;  %v5998_v55 = vmax.f32 %v1304_v59, %v1305_v19  ;;  %v1363_v37 = vsub.f32 %v5850_v57, %v5921_v0 }
 0x5c5   : > { %v5975_v33 = vpop.eup %4624  ;;  %4636 = vpow2.f32 %v1415_v2  ;;  %v1447_v14 = vmul.f32 1.442695, %v1345_v5  ;;  %v1367_v62 = vsub.f32 %v5874_v39, %v5921_v0  ;;  %v1369_v59 = vsub.f32 %v5895_v41, %v5921_v0  ;;  %v8422_v5 = vld [vmem:[#allocation32_spill] sm:$0xff] }
 0x5c6   : > { %v1501_v47 = vadd.f32 %v5961_v21, %v1500_v22  ;;  %v5982_v7 = vpop.eup %4626  ;;  %4638 = vpow2.f32 %v1419_v58  ;;  %v1459_v57 = vmul.f32 1.442695, %v1351_v16  ;;  %v1308_v39 = vsub.f32 %v5717_v18, %v5998_v55  ;;  %v8423_v16 = vld [vmem:[#allocation34_spill] sm:$0xff] }
 0x5c7   : > { %v5989_v22 = vpop.eup %4628  ;;  %4640 = vpow2.f32 %v1423_v9  ;;  %v1455_v9 = vmul.f32 1.442695, %v1349_v38  ;;  %v1483_v29 = vmul.f32 1.442695, %v1363_v37  ;;  %v1365_v41 = vsub.f32 %v5860_v23, %v5921_v0 }
 0x5c8   : > { %v1502_v12 = vadd.f32 %v5968_v17, %v1501_v47  ;;  %v5995_v61 = vpop.eup %4630  ;;  %4642 = vpow2.f32 %v1427_v4  ;;  %v1443_v47 = vmul.f32 1.442695, %v1343_v28  ;;  %v1495_v18 = vmul.f32 1.442695, %v1369_v59 }
 0x5c9   : > { %v6000_v2 = vpop.eup %4632  ;;  %4644 = vpow2.f32 %v1431_v30  ;;  %v1310_v30 = vsub.f32 %v8422_v5, %v5998_v55  ;;  %v1373_v23 = vmul.f32 1.442695, %v1308_v39  ;;  %v8425_v5 = vld [vmem:[#allocation6_spill] sm:$0xff] }
 0x5ca   : > { %v1503_v26 = vadd.f32 %v5975_v33, %v1502_v12  ;;  %v6004_v58 = vpop.eup %4634  ;;  %4646 = vpow2.f32 %v1435_v32  ;;  %v1451_v12 = vmul.f32 1.442695, %v1347_v10  ;;  %v1491_v32 = vmul.f32 1.442695, %v1367_v62  ;;  %v8424_v62 = vld [vmem:[#allocation36_spill] sm:$0xff]  ;;  %v8426_v39 = vld [vmem:[#allocation10_spill] sm:$0xff] }
 0x5cb   : > { %v6009_v28 = vpop.eup %4636  ;;  %4648 = vpow2.f32 %v1439_v45  ;;  %v1312_v45 = vsub.f32 %v8423_v16, %v5998_v55 }
 0x5cc   : > { %v1504_v31 = vadd.f32 %v5982_v7, %v1503_v26  ;;  %v6013_v4 = vpop.eup %4638  ;;  %4650 = vpow2.f32 %v1443_v47 }
 0x5cd   : > { %v6018_v19 = vpop.eup %4640  ;;  %4652 = vpow2.f32 %v1447_v14  ;;  %v1381_v16 = vmul.f32 1.442695, %v1312_v45 }
 0x5ce   : > { %v1505_v60 = vadd.f32 %v5989_v22, %v1504_v31  ;;  %v6022_v10 = vpop.eup %4642  ;;  %4654 = vpow2.f32 %v1451_v12  ;;  %v1314_v12 = vsub.f32 %v8424_v62, %v5998_v55  ;;  %v1355_v62 = vsub.f32 %v5828_v54, %v5921_v0 }
 0x5cf   : > { %v6027_v38 = vpop.eup %4644  ;;  %4656 = vpow2.f32 %v1455_v9  ;;  %v1361_v9 = vsub.f32 %v5840_v40, %v5921_v0 }
 0x5d0   : > { %v1506_v42 = vadd.f32 %v5995_v61, %v1505_v60  ;;  %v6031_v47 = vpop.eup %4646  ;;  %v1359_v60 = vsub.f32 %v5836_v53, %v5921_v0  ;;  %4658 = vpow2.f32 %v1459_v57 }
 0x5d1   : > { %v6036_v14 = vpop.eup %4648  ;;  %4660 = vpow2.f32 %v1483_v29  ;;  %v1316_v29 = vsub.f32 %v5737_v34, %v5998_v55  ;;  %v1385_v34 = vmul.f32 1.442695, %v1314_v12  ;;  %v1479_v54 = vmul.f32 1.442695, %v1361_v9 }
 0x5d2   : > { %v1507_v26 = vadd.f32 %v6000_v2, %v1506_v42  ;;  %v1377_v42 = vmul.f32 1.442695, %v1310_v30  ;;  %v6040_v59 = vpop.eup %4650  ;;  %4662 = vpow2.f32 %v1491_v32  ;;  %v1475_v40 = vmul.f32 1.442695, %v1359_v60 }
 0x5d3   : > { %v6045_v57 = vpop.eup %4652  ;;  %4664 = vpow2.f32 %v1495_v18  ;;  %v1318_v18 = vsub.f32 %v5741_v24, %v5998_v55  ;;  %v1389_v24 = vmul.f32 1.442695, %v1316_v29  ;;  %v1353_v12 = vsub.f32 %v5824_v6, %v5921_v0 }
 0x5d4   : > { %v1508_v31 = vadd.f32 %v6004_v58, %v1507_v26  ;;  %v1487_v26 = vmul.f32 1.442695, %v1365_v41  ;;  %v6051_v30 = vpop.eup %4654  ;;  %4666 = vpow2.f32 %v1373_v23 }
 0x5d5   : > { %v6056_v32 = vpop.eup %4656  ;;  %4668 = vpow2.f32 %v1377_v42 }
 0x5d6   : > { %v1509_v37 = vadd.f32 %v6009_v28, %v1508_v31  ;;  %v852_v31 = vadd.f32 %v8426_v39, %v8425_v5  ;;  %v6062_v45 = vpop.eup %4658  ;;  %v1357_v39 = vsub.f32 %v5832_v8, %v5921_v0  ;;  %4670 = vpow2.f32 %v1487_v26 }
 0x5d7   : > { %v6067_v23 = vpop.eup %4660  ;;  %4672 = vpow2.f32 %v1381_v16  ;;  %v1587_v0 = vpack.c.bf16 %v6027_v38, %v6022_v10 }
 0x5d8   : > { %v1510_v53 = vadd.f32 %v6013_v4, %v1509_v37  ;;  %v8427_v37 = vld [vmem:[#allocation11_spill] sm:$0xff]  ;;  %v6072_v42 = vpop.eup %4662  ;;  %4674 = vpow2.f32 %v1475_v40  ;;  %v1471_v29 = vmul.f32 1.442695, %v1357_v39 }
 0x5d9   : > { %v921_v51 = vadd.f32 %v8427_v37, %v8425_v5  ;;  %v1320_v5 = vsub.f32 %v5747_v35, %v5998_v55  ;;  %v1467_v37 = vmul.f32 1.442695, %v1355_v62  ;;  %v6077_v9 = vpop.eup %4664  ;;  %4676 = vpow2.f32 %v1385_v34  ;;  %1615 = vmatpush.bf16.msrb.mxu0 %v1587_v0 }
 0x5da   : > { %v1511_v41 = vadd.f32 %v6018_v19, %v1510_v53  ;;  %v8428_v53 = vld [vmem:[#allocation9_spill] sm:$0xff]  ;;  %v1393_v35 = vmul.f32 1.442695, %v1318_v18  ;;  %v6083_v16 = vpop.eup %4666  ;;  %4678 = vpow2.f32 %v1479_v54  ;;  %v1603_v62 = vpack.c.bf16 %v6077_v9, %v6072_v42 }
 0x5db   : > { %v6079_v26 = vpack.c.bf16 %v921_v51, %v852_v31  ;;  %v6088_v6 = vpop.eup %4668  ;;  %v1324_v51 = vsub.f32 %v5757_v44, %v5998_v55  ;;  %4680 = vpow2.f32 %v1389_v24  ;;  %v1397_v31 = vmul.f32 1.442695, %v1320_v5  ;;  %v8430_v44 = vld [vmem:[#allocation41_spill] sm:$0xff] }
 0x5dc   : > { %v1512_v60 = vadd.f32 %v6022_v10, %v1511_v41  ;;  %v8429_v41 = vld [vmem:[#allocation40_spill] sm:$0xff]  ;;  %v6094_v40 = vpop.eup %4670  ;;  %v1463_v18 = vmul.f32 1.442695, %v1353_v12  ;;  %4682 = vpow2.f32 %v1467_v37  ;;  %v1536_v39 = vadd.f32 %v6088_v6, %v6083_v16  ;;  %1629 = vmatpush.bf16.msrb.mxu1 %v1603_v62 }
 0x5dd   : > { %v1322_v20 = vsub.f32 %v8429_v41, %v5998_v55  ;;  %v6099_v10 = vpop.eup %4672  ;;  %v1326_v54 = vsub.f32 %v8430_v44, %v5998_v55  ;;  %4684 = vpow2.f32 %v1393_v35  ;;  %v1585_v12 = vpack.c.bf16 %v6018_v19, %v6013_v4 }
 0x5de   : > { %v1513_v8 = vadd.f32 %v6027_v38, %v1512_v60  ;;  %v6104_v5 = vpop.eup %4674  ;;  %4686 = vpow2.f32 %v1471_v29  ;;  %v1405_v41 = vmul.f32 1.442695, %v1324_v51  ;;  %v1368_v29 = vsub.f32 %v5905_v52, %v5998_v55 }
 0x5df   : > { %v1401_v60 = vmul.f32 1.442695, %v1322_v20  ;;  %v6110_v37 = vpop.eup %4676  ;;  %4688 = vpow2.f32 %v1397_v31  ;;  %v1601_v20 = vpack.c.bf16 %v6094_v40, %v6067_v23  ;;  %1616 = vmatpush.bf16.msrb.mxu0 %v1585_v12  ;;  %v1409_v31 = vmul.f32 1.442695, %v1326_v54  ;;  %v8432_v12 = vld [vmem:[#allocation43_spill] sm:$0xff] }
 0x5e0   : > { %v1514_v21 = vadd.f32 %v6031_v47, %v1513_v8  ;;  %v1328_v8 = vsub.f32 %v5770_v46, %v5998_v55  ;;  %v6116_v35 = vpop.eup %4678  ;;  %4690 = vpow2.f32 %v1463_v18  ;;  %v8431_v46 = vld [vmem:[#allocation42_spill] sm:$0xff]  ;;  %v1332_v18 = vsub.f32 %v5780_v56, %v5998_v55 }
 0x5e1   : > { %v6121_v4 = vpop.eup %4680  ;;  %v1330_v51 = vsub.f32 %v8431_v46, %v5998_v55  ;;  %4692 = vpow2.f32 %v1401_v60  ;;  %1630 = vmatpush.bf16.msrb.mxu1 %v1601_v20  ;;  %v1334_v19 = vsub.f32 %v8432_v12, %v5998_v55  ;;  %v1599_v54 = vpack.c.bf16 %v6116_v35, %v6104_v5 }
 0x5e2   : > { %v1515_v34 = vadd.f32 %v6036_v14, %v1514_v21  ;;  %v1537_v21 = vadd.f32 %v6099_v10, %v1536_v39  ;;  %4694 = vpow2.f32 %v1405_v41  ;;  %v1413_v60 = vmul.f32 1.442695, %v1328_v8  ;;  %v8433_v41 = vld [vmem:[#allocation44_spill] sm:$0xff] }
 0x5e3   : > { %v1336_v56 = vsub.f32 %v5790_v1, %v5998_v55  ;;  %v1340_v8 = vsub.f32 %v5798_v50, %v5998_v55  ;;  %v1342_v46 = vsub.f32 %v8433_v41, %v5998_v55  ;;  %4696 = vpow2.f32 %v1409_v31 }
 0x5e4   : > { %v1516_v24 = vadd.f32 %v6040_v59, %v1515_v34  ;;  %v1538_v62 = vadd.f32 %v6110_v37, %v1537_v21  ;;  %v4683_v34 = vpop.eup %4682  ;;  %v1417_v12 = vmul.f32 1.442695, %v1330_v51  ;;  %v1346_v50 = vsub.f32 %v5810_v15, %v5998_v55 }
 0x5e5   : > { %v6132_v21 = vpop.eup %4684  ;;  %1631 = vmatpush.bf16.msrb.mxu1 %v1599_v54  ;;  %4698 = vpow2.f32 %v1413_v60  ;;  %v1421_v31 = vmul.f32 1.442695, %v1332_v18  ;;  %v1425_v41 = vmul.f32 1.442695, %v1334_v19  ;;  %v1429_v15 = vmul.f32 1.442695, %v1336_v56 }
 0x5e6   : > { %v1517_v0 = vadd.f32 %v6045_v57, %v1516_v24  ;;  %v1539_v44 = vadd.f32 %v6121_v4, %v1538_v62  ;;  %v1583_v24 = vpack.c.bf16 %v6009_v28, %v6004_v58  ;;  %v4687_v20 = vpop.eup %4686  ;;  %v1338_v62 = vsub.f32 %v5794_v3, %v5998_v55 }
 0x5e7   : > { %v6144_v28 = vpop.eup %4688  ;;  %v1344_v3 = vsub.f32 %v5806_v13, %v5998_v55  ;;  %v1597_v51 = vpack.c.bf16 %v4687_v20, %v4683_v34  ;;  %4700 = vpow2.f32 %v1417_v12  ;;  %v1579_v19 = vpack.c.bf16 %v5989_v22, %v5982_v7 }
 0x5e8   : > { %v1518_v39 = vadd.f32 %v6051_v30, %v1517_v0  ;;  %v1540_v58 = vadd.f32 %v6132_v21, %v1539_v44  ;;  %1617 = vmatpush.bf16.msrb.mxu0 %v1583_v24  ;;  %v1581_v24 = vpack.c.bf16 %v6000_v2, %v5995_v61  ;;  %v8434_v61 = vld [vmem:[#allocation46_spill] sm:$0xff]  ;;  %v1433_v60 = vmul.f32 1.442695, %v1338_v62 }
 0x5e9   : > { %1632 = vmatpush.bf16.msrb.mxu1 %v1597_v51  ;;  %v1370_v2 = vsub.f32 %v5917_v36, %v5998_v55  ;;  %4702 = vpow2.f32 %v1421_v31  ;;  %v1366_v7 = vsub.f32 %v5885_v27, %v5998_v55  ;;  %v1441_v22 = vmul.f32 1.442695, %v1342_v46 }
 0x5ea   : > { %v1519_v0 = vadd.f32 %v6056_v32, %v1518_v39  ;;  %v4691_v39 = vpop.eup %4690  ;;  %v1541_v44 = vadd.f32 %v6144_v28, %v1540_v58  ;;  %4704 = vpow2.f32 %v1425_v41  ;;  %v1360_v27 = vsub.f32 %v8412_v48, %v5998_v55 }
 0x5eb   : > { %v6156_v38 = vpop.eup %4692  ;;  %v1595_v52 = vpack.c.bf16 %v4691_v39, %v6062_v45  ;;  %4706 = vpow2.f32 %v1429_v15  ;;  %v1497_v31 = vmul.f32 1.442695, %v1370_v2  ;;  %v1489_v41 = vmul.f32 1.442695, %v1366_v7  ;;  %v8436_v15 = vld [vmem:[#allocation48_spill] sm:$0xff] }
 0x5ec   : > { %v1520_v1 = vadd.f32 %v6062_v45, %v1519_v0  ;;  %v1348_v0 = vsub.f32 %v5814_v63, %v5998_v55  ;;  %v1542_v13 = vadd.f32 %v6156_v38, %v1541_v44  ;;  %1618 = vmatpush.bf16.msrb.mxu0 %v1581_v24  ;;  %v6163_v58 = vpop.eup %4694  ;;  %v1364_v24 = vsub.f32 %v5864_v25, %v5998_v55 }
 0x5ed   : > { %v6172_v44 = vpop.eup %4696  ;;  %v1493_v25 = vmul.f32 1.442695, %v1368_v29  ;;  %1633 = vmatpush.bf16.msrb.mxu1 %v1595_v52  ;;  %4708 = vpow2.f32 %v1433_v60  ;;  %v1593_v29 = vpack.c.bf16 %v6056_v32, %v6051_v30  ;;  %v8435_v32 = vld [vmem:[#allocation35_spill] sm:$0xff]  ;;  %v1449_v60 = vmul.f32 1.442695, %v1346_v50 }
 0x5ee   : > { %v1521_v54 = vadd.f32 %v4691_v39, %v1520_v1  ;;  %v1543_v1 = vadd.f32 %v6163_v58, %v1542_v13  ;;  %v6180_v12 = vpop.eup %4698  ;;  %v1352_v39 = vsub.f32 %v5822_v11, %v5998_v55  ;;  %v1485_v46 = vmul.f32 1.442695, %v1364_v24  ;;  %v8437_v24 = vld [vmem:[#allocation49_spill] sm:$0xff] }
 0x5ef   : > { %v1358_v52 = vsub.f32 %v8437_v24, %v5998_v55 }
 0x5f0   : > { %v1522_v18 = vadd.f32 %v4683_v34, %v1521_v54  ;;  %v1437_v34 = vmul.f32 1.442695, %v1340_v8  ;;  %v1544_v62 = vadd.f32 %v6172_v44, %v1543_v1  ;;  %1619 = vmatpush.bf16.msrb.mxu0 %v1579_v19  ;;  %v6188_v8 = vpop.eup %4700  ;;  %v1445_v54 = vmul.f32 1.442695, %v1344_v3 }
 0x5f1   : > { %1634 = vmatpush.bf16.msrb.mxu1 %v1593_v29  ;;  %v1477_v19 = vmul.f32 1.442695, %v1360_v27 }
 0x5f2   : > { %v1523_v56 = vadd.f32 %v4687_v20, %v1522_v18  ;;  %v1545_v45 = vadd.f32 %v6180_v12, %v1544_v62  ;;  %v1577_v20 = vpack.c.bf16 %v5975_v33, %v5968_v17  ;;  %4710 = vpow2.f32 %v1437_v34  ;;  %v6198_v17 = vpop.eup %4702  ;;  %v8439_v34 = vld [vmem:[#allocation33_spill] sm:$0xff] }
 0x5f3   : > { %v1362_v33 = vsub.f32 %v5848_v43, %v5998_v55  ;;  %4712 = vpow2.f32 %v1441_v22  ;;  %v4705_v48 = vpop.eup %4704  ;;  %v1356_v18 = vsub.f32 %v8436_v15, %v5998_v55  ;;  %v1591_v43 = vpack.c.bf16 %v6045_v57, %v6040_v59 }
 0x5f4   : > { %v1524_v36 = vadd.f32 %v6104_v5, %v1523_v56  ;;  %v1546_v51 = vadd.f32 %v6188_v8, %v1545_v45  ;;  %1620 = vmatpush.bf16.msrb.mxu0 %v1577_v20  ;;  %4714 = vpow2.f32 %v1493_v25  ;;  %v4707_v2 = vpop.eup %4706  ;;  %v8440_v22 = vsub.f32 %v8434_v61, %v5998_v55 }
 0x5f5   : > { %4716 = vpow2.f32 %v1497_v31  ;;  %v4709_v3 = vpop.eup %4708  ;;  %v1481_v56 = vmul.f32 1.442695, %v1362_v33  ;;  %1635 = vmatpush.bf16.msrb.mxu1 %v1591_v43  ;;  %v1469_v45 = vmul.f32 1.442695, %v1356_v18  ;;  %v8441_v31 = vld [vmem:[#allocation47_spill] sm:$0xff] }
 0x5f6   : > { %v1525_v5 = vadd.f32 %v6116_v35, %v1524_v36  ;;  %v1547_v30 = vadd.f32 %v6198_v17, %v1546_v51  ;;  %v1575_v35 = vpack.c.bf16 %v8435_v32, %v5954_v49  ;;  %4718 = vpow2.f32 %v1485_v46 }
 0x5f7   : > { %v1453_v49 = vmul.f32 1.442695, %v1348_v0  ;;  %4720 = vpow2.f32 %v1489_v41  ;;  %v1457_v63 = vmul.f32 1.442695, %v8440_v22  ;;  %v1589_v0 = vpack.c.bf16 %v6036_v14, %v6031_v47 }
 0x5f8   : > { %v1526_v13 = vadd.f32 %v6067_v23, %v1525_v5  ;;  %v1548_v23 = vadd.f32 %v4705_v48, %v1547_v30  ;;  %1621 = vmatpush.bf16.msrb.mxu0 %v1575_v35  ;;  %v6216_v50 = vpop.eup %4710  ;;  %4722 = vpow2.f32 %v1445_v54  ;;  %v1588_v25 = vpack.c.bf16 %v4709_v3, %v4707_v2 }
 0x5f9   : > { %v6221_v7 = vpop.eup %4712  ;;  %4724 = vpow2.f32 %v1449_v60  ;;  %v1354_v29 = vsub.f32 %v8441_v31, %v5998_v55  ;;  %v1473_v61 = vmul.f32 1.442695, %v1358_v52  ;;  %1636 = vmatpush.bf16.msrb.mxu1 %v1589_v0  ;;  %v8442_v47 = vunpack.c.l.b16 %v8428_v53 }
 0x5fa   : > { %v1527_v1 = vadd.f32 %v6094_v40, %v1526_v13  ;;  %v1549_v57 = vadd.f32 %v4707_v2, %v1548_v23  ;;  %v8438_v40 = vld [vmem:[#allocation50_spill] sm:$0xff]  ;;  %v6228_v36 = vpop.eup %4714  ;;  %4726 = vpow2.f32 %v1477_v19  ;;  %v8443_v14 = vunpack.c.l.b16 %v6079_v26 }
 0x5fb   : > { %v1573_v62 = vpack.c.bf16 %v8439_v34, %v8438_v40  ;;  %v6233_v27 = vpop.eup %4716  ;;  %4728 = vpow2.f32 %v1481_v56  ;;  %v1461_v54 = vmul.f32 1.442695, %v1352_v39  ;;  %v8444_v41 = vunpack.c.h.b16 %v8428_v53  ;;  %v8448_v34 = vld [vmem:[#allocation15_spill] sm:$0xff] }
 0x5fc   : > { %v1528_v59 = vadd.f32 %v6072_v42, %v1527_v1  ;;  %v1550_v20 = vadd.f32 %v4709_v3, %v1549_v57  ;;  %v6241_v5 = vpack.c.b16 %v8443_v14, %v8442_v47  ;;  %4730 = vpow2.f32 %v1453_v49  ;;  %v8447_v57 = vld [vmem:[#allocation14_spill] sm:$0xff] }
 0x5fd   : > { %1622 = vmatpush.bf16.msrb.mxu0 %v1573_v62  ;;  %v1604_v51 = vpack.c.bf16 %v6233_v27, %v6228_v36  ;;  %4732 = vpow2.f32 %v1457_v63  ;;  %v8445_v13 = vunpack.c.h.b16 %v6079_v26  ;;  %v1586_v32 = vpack.c.bf16 %v4705_v48, %v6198_v17  ;;  %v1725_v63 = vpop.trf.xlu0 }
 0x5fe   : > { %v6231_v42 = vadd.f32 %v6077_v9, %v1528_v59  ;;  %v6243_v9 = vpop.eup %4718  ;;  %v1551_v46 = vadd.f32 %v6216_v50, %v1550_v20  ;;  %4734 = vpow2.f32 %v1469_v45  ;;  %v1465_v18 = vmul.f32 1.442695, %v1354_v29  ;;  %v8446_v59 = vld [vmem:[#allocation7_spill] sm:$0xff] }
 0x5ff   : > { %v6248_v33 = vpop.eup %4720  ;;  %v6258_v30 = vpack.c.b16 %v8445_v13, %v8444_v41  ;;  %1657 = vmatpush.bf16.msra.mxu1 %v1604_v51  ;;  %4736 = vpow2.f32 %v1473_v61  ;;  %v1584_v39 = vpack.c.bf16 %v6188_v8, %v6180_v12  ;;  %v1582_v23 = vpack.c.bf16 %v6172_v44, %v6163_v58  ;;  %v8449_v61 = vld [vmem:[#allocation13_spill] sm:$0xff] }
 0x600   : > { %1623 = vmatmul.bf16.vlgmr.msrb.gmra.mxu0 %v6241_v5  ;;  %v4723_v35 = vpop.eup %4722  ;;  %v1552_v2 = vadd.f32 %v6221_v7, %v1551_v46  ;;  %v1602_v53 = vpack.c.bf16 %v6248_v33, %v6243_v9  ;;  %4738 = vpow2.f32 %v1461_v54  ;;  %v1580_v8 = vpack.c.bf16 %v6156_v38, %v6144_v28 }
 0x601   : > { %1643 = vmatpush.bf16.msra.mxu0 %v1588_v25  ;;  %v4725_v15 = vpop.eup %4724  ;;  %1637 = vmatmul.bf16.vlgmr.msrb.gmra.mxu1 %v6258_v30  ;;  %4740 = vpow2.f32 %v1465_v18  ;;  %v817_v40 = vadd.f32 %v8447_v57, %v8446_v59  ;;  %v886_v62 = vadd.f32 %v8448_v34, %v8446_v59  ;;  %v1578_v0 = vpack.c.bf16 %v6132_v21, %v6121_v4 }
 0x602   : > { %v4727_v11 = vpop.eup %4726  ;;  %v1553_v55 = vadd.f32 %v4723_v35, %v1552_v2  ;;  %v1576_v20 = vpack.c.bf16 %v6110_v37, %v6099_v10  ;;  %v1743_v47 = vunpack.c.l.b16 %v8449_v61  ;;  %v1592_v46 = vpack.c.bf16 %v4725_v15, %v4723_v35 }
 0x603   : > { %v4729_v26 = vpop.eup %4728  ;;  %1658 = vmatpush.bf16.msra.mxu1 %v1602_v53  ;;  %v941_v25 = vpack.c.bf16 %v886_v62, %v817_v40  ;;  %v1574_v4 = vpack.c.bf16 %v6088_v6, %v6083_v16  ;;  %v1744_v41 = vunpack.c.h.b16 %v8449_v61  ;;  %v1590_v13 = vpack.c.bf16 %v6221_v7, %v6216_v50 }
 0x604   : > { %v4731_v17 = vpop.eup %4730  ;;  %v1554_v48 = vadd.f32 %v4725_v15, %v1553_v55  ;;  %v1600_v1 = vpack.c.bf16 %v4729_v26, %v4727_v11 }
 0x605   : > { %1644 = vmatpush.bf16.msra.mxu0 %v1586_v32  ;;  %v4733_v60 = vpop.eup %4732  ;;  %v1745_v31 = vunpack.c.l.b16 %v941_v25  ;;  %v1746_v51 = vunpack.c.h.b16 %v941_v25  ;;  %v6285_v10 = vpop.trf.xlu0 }
 0x606   : > { %v4735_v43 = vpop.eup %4734  ;;  %v1555_v3 = vadd.f32 %v4731_v17, %v1554_v48  ;;  %v1594_v28 = vpack.c.bf16 %v4733_v60, %v4731_v17 }
 0x607   : > { %v4737_v19 = vpop.eup %4736  ;;  %1659 = vmatpush.bf16.msra.mxu1 %v1600_v1  ;;  %v1747_v54 = vpack.c.b16 %v1745_v31, %v1743_v47 }
 0x608   : > { %v1556_v24 = vadd.f32 %v4733_v60, %v1555_v3  ;;  %v4739_v52 = vpop.eup %4738  ;;  %v1598_v56 = vpack.c.bf16 %v4737_v19, %v4735_v43 }
 0x609   : > { %1645 = vmatpush.bf16.msra.mxu0 %v1584_v39  ;;  %v4741_v12 = vpop.eup %4740 }
 0x60a   : > { %v1557_v49 = vadd.f32 %v4739_v52, %v1556_v24  ;;  %v1596_v44 = vpack.c.bf16 %v4741_v12, %v4739_v52 }
 0x60b   : > { %1660 = vmatpush.bf16.msra.mxu1 %v1598_v56 }
 0x60c   : > { %v1558_v22 = vadd.f32 %v4741_v12, %v1557_v49 }
 0x60d   : > { %1646 = vmatpush.bf16.msra.mxu0 %v1582_v23  ;;  %v1727_v16 = vpop.trf.xlu0 }
 0x60e   : > { %v1559_v58 = vadd.f32 %v4735_v43, %v1558_v22 }
 0x60f   : > { %1661 = vmatpush.bf16.msra.mxu1 %v1596_v44 }
 0x610   : > { %v1560_v45 = vadd.f32 %v4737_v19, %v1559_v58 }
 0x611   : > { %1647 = vmatpush.bf16.msra.mxu0 %v1580_v8 }
 0x612   : > { %v1561_v38 = vadd.f32 %v4727_v11, %v1560_v45 }
 0x613   : > { %1662 = vmatpush.bf16.msra.mxu1 %v1594_v28 }
 0x614   : > { %v1562_v29 = vadd.f32 %v4729_v26, %v1561_v38 }
 0x615   : > { %1648 = vmatpush.bf16.msra.mxu0 %v1578_v0  ;;  %v6294_v6 = vpop.trf.xlu0 }
 0x616   : > { %v1563_v14 = vadd.f32 %v6243_v9, %v1562_v29  ;;  %v1748_v9 = vpack.c.b16 %v1746_v51, %v1744_v41 }
 0x617   : > { %1663 = vmatpush.bf16.msra.mxu1 %v1592_v46 }
 0x618   : > { %v1564_v21 = vadd.f32 %v6248_v33, %v1563_v14 }
 0x619   : > { %1649 = vmatpush.bf16.msra.mxu0 %v1576_v20 }
 0x61a   : > { %v1565_v37 = vadd.f32 %v6228_v36, %v1564_v21 }
 0x61b   : > { %1664 = vmatpush.bf16.msra.mxu1 %v1590_v13 }
 0x61c   : > { %v1566_v32 = vadd.f32 %v6233_v27, %v1565_v37 }
 0x61d   : > { %1650 = vmatpush.bf16.msra.mxu0 %v1574_v4  ;;  %v1729_v36 = vpop.trf.xlu0 }
 0x61e   : > { %1665 = vmatmul.bf16.vlgmr.msra.gmra.mxu1 %v6258_v30  ;;  %v1530_v30 = vrot.slane %v6231_v42, 4  ;;  %v1567_v35 = vrot.slane %v1566_v32, 4 }
 0x61f   : > { %1895 = vmatpush.bf16.msrb.mxu1 %v1748_v9 }
 0x620   : > { %1651 = vmatmul.bf16.vlgmr.msra.gmra.mxu0 %v6241_v5  ;;  %v1531_v2 = vadd.f32 %v1530_v30, %v6231_v42  ;;  %v1568_v15 = vadd.f32 %v1567_v35, %v1566_v32 }
 0x621   : > { %1806 = vmatpush.bf16.msrb.mxu0 %v1747_v54 }
 0x622   : > { %v1532_v18 = vrot.slane %v1531_v2, 2  ;;  %v1569_v11 = vrot.slane %v1568_v15, 2 }
 0x624   : > { %v1533_v53 = vadd.f32 %v1532_v18, %v1531_v2  ;;  %v1570_v26 = vadd.f32 %v1569_v11, %v1568_v15 }
 0x625   : > { %v6299_v50 = vpop.trf.xlu0 }
 0x626   : > { %v1534_v39 = vrot.slane %v1533_v53, 1  ;;  %v1571_v17 = vrot.slane %v1570_v26, 1 }
 0x628   : > { %v1535_v60 = vadd.f32 %v1534_v39, %v1533_v53  ;;  %v1572_v43 = vadd.f32 %v1571_v17, %v1570_v26 }
 0x62a   : > { %4742 = vrcp.f32 %v1535_v60  ;;  %vm1676_vm7 = vweird.f32 %v1535_v60  ;;  %v1682_v22 = vand.u32 2147483648, %v1535_v60  ;;  %v1696_v58 = vand.u32 2147483648, %v1572_v43 }
 0x62b   : > { %4744 = vrcp.f32 %v1572_v43  ;;  %vm1690_vm9 = vweird.f32 %v1572_v43  ;;  %v1694_v25 = vand.u32 2147483647, %v1572_v43 }
 0x62c   : > { %v1683_v31 = vor.u32 1.1754944e-38, %v1682_v22  ;;  %v1697_v61 = vor.u32 1.1754944e-38, %v1696_v58 }
 0x62d   : > { %v1731_v7 = vpop.trf.xlu0  ;;  %vm1695_vm12 = vcmp.eq.f32.partialorder %v1694_v25, 8.507059e+37 }
 0x62e   : > { %4386 = vmatmul.msk.bf16.vlgmr.msrb.gmra.mxu1 %vm1006_vm4, %v1725_v63 }
 0x630   : > { %4370 = vmatmul.msk.bf16.vlgmr.msrb.gmra.mxu0 %vm1006_vm4, %v1725_v63  ;;  %v4743_v42 = vpop.eup %4742  ;;  %v1680_v63 = vand.u32 2147483647, %v1535_v60 }
 0x631   : > { %v4745_v19 = vpop.eup %4744  ;;  %v1672_v24 = vmul.f32 %v4743_v42, %v1535_v60  ;;  %vm1677_vm5 = vweird.f32 %v4743_v42 }
 0x632   : > { %v1686_v52 = vmul.f32 %v4745_v19, %v1572_v43  ;;  %vm1691_vm6 = vweird.f32 %v4745_v19  ;;  %vm6321_vm8 = vmor %vm1676_vm7, %vm1677_vm5  ;;  %vm1681_vm11 = vcmp.eq.f32.partialorder %v1680_v63, 8.507059e+37 }
 0x633   : > { %v1673_v49 = vsub.f32 1.0, %v1672_v24  ;;  %vm1692_vm10 = vmor %vm1690_vm9, %vm1691_vm6 }
 0x634   : > { %v1687_v56 = vsub.f32 1.0, %v1686_v52 }
 0x635   : > { %v6303_v27 = vpop.trf.xlu0  ;;  %v1674_v59 = vmul.f32 %v4743_v42, %v1673_v49 }
 0x636   : > { %v1688_v57 = vmul.f32 %v4745_v19, %v1687_v56 }
 0x637   : > { %v1675_v34 = vadd.f32 %v4743_v42, %v1674_v59 }
 0x638   : > { %v1689_v62 = vadd.f32 %v4745_v19, %v1688_v57 }
 0x639   : > { %v1679_v28 = vsel %vm6321_vm8, %v4743_v42, %v1675_v34 }
 0x63a   : > { %v1693_v20 = vsel %vm1692_vm10, %v4745_v19, %v1689_v62  ;;  %v1684_v14 = vsel %vm1681_vm11, %v1683_v31, %v1679_v28 }
 0x63b   : > { %v1698_v46 = vsel %vm1695_vm12, %v1697_v61, %v1693_v20 }
 0x63d   : > { %v1733_v5 = vpop.trf.xlu0 }
 0x63e   : > { %4387 = vmatmul.msk.bf16.gmra.mxu1 %vm1006_vm4, %v1727_v16 }
 0x640   : > { %4371 = vmatmul.msk.bf16.gmra.mxu0 %vm1006_vm4, %v1727_v16 }
 0x645   : > { %v6307_v33 = vpop.trf.xlu0 }
 0x64d   : > { %v1735_v55 = vpop.trf.xlu0 }
 0x64e   : > { %4388 = vmatmul.msk.bf16.gmra.mxu1 %vm1006_vm4, %v1729_v36 }
 0x650   : > { %4372 = vmatmul.msk.bf16.gmra.mxu0 %vm1006_vm4, %v1729_v36 }
 0x655   : > { %v6314_v48 = vpop.trf.xlu0 }
 0x65d   : > { %v1737_v3 = vpop.trf.xlu0 }
 0x65e   : > { %4389 = vmatmul.msk.bf16.gmra.mxu1 %vm1006_vm4, %v1731_v7 }
 0x660   : > { %4373 = vmatmul.msk.bf16.gmra.mxu0 %vm1006_vm4, %v1731_v7 }
 0x665   : > { %v6319_v12 = vpop.trf.xlu0 }
 0x66d   : > { %v1739_v45 = vpop.trf.xlu0 }
 0x66e   : > { %4390 = vmatmul.msk.bf16.gmra.mxu1 %vm1006_vm4, %v1733_v5 }
 0x670   : > { %4374 = vmatmul.msk.bf16.gmra.mxu0 %vm1006_vm4, %v1733_v5 }
 0x67d   : > { %v1624_v1 = vpop.f32.mrf.mxu0 }
 0x67e   : > { %4391 = vmatmul.msk.bf16.gmra.mxu1 %vm1006_vm4, %v1735_v55  ;;  %v1638_v23 = vpop.f32.mrf.mxu1 }
 0x67f   : > { %v1639_v38 = vadd.f32 %v1638_v23, %v1624_v1 }
 0x680   : > { %4375 = vmatmul.msk.bf16.gmra.mxu0 %vm1006_vm4, %v1735_v55 }
 0x681   : > { %v1699_v51 = vmul.f32 %v1684_v14, %v1639_v38 }
 0x685   : > { %v1626_v8 = vpop.f32.mrf.mxu0 }
 0x686   : > { %v1640_v40 = vpop.f32.mrf.mxu1 }
 0x687   : > { %v1641_v41 = vadd.f32 %v1640_v40, %v1626_v8 }
 0x689   : > { %v1701_v9 = vmul.f32 %v1684_v14, %v1641_v41 }
 0x68e   : > { %4392 = vmatmul.msk.bf16.gmra.mxu1 %vm1006_vm4, %v1737_v3 }
 0x690   : > { %4376 = vmatmul.msk.bf16.gmra.mxu0 %vm1006_vm4, %v1737_v3 }
 0x69b   : > { %v1666_v29 = vpop.f32.mrf.mxu1 }
 0x69d   : > { %v1652_v0 = vpop.f32.mrf.mxu0 }
 0x69e   : > { %v1667_v47 = vadd.f32 %v1666_v29, %v1652_v0  ;;  %4393 = vmatmul.msk.bf16.gmra.mxu1 %vm1006_vm4, %v1739_v45 }
 0x6a0   : > { %4377 = vmatmul.msk.bf16.gmra.mxu0 %vm1006_vm4, %v1739_v45  ;;  %v1700_v4 = vmul.f32 %v1698_v46, %v1667_v47 }
 0x6a2   : > { %v1703_v21 = vpack.c.bf16 %v1700_v4, %v1699_v51 }
 0x6a3   : > { %v1668_v37 = vpop.f32.mrf.mxu1 }
 0x6a4   : > { %1705 = vst [vmem:[#allocation2] sm:$0xff] %v1703_v21 }
 0x6a5   : > { %v1654_v54 = vpop.f32.mrf.mxu0 }
 0x6a6   : > { %v1669_v13 = vadd.f32 %v1668_v37, %v1654_v54 }
 0x6a8   : > { %v1702_v32 = vmul.f32 %v1698_v46, %v1669_v13 }
 0x6aa   : > { %v1704_v16 = vpack.c.bf16 %v1702_v32, %v1701_v9 }
 0x6ab   : > { %v6331_v7 = vpop.f32.mrf.mxu1 }
 0x6ac   : > { %1706 = vst [vmem:[#allocation2 + $0x8] sm:$0xff] %v1704_v16 }
 0x6ad   : > { %v6329_v36 = vpop.f32.mrf.mxu0 }
 0x6ae   : > { %4394 = vmatmul.msk.bf16.gmra.mxu1 %vm1006_vm4, %v6285_v10 }
 0x6b0   : > { %4378 = vmatmul.msk.bf16.gmra.mxu0 %vm1006_vm4, %v6285_v10 }
 0x6b3   : > { %v6339_v30 = vpop.f32.mrf.mxu1 }
 0x6b4   : > { %8452 = vst [vmem:[#allocation37_spill] sm:$0xff] %v6339_v30 }
 0x6b5   : > { %v6337_v5 = vpop.f32.mrf.mxu0 }
 0x6bb   : > { %v6343_v2 = vpop.f32.mrf.mxu1 }
 0x6bc   : > { %8454 = vst [vmem:[#allocation39_spill] sm:$0xff] %v6343_v2 }
 0x6bd   : > { %v6341_v35 = vpop.f32.mrf.mxu0 }
 0x6be   : > { %8453 = vst [vmem:[#allocation38_spill] sm:$0xff] %v6341_v35  ;;  %4395 = vmatmul.msk.bf16.gmra.mxu1 %vm1006_vm4, %v6294_v6  ;;  %v1977_v21 = vmax.f32 %v6329_v36, %v6341_v35 }
 0x6c0   : > { %4379 = vmatmul.msk.bf16.gmra.mxu0 %vm1006_vm4, %v6294_v6 }
 0x6c3   : > { %v6351_v18 = vpop.f32.mrf.mxu1 }
 0x6c4   : > { %8456 = vst [vmem:[#allocation32_spill] sm:$0xff] %v6351_v18 }
 0x6c5   : > { %v6349_v15 = vpop.f32.mrf.mxu0 }
 0x6c6   : > { %8455 = vst [vmem:[#allocation45_spill] sm:$0xff] %v6349_v15  ;;  %v1978_v54 = vmax.f32 %v6337_v5, %v6349_v15 }
 0x6cb   : > { %v6355_v10 = vpop.f32.mrf.mxu1 }
 0x6cd   : > { %v6353_v11 = vpop.f32.mrf.mxu0 }
 0x6ce   : > { %8457 = vst [vmem:[#allocation34_spill] sm:$0xff] %v6353_v11  ;;  %4396 = vmatmul.msk.bf16.gmra.mxu1 %vm1006_vm4, %v6299_v50  ;;  %v1979_v41 = vmax.f32 %v1977_v21, %v6353_v11 }
 0x6d0   : > { %4380 = vmatmul.msk.bf16.gmra.mxu0 %vm1006_vm4, %v6299_v50 }
 0x6d3   : > { %v6363_v53 = vpop.f32.mrf.mxu1 }
 0x6d5   : > { %v6361_v55 = vpop.f32.mrf.mxu0 }
 0x6d6   : > { %8458 = vst [vmem:[#allocation36_spill] sm:$0xff] %v6361_v55  ;;  %v1980_v37 = vmax.f32 %v1978_v54, %v6361_v55 }
 0x6db   : > { %v6367_v6 = vpop.f32.mrf.mxu1 }
 0x6dd   : > { %v6365_v26 = vpop.f32.mrf.mxu0 }
 0x6de   : > { %8459 = vst [vmem:[#allocation6_spill] sm:$0xff] %v6365_v26  ;;  %4397 = vmatmul.msk.bf16.gmra.mxu1 %vm1006_vm4, %v6303_v27  ;;  %v1981_v32 = vmax.f32 %v1979_v41, %v6365_v26 }
 0x6e0   : > { %4381 = vmatmul.msk.bf16.gmra.mxu0 %vm1006_vm4, %v6303_v27 }
 0x6e3   : > { %v6375_v17 = vpop.f32.mrf.mxu1 }
 0x6e4   : > { %8460 = vst [vmem:[#allocation10_spill] sm:$0xff] %v6375_v17 }
 0x6e5   : > { %v6373_v39 = vpop.f32.mrf.mxu0 }
 0x6e6   : > { %v1982_v16 = vmax.f32 %v1980_v37, %v6373_v39 }
 0x6eb   : > { %v6379_v50 = vpop.f32.mrf.mxu1 }
 0x6ed   : > { %v6377_v60 = vpop.f32.mrf.mxu0 }
 0x6ee   : > { %4398 = vmatmul.msk.bf16.gmra.mxu1 %vm1006_vm4, %v6307_v33 }
 0x6f0   : > { %4382 = vmatmul.msk.bf16.gmra.mxu0 %vm1006_vm4, %v6307_v33 }
 0x6f3   : > { %v6387_v42 = vpop.f32.mrf.mxu1 }
 0x6f4   : > { %8461 = vst [vmem:[#allocation11_spill] sm:$0xff] %v6387_v42 }
 0x6f5   : > { %v6385_v43 = vpop.f32.mrf.mxu0 }
 0x6fb   : > { %v6391_v27 = vpop.f32.mrf.mxu1 }
 0x6fd   : > { %v6389_v3 = vpop.f32.mrf.mxu0 }
 0x6fe   : > { %4399 = vmatmul.msk.bf16.gmra.mxu1 %vm1006_vm4, %v6314_v48 }
 0x700   : > { %4383 = vmatmul.msk.bf16.gmra.mxu0 %vm1006_vm4, %v6314_v48  ;;  %v1740_v48 = vpop.trf.xlu0 }
 0x703   : > { %v6399_v19 = vpop.f32.mrf.mxu1 }
 0x704   : > { %8462 = vst [vmem:[#allocation9_spill] sm:$0xff] %v6399_v19 }
 0x705   : > { %v6397_v1 = vpop.f32.mrf.mxu0 }
 0x70b   : > { %v6403_v33 = vpop.f32.mrf.mxu1 }
 0x70d   : > { %v6401_v23 = vpop.f32.mrf.mxu0 }
 0x70e   : > { %4400 = vmatmul.msk.bf16.gmra.mxu1 %vm1006_vm4, %v6319_v12 }
 0x710   : > { %4384 = vmatmul.msk.bf16.gmra.mxu0 %vm1006_vm4, %v6319_v12 }
 0x713   : > { %v6411_v52 = vpop.f32.mrf.mxu1 }
 0x714   : > { %8463 = vst [vmem:[#allocation40_spill] sm:$0xff] %v6411_v52 }
 0x715   : > { %v6409_v24 = vpop.f32.mrf.mxu0 }
 0x71b   : > { %v6415_v56 = vpop.f32.mrf.mxu1 }
 0x71d   : > { %v6413_v49 = vpop.f32.mrf.mxu0 }
 0x71e   : > { %4401 = vmatmul.msk.bf16.gmra.mxu1 %vm1006_vm4, %v1740_v48 }
 0x720   : > { %4385 = vmatmul.msk.bf16.gmra.mxu0 %vm1006_vm4, %v1740_v48  ;;  %v1983_v48 = vmax.f32 %v1981_v32, %v6377_v60 }
 0x722   : > { %v1985_v35 = vmax.f32 %v1983_v48, %v6389_v3 }
 0x723   : > { %v6421_v59 = vpop.f32.mrf.mxu1 }
 0x724   : > { %v1987_v21 = vmax.f32 %v1985_v35, %v6401_v23  ;;  %v2015_v35 = vmax.f32 %v6339_v30, %v6351_v18 }
 0x725   : > { %v6419_v8 = vpop.f32.mrf.mxu0 }
 0x726   : > { %v1989_v11 = vmax.f32 %v1987_v21, %v6413_v49 }
 0x72b   : > { %v6425_v12 = vpop.f32.mrf.mxu1 }
 0x72d   : > { %v6423_v57 = vpop.f32.mrf.mxu0 }
 0x72e   : > { %v1991_v37 = vmax.f32 %v1989_v11, %v6423_v57  ;;  %v2017_v11 = vmax.f32 %v2015_v35, %v6363_v53 }
 0x733   : > { %v6429_v34 = vpop.f32.mrf.mxu1 }
 0x734   : > { %8464 = vst [vmem:[#allocation41_spill] sm:$0xff] %v6429_v34 }
 0x735   : > { %v6427_v40 = vpop.f32.mrf.mxu0 }
 0x73b   : > { %v6433_v22 = vpop.f32.mrf.mxu1 }
 0x73d   : > { %v6431_v62 = vpop.f32.mrf.mxu0 }
 0x743   : > { %v6437_v44 = vpop.f32.mrf.mxu1 }
 0x745   : > { %v6435_v58 = vpop.f32.mrf.mxu0 }
 0x746   : > { %8465 = vst [vmem:[#allocation42_spill] sm:$0xff] %v6435_v58 }
 0x74b   : > { %v6441_v0 = vpop.f32.mrf.mxu1 }
 0x74d   : > { %v6439_v63 = vpop.f32.mrf.mxu0 }
 0x753   : > { %v6445_v45 = vpop.f32.mrf.mxu1 }
 0x754   : > { %8466 = vst [vmem:[#allocation43_spill] sm:$0xff] %v6445_v45 }
 0x755   : > { %v6443_v25 = vpop.f32.mrf.mxu0 }
 0x75b   : > { %v6449_v28 = vpop.f32.mrf.mxu1 }
 0x75d   : > { %v6447_v38 = vpop.f32.mrf.mxu0 }
 0x763   : > { %v6453_v31 = vpop.f32.mrf.mxu1 }
 0x764   : > { %8467 = vst [vmem:[#allocation44_spill] sm:$0xff] %v6453_v31 }
 0x765   : > { %v6451_v20 = vpop.f32.mrf.mxu0 }
 0x76b   : > { %v6457_v61 = vpop.f32.mrf.mxu1 }
 0x76c   : > { %8468 = vst [vmem:[#allocation46_spill] sm:$0xff] %v6457_v61 }
 0x76d   : > { %v6455_v29 = vpop.f32.mrf.mxu0 }
 0x773   : > { %v6461_v14 = vpop.f32.mrf.mxu1 }
 0x774   : > { %8469 = vst [vmem:[#allocation35_spill] sm:$0xff] %v6461_v14 }
 0x775   : > { %v6459_v47 = vpop.f32.mrf.mxu0 }
 0x77b   : > { %v6465_v51 = vpop.f32.mrf.mxu1 }
 0x77c   : > { %8470 = vst [vmem:[#allocation48_spill] sm:$0xff] %v6465_v51  ;;  %v1984_v51 = vmax.f32 %v1982_v16, %v6385_v43  ;;  %v1993_v16 = vmax.f32 %v1991_v37, %v6431_v62 }
 0x77d   : > { %v6463_v46 = vpop.f32.mrf.mxu0 }
 0x77e   : > { %v1986_v15 = vmax.f32 %v1984_v51, %v6397_v1 }
 0x780   : > { %v1988_v54 = vmax.f32 %v1986_v15, %v6409_v24  ;;  %v1995_v15 = vmax.f32 %v1993_v16, %v6439_v63 }
 0x782   : > { %v1990_v41 = vmax.f32 %v1988_v54, %v6419_v8  ;;  %v2014_v54 = vmax.f32 %v6331_v7, %v6343_v2 }
 0x783   : > { %v6475_v13 = vpop.f32.mrf.mxu1 }
 0x784   : > { %v1992_v32 = vmax.f32 %v1990_v41, %v6427_v40  ;;  %v1997_v41 = vmax.f32 %v1995_v15, %v6447_v38 }
 0x785   : > { %v6467_v4 = vpop.f32.mrf.mxu0 }
 0x786   : > { %v1994_v51 = vmax.f32 %v1992_v32, %v6435_v58  ;;  %v2016_v32 = vmax.f32 %v2014_v54, %v6355_v10  ;;  %v2019_v58 = vmax.f32 %v2017_v11, %v6375_v17  ;;  %v1999_v18 = vmax.f32 %v1997_v41, %v6455_v29 }
 0x788   : > { %v1996_v48 = vmax.f32 %v1994_v51, %v6443_v25  ;;  %v2018_v30 = vmax.f32 %v2016_v32, %v6367_v6  ;;  %v2021_v2 = vmax.f32 %v2019_v58, %v6387_v42  ;;  %v2001_v35 = vmax.f32 %v1999_v18, %v6463_v46 }
 0x78a   : > { %v1998_v37 = vmax.f32 %v1996_v48, %v6451_v20  ;;  %v2020_v48 = vmax.f32 %v2018_v30, %v6379_v50  ;;  %v2023_v54 = vmax.f32 %v2021_v2, %v6399_v19 }
 0x78b   : > { %v6491_v26 = vpop.f32.mrf.mxu1 }
 0x78c   : > { %v2000_v16 = vmax.f32 %v1998_v37, %v6459_v47  ;;  %v2022_v37 = vmax.f32 %v2020_v48, %v6391_v27  ;;  %v2025_v32 = vmax.f32 %v2023_v54, %v6411_v52 }
 0x78d   : > { %v6477_v9 = vpop.f32.mrf.mxu0 }
 0x78e   : > { %v2002_v15 = vmax.f32 %v2000_v16, %v6467_v4  ;;  %v2003_v11 = vmax.f32 %v2001_v35, %v6477_v9  ;;  %v2024_v16 = vmax.f32 %v2022_v37, %v6403_v33  ;;  %v2027_v30 = vmax.f32 %v2025_v32, %v6421_v59 }
 0x790   : > { %v2026_v2 = vmax.f32 %v2024_v16, %v6415_v56  ;;  %v2029_v35 = vmax.f32 %v2027_v30, %v6429_v34 }
 0x792   : > { %v2028_v48 = vmax.f32 %v2026_v2, %v6425_v12  ;;  %v2031_v54 = vmax.f32 %v2029_v35, %v6437_v44 }
 0x793   : > { %v6512_v51 = vpop.f32.mrf.mxu1 }
 0x795   : > { %v6487_v55 = vpop.f32.mrf.mxu0 }
 0x796   : > { %v2004_v41 = vmax.f32 %v2002_v15, %v6487_v55 }
 0x79b   : > { %v6532_v19 = vpop.f32.mrf.mxu1 }
 0x79d   : > { %v6501_v21 = vpop.f32.mrf.mxu0 }
 0x79e   : > { %v2005_v58 = vmax.f32 %v2003_v11, %v6501_v21  ;;  %v2030_v11 = vmax.f32 %v2028_v48, %v6433_v22 }
 0x7a0   : > { %v2032_v32 = vmax.f32 %v2030_v11, %v6441_v0 }
 0x7a2   : > { %v2034_v16 = vmax.f32 %v2032_v32, %v6449_v28 }
 0x7a4   : > { %v2036_v2 = vmax.f32 %v2034_v16, %v6457_v61  ;;  %v8476_v61 = vld [vmem:[#allocation6_spill] sm:$0xff] }
 0x7a5   : > { %v6522_v17 = vpop.f32.mrf.mxu0 }
 0x7a6   : > { %v2006_v18 = vmax.f32 %v2004_v41, %v6522_v17  ;;  %v2033_v41 = vmax.f32 %v2031_v54, %v6445_v45 }
 0x7a8   : > { %v2007_v42 = vmax.f32 %v2005_v58, %v2006_v18  ;;  %v2035_v58 = vmax.f32 %v2033_v41, %v6453_v31 }
 0x7aa   : > { %v2008_v15 = vrot.slane %v2007_v42, 4  ;;  %v2037_v30 = vmax.f32 %v2035_v58, %v6461_v14  ;;  %v8472_v58 = vld [vmem:[#allocation38_spill] sm:$0xff] }
 0x7ac   : > { %v2009_v52 = vmax.f32 %v2007_v42, %v2008_v15  ;;  %v2039_v35 = vmax.f32 %v2037_v30, %v6475_v13  ;;  %v6544_v42 = vpop.f32.mrf.mxu1  ;;  %v8471_v15 = vld [vmem:[#allocation48_spill] sm:$0xff] }
 0x7ad   : > { %v2038_v48 = vmax.f32 %v2036_v2, %v8471_v15  ;;  %v8473_v2 = vld [vmem:[#allocation45_spill] sm:$0xff] }
 0x7ae   : > { %v2010_v37 = vrot.slane %v2009_v52, 2  ;;  %v2041_v54 = vmax.f32 %v2039_v35, %v6512_v51 }
 0x7af   : > { %v2040_v11 = vmax.f32 %v2038_v48, %v6491_v26  ;;  %v8474_v48 = vld [vmem:[#allocation34_spill] sm:$0xff] }
 0x7b0   : > { %v2011_v18 = vmax.f32 %v2009_v52, %v2010_v37  ;;  %v2043_v52 = vmax.f32 %v2041_v54, %v6544_v42 }
 0x7b1   : > { %v2042_v41 = vmax.f32 %v2040_v11, %v6532_v19 }
 0x7b2   : > { %v2012_v34 = vrot.slane %v2011_v18, 1 }
 0x7b3   : > { %v2044_v30 = vmax.f32 %v2042_v41, %v2043_v52 }
 0x7b4   : > { %v6548_v45 = vmax.f32 %v2011_v18, %v2012_v34 }
 0x7b5   : > { %v2045_v11 = vrot.slane %v2044_v30, 4 }
 0x7b6   : > { %v2051_v37 = vsub.f32 %v6329_v36, %v6548_v45  ;;  %v2053_v32 = vsub.f32 %v6337_v5, %v6548_v45  ;;  %v2055_v16 = vsub.f32 %v8472_v58, %v6548_v45  ;;  %v2057_v34 = vsub.f32 %v8473_v2, %v6548_v45  ;;  %v8475_v36 = vld [vmem:[#allocation36_spill] sm:$0xff] }
 0x7b7   : > { %v2059_v54 = vsub.f32 %v8474_v48, %v6548_v45  ;;  %v2061_v14 = vsub.f32 %v8475_v36, %v6548_v45  ;;  %v2063_v58 = vsub.f32 %v8476_v61, %v6548_v45  ;;  %v2046_v41 = vmax.f32 %v2044_v30, %v2045_v11 }
 0x7b8   : > { %v2115_v18 = vmul.f32 1.442695, %v2051_v37  ;;  %v2119_v35 = vmul.f32 1.442695, %v2053_v32  ;;  %v2123_v31 = vmul.f32 1.442695, %v2055_v16  ;;  %v2065_v37 = vsub.f32 %v6373_v39, %v6548_v45 }
 0x7b9   : > { %v2127_v5 = vmul.f32 1.442695, %v2057_v34  ;;  %v2131_v52 = vmul.f32 1.442695, %v2059_v54  ;;  %v2135_v32 = vmul.f32 1.442695, %v2061_v14  ;;  %v2067_v16 = vsub.f32 %v6377_v60, %v6548_v45 }
 0x7ba   : > { %4746 = vpow2.f32 %v2115_v18  ;;  %v2069_v34 = vsub.f32 %v6385_v43, %v6548_v45  ;;  %v2139_v61 = vmul.f32 1.442695, %v2063_v58  ;;  %v2047_v30 = vrot.slane %v2046_v41, 2 }
 0x7bb   : > { %4748 = vpow2.f32 %v2119_v35  ;;  %v2073_v35 = vsub.f32 %v6397_v1, %v6548_v45  ;;  %v2143_v60 = vmul.f32 1.442695, %v2065_v37  ;;  %v2075_v48 = vsub.f32 %v6401_v23, %v6548_v45 }
 0x7bc   : > { %4750 = vpow2.f32 %v2123_v31  ;;  %v2071_v31 = vsub.f32 %v6389_v3, %v6548_v45  ;;  %v2147_v43 = vmul.f32 1.442695, %v2067_v16  ;;  %v2077_v3 = vsub.f32 %v6409_v24, %v6548_v45 }
 0x7bd   : > { %4752 = vpow2.f32 %v2127_v5  ;;  %v2151_v36 = vmul.f32 1.442695, %v2069_v34  ;;  %v2079_v5 = vsub.f32 %v6413_v49, %v6548_v45  ;;  %v2081_v23 = vsub.f32 %v6419_v8, %v6548_v45 }
 0x7be   : > { %4754 = vpow2.f32 %v2131_v52  ;;  %v2155_v58 = vmul.f32 1.442695, %v2071_v31  ;;  %v2048_v52 = vmax.f32 %v2046_v41, %v2047_v30  ;;  %v2083_v16 = vsub.f32 %v6423_v57, %v6548_v45 }
 0x7bf   : > { %4756 = vpow2.f32 %v2135_v32  ;;  %v2159_v32 = vmul.f32 1.442695, %v2073_v35  ;;  %v2163_v24 = vmul.f32 1.442695, %v2075_v48  ;;  %v2085_v49 = vsub.f32 %v6427_v40, %v6548_v45  ;;  %v8480_v35 = vld [vmem:[#allocation42_spill] sm:$0xff] }
 0x7c0   : > { %v6569_v2 = vpop.eup %4746  ;;  %4758 = vpow2.f32 %v2139_v61  ;;  %v2087_v41 = vsub.f32 %v6431_v62, %v6548_v45  ;;  %v2167_v31 = vmul.f32 1.442695, %v2077_v3  ;;  %v2171_v8 = vmul.f32 1.442695, %v2079_v5 }
 0x7c1   : > { %8477 = vst [vmem:[#allocation49_spill] sm:$0xff] %v6569_v2  ;;  %v6573_v18 = vpop.eup %4748  ;;  %4760 = vpow2.f32 %v2143_v60  ;;  %v2049_v30 = vrot.slane %v2048_v52, 1  ;;  %v2089_v60 = vsub.f32 %v8480_v35, %v6548_v45  ;;  %v2175_v48 = vmul.f32 1.442695, %v2081_v23 }
 0x7c2   : > { %8478 = vst [vmem:[#allocation50_spill] sm:$0xff] %v6573_v18  ;;  %v2243_v39 = vadd.f32 %v6573_v18, %v6569_v2  ;;  %v6581_v14 = vpop.eup %4750  ;;  %4762 = vpow2.f32 %v2147_v43  ;;  %v2091_v40 = vsub.f32 %v6439_v63, %v6548_v45  ;;  %v2179_v43 = vmul.f32 1.442695, %v2083_v16 }
 0x7c3   : > { %v6588_v11 = vpop.eup %4752  ;;  %4764 = vpow2.f32 %v2151_v36  ;;  %v2093_v3 = vsub.f32 %v6443_v25, %v6548_v45  ;;  %v2095_v36 = vsub.f32 %v6447_v38, %v6548_v45  ;;  %v2183_v5 = vmul.f32 1.442695, %v2085_v49 }
 0x7c4   : > { %v2244_v54 = vadd.f32 %v6581_v14, %v2243_v39  ;;  %8479 = vst [vmem:[#allocation33_spill] sm:$0xff] %v6588_v11  ;;  %v6595_v37 = vpop.eup %4754  ;;  %4766 = vpow2.f32 %v2155_v58  ;;  %v6625_v23 = vmax.f32 %v2048_v52, %v2049_v30  ;;  %v2107_v16 = vsub.f32 %v6477_v9, %v6548_v45 }
 0x7c5   : > { %v6602_v61 = vpop.eup %4756  ;;  %4768 = vpow2.f32 %v2159_v32  ;;  %v2191_v25 = vmul.f32 1.442695, %v2089_v60  ;;  %v2111_v38 = vsub.f32 %v6501_v21, %v6548_v45  ;;  %v2113_v52 = vsub.f32 %v6522_v17, %v6548_v45  ;;  %v8481_v60 = vld [vmem:[#allocation37_spill] sm:$0xff] }
 0x7c6   : > { %v2245_v1 = vadd.f32 %v6588_v11, %v2244_v54  ;;  %v6609_v57 = vpop.eup %4758  ;;  %4770 = vpow2.f32 %v2163_v24  ;;  %v2203_v9 = vmul.f32 1.442695, %v2095_v36  ;;  %v2052_v21 = vsub.f32 %v6331_v7, %v6625_v23  ;;  %v8482_v36 = vld [vmem:[#allocation39_spill] sm:$0xff] }
 0x7c7   : > { %v6616_v54 = vpop.eup %4760  ;;  %4772 = vpow2.f32 %v2167_v31  ;;  %v2199_v31 = vmul.f32 1.442695, %v2093_v3  ;;  %v2227_v35 = vmul.f32 1.442695, %v2107_v16  ;;  %v2109_v17 = vsub.f32 %v6487_v55, %v6548_v45 }
 0x7c8   : > { %v2246_v34 = vadd.f32 %v6595_v37, %v2245_v1  ;;  %v6622_v58 = vpop.eup %4762  ;;  %4774 = vpow2.f32 %v2171_v8  ;;  %v2187_v1 = vmul.f32 1.442695, %v2087_v41  ;;  %v2239_v7 = vmul.f32 1.442695, %v2113_v52 }
 0x7c9   : > { %v6627_v32 = vpop.eup %4764  ;;  %4776 = vpow2.f32 %v2175_v48  ;;  %v2054_v48 = vsub.f32 %v8481_v60, %v6625_v23  ;;  %v2103_v16 = vsub.f32 %v6463_v46, %v6548_v45  ;;  %v2231_v60 = vmul.f32 1.442695, %v2109_v17 }
 0x7ca   : > { %v2247_v39 = vadd.f32 %v6602_v61, %v2246_v34  ;;  %v6631_v24 = vpop.eup %4766  ;;  %4778 = vpow2.f32 %v2179_v43  ;;  %v2195_v34 = vmul.f32 1.442695, %v2091_v40  ;;  %v2235_v43 = vmul.f32 1.442695, %v2111_v38 }
 0x7cb   : > { %v6636_v41 = vpop.eup %4768  ;;  %4780 = vpow2.f32 %v2183_v5  ;;  %v2056_v5 = vsub.f32 %v8482_v36, %v6625_v23  ;;  %v2121_v52 = vmul.f32 1.442695, %v2054_v48  ;;  %v2099_v48 = vsub.f32 %v6455_v29, %v6548_v45 }
 0x7cc   : > { %v2248_v62 = vadd.f32 %v6609_v57, %v2247_v39  ;;  %v6640_v8 = vpop.eup %4770  ;;  %4782 = vpow2.f32 %v2187_v1  ;;  %v2219_v18 = vmul.f32 1.442695, %v2103_v16 }
 0x7cd   : > { %v6645_v30 = vpop.eup %4772  ;;  %4784 = vpow2.f32 %v2191_v25  ;;  %v2117_v25 = vmul.f32 1.442695, %v2052_v21  ;;  %v2125_v36 = vmul.f32 1.442695, %v2056_v5  ;;  %v2101_v5 = vsub.f32 %v6459_v47, %v6548_v45 }
 0x7ce   : > { %v2249_v63 = vadd.f32 %v6616_v54, %v2248_v62  ;;  %v6649_v40 = vpop.eup %4774  ;;  %4786 = vpow2.f32 %v2195_v34  ;;  %v8483_v34 = vld [vmem:[#allocation32_spill] sm:$0xff] }
 0x7cf   : > { %v6654_v3 = vpop.eup %4776  ;;  %4788 = vpow2.f32 %v2199_v31 }
 0x7d0   : > { %v2250_v49 = vadd.f32 %v6622_v58, %v2249_v63  ;;  %v6658_v1 = vpop.eup %4778  ;;  %v681_v63 = vpop.permute.xlu2 %680  ;;  %4790 = vpow2.f32 %v2203_v9 }
 0x7d1   : > { %v6663_v38 = vpop.eup %4780  ;;  %4792 = vpow2.f32 %v2227_v35  ;;  %v2060_v35 = vsub.f32 %v6355_v10, %v6625_v23 }
 0x7d2   : > { %v2251_v39 = vadd.f32 %v6627_v32, %v2250_v49  ;;  %v2058_v49 = vsub.f32 %v8483_v34, %v6625_v23  ;;  %v6667_v31 = vpop.eup %4782  ;;  %4794 = vpow2.f32 %v2235_v43  ;;  %v8485_v43 = vld [vmem:[#allocation18_spill] sm:$0xff] }
 0x7d3   : > { %v6672_v9 = vpop.eup %4784  ;;  %4796 = vpow2.f32 %v2239_v7  ;;  %v2062_v7 = vsub.f32 %v6363_v53, %v6625_v23  ;;  %v2133_v53 = vmul.f32 1.442695, %v2060_v35  ;;  %v2215_v35 = vmul.f32 1.442695, %v2101_v5 }
 0x7d4   : > { %v2252_v62 = vadd.f32 %v6631_v24, %v2251_v39  ;;  %v2105_v39 = vsub.f32 %v6467_v4, %v6548_v45  ;;  %v6677_v34 = vpop.eup %4786  ;;  %4798 = vpow2.f32 %v2117_v25  ;;  %v8486_v25 = vld [vmem:[#allocation16_spill] sm:$0xff] }
 0x7d5   : > { %v6682_v17 = vpop.eup %4788  ;;  %4800 = vpow2.f32 %v2121_v52 }
 0x7d6   : > { %v2253_v55 = vadd.f32 %v6636_v41, %v2252_v62  ;;  %v8484_v62 = vld [vmem:[#allocation17_spill] sm:$0xff]  ;;  %v6687_v10 = vpop.eup %4790  ;;  %v2223_v2 = vmul.f32 1.442695, %v2105_v39  ;;  %4802 = vpow2.f32 %v2231_v60 }
 0x7d7   : > { %v857_v21 = vadd.f32 %v8484_v62, %v681_v63  ;;  %v2129_v62 = vmul.f32 1.442695, %v2058_v49  ;;  %v6692_v16 = vpop.eup %4792  ;;  %4804 = vpow2.f32 %v2125_v36  ;;  %v2097_v49 = vsub.f32 %v6451_v20, %v6548_v45 }
 0x7d8   : > { %v2254_v46 = vadd.f32 %v6640_v8, %v2253_v55  ;;  %v926_v55 = vadd.f32 %v8485_v43, %v681_v63  ;;  %v2064_v63 = vsub.f32 %v6367_v6, %v6625_v23  ;;  %v6697_v52 = vpop.eup %4794  ;;  %v2211_v43 = vmul.f32 1.442695, %v2099_v48 }
 0x7d9   : > { %4806 = vpow2.f32 %v2219_v18  ;;  %v6702_v39 = vpop.eup %4796  ;;  %v2137_v6 = vmul.f32 1.442695, %v2062_v7  ;;  %v2331_v45 = vpack.c.bf16 %v6654_v3, %v6649_v40  ;;  %v2068_v18 = vsub.f32 %v6379_v50, %v6625_v23  ;;  %v8488_v50 = vld [vmem:[#allocation11_spill] sm:$0xff] }
 0x7da   : > { %v2255_v4 = vadd.f32 %v6645_v30, %v2254_v46  ;;  %v6704_v60 = vpack.c.bf16 %v926_v55, %v857_v21  ;;  %4808 = vpow2.f32 %v2129_v62  ;;  %v6708_v36 = vpop.eup %4798  ;;  %v2141_v21 = vmul.f32 1.442695, %v2064_v63 }
 0x7db   : > { %4810 = vpow2.f32 %v2223_v2  ;;  %v6713_v20 = vpop.eup %4800  ;;  %v2347_v48 = vpack.c.bf16 %v6702_v39, %v6697_v52  ;;  %v2207_v7 = vmul.f32 1.442695, %v2097_v49  ;;  %2359 = vmatpush.bf16.msra.mxu2 %v2331_v45  ;;  %v2070_v5 = vsub.f32 %v8488_v50, %v6625_v23 }
 0x7dc   : > { %v2256_v29 = vadd.f32 %v6649_v40, %v2255_v4  ;;  %v8487_v4 = vld [vmem:[#allocation10_spill] sm:$0xff]  ;;  %4812 = vpow2.f32 %v2133_v53  ;;  %v6719_v55 = vpop.eup %4802  ;;  %v2280_v62 = vadd.f32 %v6713_v20, %v6708_v36  ;;  %v2329_v49 = vpack.c.bf16 %v6645_v30, %v6640_v8 }
 0x7dd   : > { %v2066_v46 = vsub.f32 %v8487_v4, %v6625_v23  ;;  %4814 = vpow2.f32 %v2211_v43  ;;  %v6724_v40 = vpop.eup %4804  ;;  %2373 = vmatpush.bf16.msra.mxu3 %v2347_v48  ;;  %v2149_v4 = vmul.f32 1.442695, %v2068_v18 }
 0x7de   : > { %v2257_v47 = vadd.f32 %v6654_v3, %v2256_v29  ;;  %4816 = vpow2.f32 %v2137_v6 }
 0x7df   : > { %v2145_v29 = vmul.f32 1.442695, %v2066_v46  ;;  %v6729_v63 = vpop.eup %4806  ;;  %4818 = vpow2.f32 %v2215_v35  ;;  %v2345_v46 = vpack.c.bf16 %v6719_v55, %v6692_v16  ;;  %2360 = vmatpush.bf16.msra.mxu2 %v2329_v49  ;;  %v8490_v49 = vld [vmem:[#allocation40_spill] sm:$0xff]  ;;  %v2112_v35 = vsub.f32 %v6532_v19, %v6625_v23 }
 0x7e0   : > { %v2258_v11 = vadd.f32 %v6658_v1, %v2257_v47  ;;  %v6735_v43 = vpop.eup %4808  ;;  %v2072_v47 = vsub.f32 %v6391_v27, %v6625_v23  ;;  %4820 = vpow2.f32 %v2141_v21  ;;  %v8489_v27 = vld [vmem:[#allocation9_spill] sm:$0xff]  ;;  %v2153_v21 = vmul.f32 1.442695, %v2070_v5 }
 0x7e1   : > { %v6741_v6 = vpop.eup %4810  ;;  %4822 = vpow2.f32 %v2207_v7  ;;  %v2074_v18 = vsub.f32 %v8489_v27, %v6625_v23  ;;  %2374 = vmatpush.bf16.msra.mxu3 %v2345_v46  ;;  %v2076_v7 = vsub.f32 %v6403_v33, %v6625_v23  ;;  %v2078_v30 = vsub.f32 %v8490_v49, %v6625_v23 }
 0x7e2   : > { %v2259_v2 = vadd.f32 %v6663_v38, %v2258_v11  ;;  %v2281_v11 = vadd.f32 %v6724_v40, %v2280_v62  ;;  %v6746_v8 = vpop.eup %4812  ;;  %4824 = vpow2.f32 %v2145_v29  ;;  %v2157_v29 = vmul.f32 1.442695, %v2072_v47 }
 0x7e3   : > { %4826 = vpow2.f32 %v2149_v4  ;;  %v2343_v5 = vpack.c.bf16 %v6741_v6, %v6729_v63  ;;  %v2080_v33 = vsub.f32 %v6415_v56, %v6625_v23  ;;  %v2084_v47 = vsub.f32 %v6425_v12, %v6625_v23  ;;  %v8491_v4 = vld [vmem:[#allocation41_spill] sm:$0xff] }
 0x7e4   : > { %v2260_v53 = vadd.f32 %v6667_v31, %v2259_v2  ;;  %v2282_v48 = vadd.f32 %v6735_v43, %v2281_v11  ;;  %v4815_v2 = vpop.eup %4814  ;;  %v2086_v27 = vsub.f32 %v8491_v4, %v6625_v23  ;;  %4828 = vpow2.f32 %v2153_v21 }
 0x7e5   : > { %v6757_v11 = vpop.eup %4816  ;;  %v2161_v49 = vmul.f32 1.442695, %v2074_v18  ;;  %2375 = vmatpush.bf16.msra.mxu3 %v2343_v5  ;;  %v2090_v12 = vsub.f32 %v6437_v44, %v6625_v23  ;;  %4830 = vpow2.f32 %v2157_v29  ;;  %v2165_v21 = vmul.f32 1.442695, %v2076_v7 }
 0x7e6   : > { %v2261_v45 = vadd.f32 %v6672_v9, %v2260_v53  ;;  %v2283_v50 = vadd.f32 %v6746_v8, %v2282_v48  ;;  %v2327_v53 = vpack.c.bf16 %v6636_v41, %v6631_v24  ;;  %v4819_v46 = vpop.eup %4818  ;;  %v2082_v48 = vsub.f32 %v6421_v59, %v6625_v23 }
 0x7e7   : > { %v6769_v41 = vpop.eup %4820  ;;  %v2088_v59 = vsub.f32 %v6433_v22, %v6625_v23  ;;  %v2341_v18 = vpack.c.bf16 %v4819_v46, %v4815_v2  ;;  %v2169_v4 = vmul.f32 1.442695, %v2078_v30  ;;  %4832 = vpow2.f32 %v2161_v49 }
 0x7e8   : > { %v2262_v62 = vadd.f32 %v6677_v34, %v2261_v45  ;;  %v2284_v24 = vadd.f32 %v6757_v11, %v2283_v50  ;;  %2361 = vmatpush.bf16.msra.mxu2 %v2327_v53  ;;  %v2325_v53 = vpack.c.bf16 %v6627_v32, %v6622_v58  ;;  %v8492_v58 = vld [vmem:[#allocation43_spill] sm:$0xff]  ;;  %v2173_v44 = vmul.f32 1.442695, %v2080_v33 }
 0x7e9   : > { %2376 = vmatpush.bf16.msra.mxu3 %v2341_v18  ;;  %v2177_v29 = vmul.f32 1.442695, %v2082_v48  ;;  %v2323_v30 = vpack.c.bf16 %v6616_v54, %v6609_v57  ;;  %v2114_v32 = vsub.f32 %v6544_v42, %v6625_v23  ;;  %4834 = vpow2.f32 %v2165_v21 }
 0x7ea   : > { %v2263_v45 = vadd.f32 %v6682_v17, %v2262_v62  ;;  %v4823_v62 = vpop.eup %4822  ;;  %v2285_v50 = vadd.f32 %v6769_v41, %v2284_v24  ;;  %4836 = vpow2.f32 %v2169_v4  ;;  %v2110_v57 = vsub.f32 %v6512_v51, %v6625_v23 }
 0x7eb   : > { %v6781_v3 = vpop.eup %4824  ;;  %v2339_v19 = vpack.c.bf16 %v4823_v62, %v6687_v10  ;;  %4838 = vpow2.f32 %v2173_v44  ;;  %v2185_v54 = vmul.f32 1.442695, %v2086_v27  ;;  %v2104_v51 = vsub.f32 %v8471_v15, %v6625_v23  ;;  %v8494_v44 = vld [vmem:[#allocation46_spill] sm:$0xff] }
 0x7ec   : > { %v2264_v56 = vadd.f32 %v6687_v10, %v2263_v45  ;;  %v2092_v45 = vsub.f32 %v6441_v0, %v6625_v23  ;;  %v2286_v22 = vadd.f32 %v6781_v3, %v2285_v50  ;;  %2362 = vmatpush.bf16.msra.mxu2 %v2325_v53  ;;  %v6788_v24 = vpop.eup %4826  ;;  %v2108_v53 = vsub.f32 %v6491_v26, %v6625_v23 }
 0x7ed   : > { %v6797_v50 = vpop.eup %4828  ;;  %v2237_v26 = vmul.f32 1.442695, %v2112_v35  ;;  %2377 = vmatpush.bf16.msra.mxu3 %v2339_v19  ;;  %4840 = vpow2.f32 %v2177_v29  ;;  %v2241_v21 = vmul.f32 1.442695, %v2114_v32  ;;  %v2337_v35 = vpack.c.bf16 %v6682_v17, %v6677_v34  ;;  %v8493_v17 = vld [vmem:[#allocation33_spill] sm:$0xff] }
 0x7ee   : > { %v2265_v5 = vadd.f32 %v4823_v62, %v2264_v56  ;;  %v2287_v56 = vadd.f32 %v6788_v24, %v2286_v22  ;;  %v6805_v49 = vpop.eup %4830  ;;  %v2096_v62 = vsub.f32 %v6449_v28, %v6625_v23  ;;  %v2229_v27 = vmul.f32 1.442695, %v2108_v53  ;;  %v8495_v53 = vld [vmem:[#allocation35_spill] sm:$0xff] }
 0x7ef   : > { %v2233_v4 = vmul.f32 1.442695, %v2110_v57  ;;  %v2193_v29 = vmul.f32 1.442695, %v2090_v12  ;;  %v2102_v19 = vsub.f32 %v8495_v53, %v6625_v23 }
 0x7f0   : > { %v2266_v7 = vadd.f32 %v4815_v2, %v2265_v5  ;;  %v2181_v2 = vmul.f32 1.442695, %v2084_v47  ;;  %v2288_v48 = vadd.f32 %v6797_v50, %v2287_v56  ;;  %2363 = vmatpush.bf16.msra.mxu2 %v2323_v30  ;;  %v6813_v47 = vpop.eup %4832  ;;  %v2189_v5 = vmul.f32 1.442695, %v2088_v59 }
 0x7f1   : > { %2378 = vmatpush.bf16.msra.mxu3 %v2337_v35  ;;  %v2221_v30 = vmul.f32 1.442695, %v2104_v51 }
 0x7f2   : > { %v2267_v33 = vadd.f32 %v4819_v46, %v2266_v7  ;;  %v2289_v10 = vadd.f32 %v6805_v49, %v2288_v48  ;;  %v2321_v46 = vpack.c.bf16 %v6602_v61, %v6595_v37  ;;  %4842 = vpow2.f32 %v2181_v2  ;;  %v6823_v37 = vpop.eup %4834  ;;  %v8497_v2 = vld [vmem:[#allocation50_spill] sm:$0xff] }
 0x7f3   : > { %v2106_v61 = vsub.f32 %v6475_v13, %v6625_v23  ;;  %4844 = vpow2.f32 %v2185_v54  ;;  %v4837_v15 = vpop.eup %4836  ;;  %v2100_v7 = vsub.f32 %v8494_v44, %v6625_v23  ;;  %v2335_v13 = vpack.c.bf16 %v6672_v9, %v6667_v31 }
 0x7f4   : > { %v2268_v42 = vadd.f32 %v6729_v63, %v2267_v33  ;;  %v2290_v18 = vadd.f32 %v6813_v47, %v2289_v10  ;;  %2364 = vmatpush.bf16.msra.mxu2 %v2321_v46  ;;  %4846 = vpow2.f32 %v2237_v26  ;;  %v4839_v32 = vpop.eup %4838  ;;  %v8498_v54 = vsub.f32 %v8492_v58, %v6625_v23 }
 0x7f5   : > { %4848 = vpow2.f32 %v2241_v21  ;;  %v4841_v59 = vpop.eup %4840  ;;  %v2225_v33 = vmul.f32 1.442695, %v2106_v61  ;;  %2379 = vmatpush.bf16.msra.mxu3 %v2335_v13  ;;  %v2213_v10 = vmul.f32 1.442695, %v2100_v7  ;;  %v8499_v21 = vunpack.c.l.b16 %v8486_v25 }
 0x7f6   : > { %v2269_v63 = vadd.f32 %v6741_v6, %v2268_v42  ;;  %v2291_v34 = vadd.f32 %v6823_v37, %v2290_v18  ;;  %v2319_v6 = vpack.c.bf16 %v8493_v17, %v6581_v14  ;;  %4850 = vpow2.f32 %v2229_v27 }
 0x7f7   : > { %v2197_v14 = vmul.f32 1.442695, %v2092_v45  ;;  %4852 = vpow2.f32 %v2233_v4  ;;  %v2201_v0 = vmul.f32 1.442695, %v8498_v54  ;;  %v2333_v45 = vpack.c.bf16 %v6663_v38, %v6658_v1  ;;  %v8501_v1 = vld [vmem:[#allocation44_spill] sm:$0xff] }
 0x7f8   : > { %v2270_v22 = vadd.f32 %v6692_v16, %v2269_v63  ;;  %v2292_v16 = vadd.f32 %v4837_v15, %v2291_v34  ;;  %2365 = vmatpush.bf16.msra.mxu2 %v2319_v6  ;;  %v6841_v12 = vpop.eup %4842  ;;  %4854 = vpow2.f32 %v2189_v5  ;;  %v2332_v26 = vpack.c.bf16 %v4841_v59, %v4839_v32 }
 0x7f9   : > { %v6846_v57 = vpop.eup %4844  ;;  %4856 = vpow2.f32 %v2193_v29  ;;  %v8500_v58 = vunpack.c.l.b16 %v6704_v60  ;;  %v2098_v38 = vsub.f32 %v8501_v1, %v6625_v23  ;;  %v2217_v63 = vmul.f32 1.442695, %v2102_v19  ;;  %2380 = vmatpush.bf16.msra.mxu3 %v2333_v45  ;;  %v8507_v1 = vld [vmem:[#allocation19_spill] sm:$0xff] }
 0x7fa   : > { %v2271_v56 = vadd.f32 %v6719_v55, %v2270_v22  ;;  %v2293_v9 = vadd.f32 %v4839_v32, %v2292_v16  ;;  %v8496_v55 = vld [vmem:[#allocation49_spill] sm:$0xff]  ;;  %v6853_v42 = vpop.eup %4846  ;;  %4858 = vpow2.f32 %v2221_v30  ;;  %v8502_v5 = vunpack.c.h.b16 %v8486_v25 }
 0x7fb   : > { %v2317_v48 = vpack.c.bf16 %v8497_v2, %v8496_v55  ;;  %v6858_v51 = vpop.eup %4848  ;;  %v6864_v35 = vpack.c.b16 %v8500_v58, %v8499_v21  ;;  %4860 = vpow2.f32 %v2225_v33  ;;  %v8503_v4 = vunpack.c.h.b16 %v6704_v60  ;;  %v8506_v2 = vld [vmem:[#allocation21_spill] sm:$0xff] }
 0x7fc   : > { %v2272_v31 = vadd.f32 %v6697_v52, %v2271_v56  ;;  %v2294_v46 = vadd.f32 %v4841_v59, %v2293_v9  ;;  %4862 = vpow2.f32 %v2197_v14  ;;  %v2348_v18 = vpack.c.bf16 %v6858_v51, %v6853_v42  ;;  %v8505_v9 = vld [vmem:[#allocation20_spill] sm:$0xff] }
 0x7fd   : > { %2366 = vmatpush.bf16.msra.mxu2 %v2317_v48  ;;  %v6879_v22 = vpack.c.b16 %v8503_v4, %v8502_v5  ;;  %4864 = vpow2.f32 %v2201_v0  ;;  %v2205_v34 = vmul.f32 1.442695, %v2096_v62  ;;  %v2330_v17 = vpack.c.bf16 %v4837_v15, %v6823_v37  ;;  %v2469_v0 = vpop.trf.xlu0 }
 0x7fe   : > { %v6856_v52 = vadd.f32 %v6702_v39, %v2272_v31  ;;  %v6868_v39 = vpop.eup %4850  ;;  %v2295_v27 = vadd.f32 %v6841_v12, %v2294_v46  ;;  %4866 = vpow2.f32 %v2213_v10  ;;  %2401 = vmatpush.bf16.msrb.mxu3 %v2348_v18  ;;  %v2209_v25 = vmul.f32 1.442695, %v2098_v38  ;;  %v8504_v31 = vld [vmem:[#allocation8_spill] sm:$0xff] }
 0x7ff   : > { %v6873_v61 = vpop.eup %4852  ;;  %4868 = vpow2.f32 %v2217_v63  ;;  %2381 = vmatmul.bf16.vlgmr.msra.gmra.mxu3 %v6879_v22  ;;  %v2328_v62 = vpack.c.bf16 %v6813_v47, %v6805_v49  ;;  %v2326_v16 = vpack.c.bf16 %v6797_v50, %v6788_v24  ;;  %v2324_v47 = vpack.c.bf16 %v6781_v3, %v6769_v41 }
 0x800   : > { %2367 = vmatmul.bf16.vlgmr.msra.gmra.mxu2 %v6864_v35  ;;  %v4855_v6 = vpop.eup %4854  ;;  %v2296_v32 = vadd.f32 %v6846_v57, %v2295_v27  ;;  %v2346_v28 = vpack.c.bf16 %v6873_v61, %v6868_v39  ;;  %4870 = vpow2.f32 %v2205_v34  ;;  %v822_v55 = vadd.f32 %v8505_v9, %v8504_v31 }
 0x801   : > { %2387 = vmatpush.bf16.msrb.mxu2 %v2332_v26  ;;  %v4857_v44 = vpop.eup %4856  ;;  %4872 = vpow2.f32 %v2209_v25  ;;  %v891_v48 = vadd.f32 %v8506_v2, %v8504_v31  ;;  %v2322_v45 = vpack.c.bf16 %v6757_v11, %v6746_v8  ;;  %v2320_v46 = vpack.c.bf16 %v6735_v43, %v6724_v40 }
 0x802   : > { %v4859_v60 = vpop.eup %4858  ;;  %v2297_v7 = vadd.f32 %v4855_v6, %v2296_v32  ;;  %2402 = vmatpush.bf16.msrb.mxu3 %v2346_v28  ;;  %v2487_v38 = vunpack.c.l.b16 %v8507_v1  ;;  %v2336_v27 = vpack.c.bf16 %v4857_v44, %v4855_v6  ;;  %v2318_v8 = vpack.c.bf16 %v6713_v20, %v6708_v36 }
 0x803   : > { %v4861_v23 = vpop.eup %4860  ;;  %v943_v26 = vpack.c.bf16 %v891_v48, %v822_v55  ;;  %v2488_v4 = vunpack.c.h.b16 %v8507_v1  ;;  %v2334_v34 = vpack.c.bf16 %v6846_v57, %v6841_v12 }
 0x804   : > { %v4863_v37 = vpop.eup %4862  ;;  %v2298_v15 = vadd.f32 %v4857_v44, %v2297_v7  ;;  %v2344_v56 = vpack.c.bf16 %v4861_v23, %v4859_v60 }
 0x805   : > { %2388 = vmatpush.bf16.msrb.mxu2 %v2330_v17  ;;  %v4865_v29 = vpop.eup %4864  ;;  %v2489_v21 = vunpack.c.l.b16 %v943_v26  ;;  %v2490_v18 = vunpack.c.h.b16 %v943_v26  ;;  %v6910_v40 = vpop.trf.xlu0 }
 0x806   : > { %v4867_v13 = vpop.eup %4866  ;;  %v2299_v59 = vadd.f32 %v4863_v37, %v2298_v15  ;;  %2403 = vmatpush.bf16.msrb.mxu3 %v2344_v56  ;;  %v2338_v41 = vpack.c.bf16 %v4865_v29, %v4863_v37 }
 0x807   : > { %v4869_v30 = vpop.eup %4868  ;;  %v2491_v5 = vpack.c.b16 %v2489_v21, %v2487_v38 }
 0x808   : > { %v2300_v53 = vadd.f32 %v4865_v29, %v2299_v59  ;;  %v4871_v19 = vpop.eup %4870  ;;  %v2342_v33 = vpack.c.bf16 %v4869_v30, %v4867_v13 }
 0x809   : > { %2389 = vmatpush.bf16.msrb.mxu2 %v2328_v62  ;;  %v4873_v49 = vpop.eup %4872 }
 0x80a   : > { %v2301_v14 = vadd.f32 %v4871_v19, %v2300_v53  ;;  %2404 = vmatpush.bf16.msrb.mxu3 %v2342_v33  ;;  %v2340_v50 = vpack.c.bf16 %v4873_v49, %v4871_v19 }
 0x80c   : > { %v2302_v54 = vadd.f32 %v4873_v49, %v2301_v14 }
 0x80d   : > { %2390 = vmatpush.bf16.msrb.mxu2 %v2326_v16  ;;  %v2471_v36 = vpop.trf.xlu0 }
 0x80e   : > { %v2303_v24 = vadd.f32 %v4867_v13, %v2302_v54  ;;  %2405 = vmatpush.bf16.msrb.mxu3 %v2340_v50 }
 0x810   : > { %v2304_v10 = vadd.f32 %v4869_v30, %v2303_v24 }
 0x811   : > { %2391 = vmatpush.bf16.msrb.mxu2 %v2324_v47 }
 0x812   : > { %v2305_v3 = vadd.f32 %v4859_v60, %v2304_v10  ;;  %2406 = vmatpush.bf16.msrb.mxu3 %v2338_v41 }
 0x814   : > { %v2306_v58 = vadd.f32 %v4861_v23, %v2305_v3 }
 0x815   : > { %2392 = vmatpush.bf16.msrb.mxu2 %v2322_v45  ;;  %v6919_v20 = vpop.trf.xlu0 }
 0x816   : > { %v2307_v63 = vadd.f32 %v6868_v39, %v2306_v58  ;;  %2407 = vmatpush.bf16.msrb.mxu3 %v2336_v27  ;;  %v2492_v39 = vpack.c.b16 %v2490_v18, %v2488_v4 }
 0x818   : > { %v2308_v11 = vadd.f32 %v6873_v61, %v2307_v63 }
 0x819   : > { %2393 = vmatpush.bf16.msrb.mxu2 %v2320_v46 }
 0x81a   : > { %v2309_v43 = vadd.f32 %v6853_v42, %v2308_v11  ;;  %2408 = vmatpush.bf16.msrb.mxu3 %v2334_v34 }
 0x81c   : > { %v2310_v17 = vadd.f32 %v6858_v51, %v2309_v43 }
 0x81d   : > { %2394 = vmatpush.bf16.msrb.mxu2 %v2318_v8  ;;  %2409 = vmatmul.bf16.vlgmr.msrb.gmra.mxu3 %v6879_v22  ;;  %v2473_v42 = vpop.trf.xlu0  ;;  %v2274_v22 = vrot.slane %v6856_v52, 4 }
 0x81e   : > { %2639 = vmatpush.bf16.msra.mxu3 %v2492_v39  ;;  %v2311_v6 = vrot.slane %v2310_v17, 4 }
 0x81f   : > { %v2275_v44 = vadd.f32 %v2274_v22, %v6856_v52 }
 0x820   : > { %2395 = vmatmul.bf16.vlgmr.msrb.gmra.mxu2 %v6864_v35  ;;  %v2312_v25 = vadd.f32 %v2311_v6, %v2310_v17 }
 0x821   : > { %2550 = vmatpush.bf16.msra.mxu2 %v2491_v5  ;;  %v2276_v60 = vrot.slane %v2275_v44, 2 }
 0x822   : > { %v2313_v7 = vrot.slane %v2312_v25, 2 }
 0x823   : > { %v2277_v28 = vadd.f32 %v2276_v60, %v2275_v44 }
 0x824   : > { %v2314_v23 = vadd.f32 %v2313_v7, %v2312_v25 }
 0x825   : > { %v6924_v12 = vpop.trf.xlu0  ;;  %v2278_v37 = vrot.slane %v2277_v28, 1 }
 0x826   : > { %v2315_v15 = vrot.slane %v2314_v23, 1 }
 0x827   : > { %v2279_v29 = vadd.f32 %v2278_v37, %v2277_v28 }
 0x828   : > { %v2316_v13 = vadd.f32 %v2315_v15, %v2314_v23 }
 0x829   : > { %4874 = vrcp.f32 %v2279_v29  ;;  %vm2420_vm15 = vweird.f32 %v2279_v29  ;;  %v2426_v24 = vand.u32 2147483648, %v2279_v29  ;;  %v2424_v45 = vand.u32 2147483647, %v2279_v29 }
 0x82a   : > { %4876 = vrcp.f32 %v2316_v13  ;;  %v2440_v50 = vand.u32 2147483648, %v2316_v13  ;;  %vm2434_vm1 = vweird.f32 %v2316_v13  ;;  %v2438_v10 = vand.u32 2147483647, %v2316_v13 }
 0x82b   : > { %v2427_v21 = vor.u32 1.1754944e-38, %v2426_v24  ;;  %vm2425_vm5 = vcmp.eq.f32.partialorder %v2424_v45, 8.507059e+37 }
 0x82c   : > { %v2441_v1 = vor.u32 1.1754944e-38, %v2440_v50  ;;  %vm2439_vm6 = vcmp.eq.f32.partialorder %v2438_v10, 8.507059e+37 }
 0x82d   : > { %4418 = vmatmul.msk.bf16.vlgmr.msra.gmra.mxu3 %vm1006_vm4, %v2469_v0  ;;  %v2475_v57 = vpop.trf.xlu0 }
 0x82f   : > { %v4875_v52 = vpop.eup %4874 }
 0x830   : > { %4402 = vmatmul.msk.bf16.vlgmr.msra.gmra.mxu2 %vm1006_vm4, %v2469_v0  ;;  %v4877_v30 = vpop.eup %4876  ;;  %v2416_v19 = vmul.f32 %v4875_v52, %v2279_v29  ;;  %vm2421_vm13 = vweird.f32 %v4875_v52 }
 0x831   : > { %v2430_v14 = vmul.f32 %v4877_v30, %v2316_v13  ;;  %vm2435_vm14 = vweird.f32 %v4877_v30  ;;  %vm6947_vm0 = vmor %vm2420_vm15, %vm2421_vm13 }
 0x832   : > { %v2417_v33 = vsub.f32 1.0, %v2416_v19  ;;  %vm2436_vm2 = vmor %vm2434_vm1, %vm2435_vm14 }
 0x833   : > { %v2431_v49 = vsub.f32 1.0, %v2430_v14 }
 0x834   : > { %v2418_v31 = vmul.f32 %v4875_v52, %v2417_v33 }
 0x835   : > { %v6928_v51 = vpop.trf.xlu0  ;;  %v2432_v9 = vmul.f32 %v4877_v30, %v2431_v49 }
 0x836   : > { %v2419_v48 = vadd.f32 %v4875_v52, %v2418_v31 }
 0x837   : > { %v2433_v54 = vadd.f32 %v4877_v30, %v2432_v9 }
 0x838   : > { %v2423_v41 = vsel %vm6947_vm0, %v4875_v52, %v2419_v48 }
 0x839   : > { %v2437_v46 = vsel %vm2436_vm2, %v4877_v30, %v2433_v54  ;;  %v2428_v63 = vsel %vm2425_vm5, %v2427_v21, %v2423_v41 }
 0x83a   : > { %v2442_v27 = vsel %vm2439_vm6, %v2441_v1, %v2437_v46 }
 0x83d   : > { %4419 = vmatmul.msk.bf16.gmra.mxu3 %vm1006_vm4, %v2471_v36  ;;  %v2477_v35 = vpop.trf.xlu0 }
 0x840   : > { %4403 = vmatmul.msk.bf16.gmra.mxu2 %vm1006_vm4, %v2471_v36 }
 0x845   : > { %v6932_v61 = vpop.trf.xlu0 }
 0x84d   : > { %4420 = vmatmul.msk.bf16.gmra.mxu3 %vm1006_vm4, %v2473_v42  ;;  %v2479_v32 = vpop.trf.xlu0 }
 0x850   : > { %4404 = vmatmul.msk.bf16.gmra.mxu2 %vm1006_vm4, %v2473_v42 }
 0x855   : > { %v6939_v62 = vpop.trf.xlu0 }
 0x85d   : > { %4421 = vmatmul.msk.bf16.gmra.mxu3 %vm1006_vm4, %v2475_v57  ;;  %v2481_v59 = vpop.trf.xlu0 }
 0x860   : > { %4405 = vmatmul.msk.bf16.gmra.mxu2 %vm1006_vm4, %v2475_v57 }
 0x865   : > { %v6944_v53 = vpop.trf.xlu0 }
 0x86d   : > { %4422 = vmatmul.msk.bf16.gmra.mxu3 %vm1006_vm4, %v2477_v35  ;;  %v2483_v2 = vpop.trf.xlu0 }
 0x870   : > { %4406 = vmatmul.msk.bf16.gmra.mxu2 %vm1006_vm4, %v2477_v35 }
 0x875   : > { %v2484_v14 = vpop.trf.xlu0 }
 0x87d   : > { %4423 = vmatmul.msk.bf16.gmra.mxu3 %vm1006_vm4, %v2479_v32 }
 0x880   : > { %4407 = vmatmul.msk.bf16.gmra.mxu2 %vm1006_vm4, %v2479_v32 }
 0x882   : > { %v2382_v16 = vpop.f32.mrf.mxu3 }
 0x883   : > { %v2368_v56 = vpop.f32.mrf.mxu2 }
 0x884   : > { %v2383_v3 = vadd.f32 %v2382_v16, %v2368_v56 }
 0x886   : > { %v2443_v18 = vmul.f32 %v2428_v63, %v2383_v3 }
 0x88a   : > { %v2384_v55 = vpop.f32.mrf.mxu3 }
 0x88b   : > { %v2370_v47 = vpop.f32.mrf.mxu2 }
 0x88c   : > { %v2385_v4 = vadd.f32 %v2384_v55, %v2370_v47 }
 0x88d   : > { %4424 = vmatmul.msk.bf16.gmra.mxu3 %vm1006_vm4, %v2481_v59 }
 0x88e   : > { %v2445_v39 = vmul.f32 %v2428_v63, %v2385_v4 }
 0x890   : > { %4408 = vmatmul.msk.bf16.gmra.mxu2 %vm1006_vm4, %v2481_v59 }
 0x89d   : > { %4425 = vmatmul.msk.bf16.gmra.mxu3 %vm1006_vm4, %v2483_v2 }
 0x8a0   : > { %4409 = vmatmul.msk.bf16.gmra.mxu2 %vm1006_vm4, %v2483_v2  ;;  %v2410_v58 = vpop.f32.mrf.mxu3 }
 0x8a3   : > { %v2396_v26 = vpop.f32.mrf.mxu2 }
 0x8a4   : > { %v2411_v38 = vadd.f32 %v2410_v58, %v2396_v26 }
 0x8a6   : > { %v2444_v8 = vmul.f32 %v2442_v27, %v2411_v38 }
 0x8a8   : > { %v2447_v11 = vpack.c.bf16 %v2444_v8, %v2443_v18  ;;  %v2412_v43 = vpop.f32.mrf.mxu3 }
 0x8aa   : > { %2449 = vst [vmem:[#allocation2 + $0x10] sm:$0xff] %v2447_v11 }
 0x8ab   : > { %v2398_v5 = vpop.f32.mrf.mxu2 }
 0x8ac   : > { %v2413_v34 = vadd.f32 %v2412_v43, %v2398_v5 }
 0x8ad   : > { %4426 = vmatmul.msk.bf16.gmra.mxu3 %vm1006_vm4, %v6910_v40 }
 0x8ae   : > { %v2446_v17 = vmul.f32 %v2442_v27, %v2413_v34 }
 0x8b0   : > { %4410 = vmatmul.msk.bf16.gmra.mxu2 %vm1006_vm4, %v6910_v40  ;;  %v2448_v36 = vpack.c.bf16 %v2446_v17, %v2445_v39  ;;  %v6960_v57 = vpop.f32.mrf.mxu3 }
 0x8b2   : > { %2450 = vst [vmem:[#allocation2 + $0x18] sm:$0xff] %v2448_v36 }
 0x8b3   : > { %v6958_v42 = vpop.f32.mrf.mxu2 }
 0x8b8   : > { %v6964_v22 = vpop.f32.mrf.mxu3 }
 0x8b9   : > { %8510 = vst [vmem:[#allocation47_spill] sm:$0xff] %v6964_v22 }
 0x8bb   : > { %v6962_v35 = vpop.f32.mrf.mxu2 }
 0x8bd   : > { %4427 = vmatmul.msk.bf16.gmra.mxu3 %vm1006_vm4, %v6919_v20 }
 0x8c0   : > { %4411 = vmatmul.msk.bf16.gmra.mxu2 %vm1006_vm4, %v6919_v20  ;;  %v6972_v32 = vpop.f32.mrf.mxu3 }
 0x8c1   : > { %8512 = vst [vmem:[#allocation14_spill] sm:$0xff] %v6972_v32 }
 0x8c3   : > { %v6970_v6 = vpop.f32.mrf.mxu2 }
 0x8c4   : > { %8511 = vst [vmem:[#allocation7_spill] sm:$0xff] %v6970_v6  ;;  %v2721_v11 = vmax.f32 %v6958_v42, %v6970_v6 }
 0x8c8   : > { %v6976_v44 = vpop.f32.mrf.mxu3 }
 0x8c9   : > { %8514 = vst [vmem:[#allocation13_spill] sm:$0xff] %v6976_v44 }
 0x8cb   : > { %v6974_v40 = vpop.f32.mrf.mxu2 }
 0x8cc   : > { %8513 = vst [vmem:[#allocation15_spill] sm:$0xff] %v6974_v40  ;;  %v2722_v5 = vmax.f32 %v6962_v35, %v6974_v40 }
 0x8cd   : > { %4428 = vmatmul.msk.bf16.gmra.mxu3 %vm1006_vm4, %v6924_v12 }
 0x8d0   : > { %4412 = vmatmul.msk.bf16.gmra.mxu2 %vm1006_vm4, %v6924_v12  ;;  %v6984_v60 = vpop.f32.mrf.mxu3 }
 0x8d3   : > { %v6982_v25 = vpop.f32.mrf.mxu2 }
 0x8d4   : > { %8515 = vst [vmem:[#allocation48_spill] sm:$0xff] %v6982_v25  ;;  %v2723_v4 = vmax.f32 %v2721_v11, %v6982_v25 }
 0x8d8   : > { %v6988_v20 = vpop.f32.mrf.mxu3 }
 0x8db   : > { %v6986_v7 = vpop.f32.mrf.mxu2 }
 0x8dc   : > { %8516 = vst [vmem:[#allocation38_spill] sm:$0xff] %v6986_v7  ;;  %v2724_v43 = vmax.f32 %v2722_v5, %v6986_v7 }
 0x8dd   : > { %4429 = vmatmul.msk.bf16.gmra.mxu3 %vm1006_vm4, %v6928_v51 }
 0x8e0   : > { %4413 = vmatmul.msk.bf16.gmra.mxu2 %vm1006_vm4, %v6928_v51  ;;  %v6996_v23 = vpop.f32.mrf.mxu3 }
 0x8e3   : > { %v6994_v28 = vpop.f32.mrf.mxu2 }
 0x8e4   : > { %8517 = vst [vmem:[#allocation45_spill] sm:$0xff] %v6994_v28  ;;  %v2725_v17 = vmax.f32 %v2723_v4, %v6994_v28 }
 0x8e8   : > { %v7000_v12 = vpop.f32.mrf.mxu3 }
 0x8e9   : > { %8518 = vst [vmem:[#allocation34_spill] sm:$0xff] %v7000_v12 }
 0x8eb   : > { %v6998_v37 = vpop.f32.mrf.mxu2 }
 0x8ec   : > { %v2726_v36 = vmax.f32 %v2724_v43, %v6998_v37 }
 0x8ed   : > { %4430 = vmatmul.msk.bf16.gmra.mxu3 %vm1006_vm4, %v6932_v61 }
 0x8f0   : > { %4414 = vmatmul.msk.bf16.gmra.mxu2 %vm1006_vm4, %v6932_v61  ;;  %v7008_v29 = vpop.f32.mrf.mxu3 }
 0x8f3   : > { %v7006_v15 = vpop.f32.mrf.mxu2 }
 0x8f8   : > { %v7012_v51 = vpop.f32.mrf.mxu3 }
 0x8f9   : > { %8519 = vst [vmem:[#allocation36_spill] sm:$0xff] %v7012_v51 }
 0x8fb   : > { %v7010_v13 = vpop.f32.mrf.mxu2 }
 0x8fd   : > { %4431 = vmatmul.msk.bf16.gmra.mxu3 %vm1006_vm4, %v6939_v62 }
 0x900   : > { %4415 = vmatmul.msk.bf16.gmra.mxu2 %vm1006_vm4, %v6939_v62  ;;  %v7020_v52 = vpop.f32.mrf.mxu3 }
 0x903   : > { %v7018_v59 = vpop.f32.mrf.mxu2 }
 0x908   : > { %v7024_v61 = vpop.f32.mrf.mxu3 }
 0x909   : > { %8520 = vst [vmem:[#allocation6_spill] sm:$0xff] %v7024_v61 }
 0x90b   : > { %v7022_v56 = vpop.f32.mrf.mxu2 }
 0x90d   : > { %4432 = vmatmul.msk.bf16.gmra.mxu3 %vm1006_vm4, %v6944_v53 }
 0x910   : > { %4416 = vmatmul.msk.bf16.gmra.mxu2 %vm1006_vm4, %v6944_v53  ;;  %v7032_v16 = vpop.f32.mrf.mxu3 }
 0x913   : > { %v7030_v30 = vpop.f32.mrf.mxu2 }
 0x918   : > { %v7036_v62 = vpop.f32.mrf.mxu3 }
 0x919   : > { %8521 = vst [vmem:[#allocation42_spill] sm:$0xff] %v7036_v62 }
 0x91b   : > { %v7034_v19 = vpop.f32.mrf.mxu2 }
 0x91d   : > { %4433 = vmatmul.msk.bf16.gmra.mxu3 %vm1006_vm4, %v2484_v14 }
 0x920   : > { %4417 = vmatmul.msk.bf16.gmra.mxu2 %vm1006_vm4, %v2484_v14  ;;  %v7042_v49 = vpop.f32.mrf.mxu3  ;;  %v2727_v14 = vmax.f32 %v2725_v17, %v7006_v15 }
 0x922   : > { %v2729_v6 = vmax.f32 %v2727_v14, %v7018_v59 }
 0x923   : > { %v7040_v33 = vpop.f32.mrf.mxu2 }
 0x924   : > { %v2731_v11 = vmax.f32 %v2729_v6, %v7030_v30  ;;  %v2759_v6 = vmax.f32 %v6964_v22, %v6976_v44 }
 0x926   : > { %v2733_v25 = vmax.f32 %v2731_v11, %v7040_v33 }
 0x928   : > { %v7046_v53 = vpop.f32.mrf.mxu3 }
 0x92b   : > { %v7044_v47 = vpop.f32.mrf.mxu2 }
 0x930   : > { %v7050_v9 = vpop.f32.mrf.mxu3 }
 0x933   : > { %v7048_v31 = vpop.f32.mrf.mxu2 }
 0x934   : > { %v2735_v43 = vmax.f32 %v2733_v25, %v7048_v31  ;;  %v2761_v25 = vmax.f32 %v2759_v6, %v6988_v20 }
 0x938   : > { %v7054_v2 = vpop.f32.mrf.mxu3 }
 0x939   : > { %8522 = vst [vmem:[#allocation37_spill] sm:$0xff] %v7054_v2 }
 0x93b   : > { %v7052_v55 = vpop.f32.mrf.mxu2 }
 0x940   : > { %v7058_v54 = vpop.f32.mrf.mxu3 }
 0x943   : > { %v7056_v48 = vpop.f32.mrf.mxu2 }
 0x948   : > { %v7062_v50 = vpop.f32.mrf.mxu3 }
 0x94b   : > { %v7060_v24 = vpop.f32.mrf.mxu2 }
 0x94c   : > { %8523 = vst [vmem:[#allocation39_spill] sm:$0xff] %v7060_v24 }
 0x950   : > { %v7066_v45 = vpop.f32.mrf.mxu3 }
 0x953   : > { %v7064_v0 = vpop.f32.mrf.mxu2 }
 0x958   : > { %v7070_v10 = vpop.f32.mrf.mxu3 }
 0x959   : > { %8524 = vst [vmem:[#allocation32_spill] sm:$0xff] %v7070_v10 }
 0x95b   : > { %v7068_v26 = vpop.f32.mrf.mxu2 }
 0x960   : > { %v7074_v41 = vpop.f32.mrf.mxu3 }
 0x963   : > { %v7072_v3 = vpop.f32.mrf.mxu2 }
 0x968   : > { %v7078_v21 = vpop.f32.mrf.mxu3 }
 0x969   : > { %8525 = vst [vmem:[#allocation17_spill] sm:$0xff] %v7078_v21 }
 0x96b   : > { %v7076_v46 = vpop.f32.mrf.mxu2 }
 0x970   : > { %v7082_v1 = vpop.f32.mrf.mxu3 }
 0x971   : > { %8526 = vst [vmem:[#allocation18_spill] sm:$0xff] %v7082_v1 }
 0x973   : > { %v7080_v58 = vpop.f32.mrf.mxu2 }
 0x978   : > { %v7086_v63 = vpop.f32.mrf.mxu3 }
 0x979   : > { %8527 = vst [vmem:[#allocation16_spill] sm:$0xff] %v7086_v63 }
 0x97b   : > { %v7084_v38 = vpop.f32.mrf.mxu2 }
 0x980   : > { %v7090_v18 = vpop.f32.mrf.mxu3 }
 0x981   : > { %8528 = vst [vmem:[#allocation10_spill] sm:$0xff] %v7090_v18  ;;  %v2728_v18 = vmax.f32 %v2726_v36, %v7010_v13  ;;  %v2737_v36 = vmax.f32 %v2735_v43, %v7056_v48 }
 0x983   : > { %v7088_v27 = vpop.f32.mrf.mxu2  ;;  %v2730_v40 = vmax.f32 %v2728_v18, %v7022_v56 }
 0x985   : > { %v2732_v5 = vmax.f32 %v2730_v40, %v7034_v19  ;;  %v2739_v40 = vmax.f32 %v2737_v36, %v7064_v0 }
 0x987   : > { %v2734_v4 = vmax.f32 %v2732_v5, %v7044_v47  ;;  %v2758_v5 = vmax.f32 %v6960_v57, %v6972_v32 }
 0x988   : > { %v7100_v34 = vpop.f32.mrf.mxu3 }
 0x989   : > { %v2736_v17 = vmax.f32 %v2734_v4, %v7052_v55  ;;  %v2741_v4 = vmax.f32 %v2739_v40, %v7072_v3 }
 0x98b   : > { %v7092_v8 = vpop.f32.mrf.mxu2  ;;  %v2738_v18 = vmax.f32 %v2736_v17, %v7060_v24  ;;  %v2760_v17 = vmax.f32 %v2758_v5, %v6984_v60  ;;  %v2763_v24 = vmax.f32 %v2761_v25, %v7000_v12  ;;  %v2743_v44 = vmax.f32 %v2741_v4, %v7080_v58 }
 0x98d   : > { %v2740_v14 = vmax.f32 %v2738_v18, %v7068_v26  ;;  %v2762_v22 = vmax.f32 %v2760_v17, %v6996_v23  ;;  %v2765_v32 = vmax.f32 %v2763_v24, %v7012_v51  ;;  %v2745_v6 = vmax.f32 %v2743_v44, %v7088_v27 }
 0x98f   : > { %v2742_v43 = vmax.f32 %v2740_v14, %v7076_v46  ;;  %v2764_v14 = vmax.f32 %v2762_v22, %v7008_v29  ;;  %v2767_v5 = vmax.f32 %v2765_v32, %v7024_v61 }
 0x990   : > { %v7116_v28 = vpop.f32.mrf.mxu3 }
 0x991   : > { %v2744_v36 = vmax.f32 %v2742_v43, %v7084_v38  ;;  %v2766_v43 = vmax.f32 %v2764_v14, %v7020_v52  ;;  %v2769_v17 = vmax.f32 %v2767_v5, %v7036_v62 }
 0x993   : > { %v7102_v39 = vpop.f32.mrf.mxu2  ;;  %v2746_v40 = vmax.f32 %v2744_v36, %v7092_v8  ;;  %v2768_v36 = vmax.f32 %v2766_v43, %v7032_v16  ;;  %v2771_v22 = vmax.f32 %v2769_v17, %v7046_v53 }
 0x994   : > { %v2747_v25 = vmax.f32 %v2745_v6, %v7102_v39 }
 0x995   : > { %v2770_v32 = vmax.f32 %v2768_v36, %v7042_v49  ;;  %v2773_v6 = vmax.f32 %v2771_v22, %v7054_v2 }
 0x997   : > { %v2772_v14 = vmax.f32 %v2770_v32, %v7050_v9  ;;  %v2775_v5 = vmax.f32 %v2773_v6, %v7062_v50 }
 0x998   : > { %v7137_v18 = vpop.f32.mrf.mxu3 }
 0x99b   : > { %v7112_v7 = vpop.f32.mrf.mxu2 }
 0x99c   : > { %v2748_v4 = vmax.f32 %v2746_v40, %v7112_v7 }
 0x9a0   : > { %v7157_v61 = vpop.f32.mrf.mxu3 }
 0x9a3   : > { %v7126_v11 = vpop.f32.mrf.mxu2 }
 0x9a4   : > { %v2749_v24 = vmax.f32 %v2747_v25, %v7126_v11  ;;  %v2774_v25 = vmax.f32 %v2772_v14, %v7058_v54 }
 0x9a6   : > { %v2776_v17 = vmax.f32 %v2774_v25, %v7066_v45 }
 0x9a8   : > { %v2778_v36 = vmax.f32 %v2776_v17, %v7074_v41 }
 0x9aa   : > { %v2780_v32 = vmax.f32 %v2778_v36, %v7082_v1  ;;  %v8534_v1 = vld [vmem:[#allocation45_spill] sm:$0xff] }
 0x9ab   : > { %v7147_v12 = vpop.f32.mrf.mxu2 }
 0x9ac   : > { %v2750_v44 = vmax.f32 %v2748_v4, %v7147_v12  ;;  %v2777_v4 = vmax.f32 %v2775_v5, %v7070_v10 }
 0x9ae   : > { %v2751_v51 = vmax.f32 %v2749_v24, %v2750_v44  ;;  %v2779_v24 = vmax.f32 %v2777_v4, %v7078_v21 }
 0x9b0   : > { %v2752_v40 = vrot.slane %v2751_v51, 4  ;;  %v2781_v22 = vmax.f32 %v2779_v24, %v7086_v63  ;;  %v8530_v24 = vld [vmem:[#allocation7_spill] sm:$0xff] }
 0x9b2   : > { %v2753_v62 = vmax.f32 %v2751_v51, %v2752_v40  ;;  %v2783_v6 = vmax.f32 %v2781_v22, %v7100_v34  ;;  %v7169_v51 = vpop.f32.mrf.mxu3  ;;  %v8529_v40 = vld [vmem:[#allocation10_spill] sm:$0xff] }
 0x9b3   : > { %v2782_v14 = vmax.f32 %v2780_v32, %v8529_v40  ;;  %v8531_v32 = vld [vmem:[#allocation15_spill] sm:$0xff] }
 0x9b4   : > { %v2754_v43 = vrot.slane %v2753_v62, 2  ;;  %v2785_v5 = vmax.f32 %v2783_v6, %v7137_v18 }
 0x9b5   : > { %v2784_v25 = vmax.f32 %v2782_v14, %v7116_v28  ;;  %v8532_v14 = vld [vmem:[#allocation48_spill] sm:$0xff] }
 0x9b6   : > { %v2755_v44 = vmax.f32 %v2753_v62, %v2754_v43  ;;  %v2787_v62 = vmax.f32 %v2785_v5, %v7169_v51 }
 0x9b7   : > { %v2786_v4 = vmax.f32 %v2784_v25, %v7157_v61 }
 0x9b8   : > { %v2756_v2 = vrot.slane %v2755_v44, 1 }
 0x9b9   : > { %v2788_v22 = vmax.f32 %v2786_v4, %v2787_v62 }
 0x9ba   : > { %v7173_v10 = vmax.f32 %v2755_v44, %v2756_v2 }
 0x9bb   : > { %v2789_v25 = vrot.slane %v2788_v22, 4 }
 0x9bc   : > { %v2795_v43 = vsub.f32 %v6958_v42, %v7173_v10  ;;  %v2797_v17 = vsub.f32 %v6962_v35, %v7173_v10  ;;  %v2799_v36 = vsub.f32 %v8530_v24, %v7173_v10  ;;  %v2801_v2 = vsub.f32 %v8531_v32, %v7173_v10  ;;  %v8533_v42 = vld [vmem:[#allocation38_spill] sm:$0xff] }
 0x9bd   : > { %v2803_v5 = vsub.f32 %v8532_v14, %v7173_v10  ;;  %v2805_v63 = vsub.f32 %v8533_v42, %v7173_v10  ;;  %v2807_v24 = vsub.f32 %v8534_v1, %v7173_v10  ;;  %v2790_v4 = vmax.f32 %v2788_v22, %v2789_v25 }
 0x9be   : > { %v2859_v44 = vmul.f32 1.442695, %v2795_v43  ;;  %v2863_v6 = vmul.f32 1.442695, %v2797_v17  ;;  %v2867_v21 = vmul.f32 1.442695, %v2799_v36  ;;  %v2809_v43 = vsub.f32 %v6998_v37, %v7173_v10 }
 0x9bf   : > { %v2871_v35 = vmul.f32 1.442695, %v2801_v2  ;;  %v2875_v62 = vmul.f32 1.442695, %v2803_v5  ;;  %v2879_v17 = vmul.f32 1.442695, %v2805_v63  ;;  %v2811_v36 = vsub.f32 %v7006_v15, %v7173_v10 }
 0x9c0   : > { %4878 = vpow2.f32 %v2859_v44  ;;  %v2813_v2 = vsub.f32 %v7010_v13, %v7173_v10  ;;  %v2883_v1 = vmul.f32 1.442695, %v2807_v24  ;;  %v2791_v22 = vrot.slane %v2790_v4, 2 }
 0x9c1   : > { %4880 = vpow2.f32 %v2863_v6  ;;  %v2817_v6 = vsub.f32 %v7022_v56, %v7173_v10  ;;  %v2887_v15 = vmul.f32 1.442695, %v2809_v43  ;;  %v2819_v14 = vsub.f32 %v7030_v30, %v7173_v10 }
 0x9c2   : > { %4882 = vpow2.f32 %v2867_v21  ;;  %v2815_v21 = vsub.f32 %v7018_v59, %v7173_v10  ;;  %v2891_v13 = vmul.f32 1.442695, %v2811_v36  ;;  %v2821_v59 = vsub.f32 %v7034_v19, %v7173_v10 }
 0x9c3   : > { %4884 = vpow2.f32 %v2871_v35  ;;  %v2895_v42 = vmul.f32 1.442695, %v2813_v2  ;;  %v2823_v35 = vsub.f32 %v7040_v33, %v7173_v10  ;;  %v2825_v30 = vsub.f32 %v7044_v47, %v7173_v10 }
 0x9c4   : > { %4886 = vpow2.f32 %v2875_v62  ;;  %v2899_v24 = vmul.f32 1.442695, %v2815_v21  ;;  %v2792_v62 = vmax.f32 %v2790_v4, %v2791_v22  ;;  %v2827_v36 = vsub.f32 %v7048_v31, %v7173_v10 }
 0x9c5   : > { %4888 = vpow2.f32 %v2879_v17  ;;  %v2903_v17 = vmul.f32 1.442695, %v2817_v6  ;;  %v2907_v19 = vmul.f32 1.442695, %v2819_v14  ;;  %v2829_v33 = vsub.f32 %v7052_v55, %v7173_v10  ;;  %v8538_v6 = vld [vmem:[#allocation39_spill] sm:$0xff] }
 0x9c6   : > { %v7194_v32 = vpop.eup %4878  ;;  %4890 = vpow2.f32 %v2883_v1  ;;  %v2831_v4 = vsub.f32 %v7056_v48, %v7173_v10  ;;  %v2911_v21 = vmul.f32 1.442695, %v2821_v59  ;;  %v2915_v47 = vmul.f32 1.442695, %v2823_v35 }
 0x9c7   : > { %8535 = vst [vmem:[#allocation11_spill] sm:$0xff] %v7194_v32  ;;  %v7198_v44 = vpop.eup %4880  ;;  %4892 = vpow2.f32 %v2887_v15  ;;  %v2793_v22 = vrot.slane %v2792_v62, 1  ;;  %v2833_v15 = vsub.f32 %v8538_v6, %v7173_v10  ;;  %v2919_v14 = vmul.f32 1.442695, %v2825_v30 }
 0x9c8   : > { %8536 = vst [vmem:[#allocation9_spill] sm:$0xff] %v7198_v44  ;;  %v2987_v37 = vadd.f32 %v7198_v44, %v7194_v32  ;;  %v7206_v63 = vpop.eup %4882  ;;  %4894 = vpow2.f32 %v2891_v13  ;;  %v2835_v55 = vsub.f32 %v7064_v0, %v7173_v10  ;;  %v2923_v13 = vmul.f32 1.442695, %v2827_v36 }
 0x9c9   : > { %v7213_v25 = vpop.eup %4884  ;;  %4896 = vpow2.f32 %v2895_v42  ;;  %v2837_v59 = vsub.f32 %v7068_v26, %v7173_v10  ;;  %v2839_v42 = vsub.f32 %v7072_v3, %v7173_v10  ;;  %v2927_v35 = vmul.f32 1.442695, %v2829_v33 }
 0x9ca   : > { %v2988_v5 = vadd.f32 %v7206_v63, %v2987_v37  ;;  %8537 = vst [vmem:[#allocation40_spill] sm:$0xff] %v7213_v25  ;;  %v7220_v43 = vpop.eup %4886  ;;  %4898 = vpow2.f32 %v2899_v24  ;;  %v7250_v30 = vmax.f32 %v2792_v62, %v2793_v22  ;;  %v2851_v36 = vsub.f32 %v7102_v39, %v7173_v10 }
 0x9cb   : > { %v7227_v1 = vpop.eup %4888  ;;  %4900 = vpow2.f32 %v2903_v17  ;;  %v2935_v26 = vmul.f32 1.442695, %v2833_v15  ;;  %v2855_v3 = vsub.f32 %v7126_v11, %v7173_v10  ;;  %v2857_v62 = vsub.f32 %v7147_v12, %v7173_v10  ;;  %v8539_v15 = vld [vmem:[#allocation47_spill] sm:$0xff] }
 0x9cc   : > { %v2989_v56 = vadd.f32 %v7213_v25, %v2988_v5  ;;  %v7234_v31 = vpop.eup %4890  ;;  %4902 = vpow2.f32 %v2907_v19  ;;  %v2947_v39 = vmul.f32 1.442695, %v2839_v42  ;;  %v2796_v11 = vsub.f32 %v6960_v57, %v7250_v30  ;;  %v8540_v42 = vld [vmem:[#allocation14_spill] sm:$0xff] }
 0x9cd   : > { %v7241_v5 = vpop.eup %4892  ;;  %4904 = vpow2.f32 %v2911_v21  ;;  %v2943_v21 = vmul.f32 1.442695, %v2837_v59  ;;  %v2971_v6 = vmul.f32 1.442695, %v2851_v36  ;;  %v2853_v12 = vsub.f32 %v7112_v7, %v7173_v10 }
 0x9ce   : > { %v2990_v2 = vadd.f32 %v7220_v43, %v2989_v56  ;;  %v7247_v24 = vpop.eup %4894  ;;  %4906 = vpow2.f32 %v2915_v47  ;;  %v2931_v56 = vmul.f32 1.442695, %v2831_v4  ;;  %v2983_v57 = vmul.f32 1.442695, %v2857_v62 }
 0x9cf   : > { %v7252_v17 = vpop.eup %4896  ;;  %4908 = vpow2.f32 %v2919_v14  ;;  %v2798_v14 = vsub.f32 %v8539_v15, %v7250_v30  ;;  %v2861_v7 = vmul.f32 1.442695, %v2796_v11  ;;  %v8542_v15 = vld [vmem:[#allocation12_spill] sm:$0xff]  ;;  %v8543_v11 = vld [vmem:[#allocation27_spill] sm:$0xff] }
 0x9d0   : > { %v2991_v37 = vadd.f32 %v7227_v1, %v2990_v2  ;;  %v7256_v19 = vpop.eup %4898  ;;  %4910 = vpow2.f32 %v2923_v13  ;;  %v2939_v2 = vmul.f32 1.442695, %v2835_v55  ;;  %v2979_v13 = vmul.f32 1.442695, %v2855_v3  ;;  %v8541_v3 = vld [vmem:[#allocation13_spill] sm:$0xff] }
 0x9d1   : > { %v7261_v4 = vpop.eup %4900  ;;  %4912 = vpow2.f32 %v2927_v35  ;;  %v2800_v35 = vsub.f32 %v8540_v42, %v7250_v30 }
 0x9d2   : > { %v2992_v48 = vadd.f32 %v7234_v31, %v2991_v37  ;;  %v7265_v47 = vpop.eup %4902  ;;  %4914 = vpow2.f32 %v2931_v56 }
 0x9d3   : > { %v7270_v22 = vpop.eup %4904  ;;  %4916 = vpow2.f32 %v2935_v26  ;;  %v2869_v42 = vmul.f32 1.442695, %v2800_v35 }
 0x9d4   : > { %v2993_v0 = vadd.f32 %v7241_v5, %v2992_v48  ;;  %v7274_v55 = vpop.eup %4906  ;;  %4918 = vpow2.f32 %v2939_v2  ;;  %v2802_v2 = vsub.f32 %v8541_v3, %v7250_v30  ;;  %v2843_v3 = vsub.f32 %v7080_v58, %v7173_v10 }
 0x9d5   : > { %v7279_v59 = vpop.eup %4908  ;;  %4920 = vpow2.f32 %v2943_v21  ;;  %v2849_v21 = vsub.f32 %v7092_v8, %v7173_v10 }
 0x9d6   : > { %v2994_v33 = vadd.f32 %v7247_v24, %v2993_v0  ;;  %v7283_v56 = vpop.eup %4910  ;;  %v2847_v0 = vsub.f32 %v7088_v27, %v7173_v10  ;;  %4922 = vpow2.f32 %v2947_v39 }
 0x9d7   : > { %v7288_v26 = vpop.eup %4912  ;;  %4924 = vpow2.f32 %v2971_v6  ;;  %v2804_v6 = vsub.f32 %v6984_v60, %v7250_v30  ;;  %v2873_v60 = vmul.f32 1.442695, %v2802_v2  ;;  %v2967_v58 = vmul.f32 1.442695, %v2849_v21 }
 0x9d8   : > { %v2995_v37 = vadd.f32 %v7252_v17, %v2994_v33  ;;  %v2865_v33 = vmul.f32 1.442695, %v2798_v14  ;;  %v7292_v62 = vpop.eup %4914  ;;  %4926 = vpow2.f32 %v2979_v13  ;;  %v2963_v8 = vmul.f32 1.442695, %v2847_v0 }
 0x9d9   : > { %v7297_v39 = vpop.eup %4916  ;;  %4928 = vpow2.f32 %v2983_v57  ;;  %v2806_v57 = vsub.f32 %v6988_v20, %v7250_v30  ;;  %v2877_v20 = vmul.f32 1.442695, %v2804_v6  ;;  %v2841_v2 = vsub.f32 %v7076_v46, %v7173_v10 }
 0x9da   : > { %v2996_v48 = vadd.f32 %v7256_v19, %v2995_v37  ;;  %v2975_v37 = vmul.f32 1.442695, %v2853_v12  ;;  %v7303_v14 = vpop.eup %4918  ;;  %4930 = vpow2.f32 %v2861_v7 }
 0x9db   : > { %v7308_v13 = vpop.eup %4920  ;;  %4932 = vpow2.f32 %v2865_v33 }
 0x9dc   : > { %v2997_v36 = vadd.f32 %v7261_v4, %v2996_v48  ;;  %v862_v48 = vadd.f32 %v8543_v11, %v8542_v15  ;;  %v7314_v35 = vpop.eup %4922  ;;  %v2845_v11 = vsub.f32 %v7084_v38, %v7173_v10  ;;  %4934 = vpow2.f32 %v2975_v37 }
 0x9dd   : > { %v7319_v7 = vpop.eup %4924  ;;  %4936 = vpow2.f32 %v2869_v42  ;;  %v3075_v10 = vpack.c.bf16 %v7279_v59, %v7274_v55 }
 0x9de   : > { %v2998_v27 = vadd.f32 %v7265_v47, %v2997_v36  ;;  %v8544_v36 = vld [vmem:[#allocation26_spill] sm:$0xff]  ;;  %v7324_v33 = vpop.eup %4926  ;;  %4938 = vpow2.f32 %v2963_v8  ;;  %v2959_v6 = vmul.f32 1.442695, %v2845_v11 }
 0x9df   : > { %v931_v44 = vadd.f32 %v8544_v36, %v8542_v15  ;;  %v2808_v15 = vsub.f32 %v6996_v23, %v7250_v30  ;;  %v2955_v36 = vmul.f32 1.442695, %v2843_v3  ;;  %v7329_v21 = vpop.eup %4928  ;;  %4940 = vpow2.f32 %v2873_v60  ;;  %3103 = vmatpush.bf16.msra.mxu0 %v3075_v10 }
 0x9e0   : > { %v2999_v12 = vadd.f32 %v7270_v22, %v2998_v27  ;;  %v8545_v27 = vld [vmem:[#allocation22_spill] sm:$0xff]  ;;  %v2881_v23 = vmul.f32 1.442695, %v2806_v57  ;;  %v7335_v42 = vpop.eup %4930  ;;  %4942 = vpow2.f32 %v2967_v58  ;;  %v3091_v3 = vpack.c.bf16 %v7329_v21, %v7324_v33 }
 0x9e1   : > { %v7331_v37 = vpack.c.bf16 %v931_v44, %v862_v48  ;;  %v7340_v46 = vpop.eup %4932  ;;  %v2812_v44 = vsub.f32 %v7008_v29, %v7250_v30  ;;  %4944 = vpow2.f32 %v2877_v20  ;;  %v2885_v48 = vmul.f32 1.442695, %v2808_v15  ;;  %v8547_v29 = vld [vmem:[#allocation36_spill] sm:$0xff] }
 0x9e2   : > { %v3000_v0 = vadd.f32 %v7274_v55, %v2999_v12  ;;  %v8546_v12 = vld [vmem:[#allocation34_spill] sm:$0xff]  ;;  %v7346_v8 = vpop.eup %4934  ;;  %v2951_v57 = vmul.f32 1.442695, %v2841_v2  ;;  %4946 = vpow2.f32 %v2955_v36  ;;  %v3024_v11 = vadd.f32 %v7340_v46, %v7335_v42  ;;  %3117 = vmatpush.bf16.msra.mxu1 %v3091_v3 }
 0x9e3   : > { %v2810_v32 = vsub.f32 %v8546_v12, %v7250_v30  ;;  %v7351_v55 = vpop.eup %4936  ;;  %v2814_v58 = vsub.f32 %v8547_v29, %v7250_v30  ;;  %4948 = vpow2.f32 %v2881_v23  ;;  %v3073_v2 = vpack.c.bf16 %v7270_v22, %v7265_v47 }
 0x9e4   : > { %v3001_v38 = vadd.f32 %v7279_v59, %v3000_v0  ;;  %v7356_v15 = vpop.eup %4938  ;;  %4950 = vpow2.f32 %v2959_v6  ;;  %v2893_v12 = vmul.f32 1.442695, %v2812_v44  ;;  %v2856_v6 = vsub.f32 %v7157_v61, %v7250_v30 }
 0x9e5   : > { %v2889_v0 = vmul.f32 1.442695, %v2810_v32  ;;  %v7362_v36 = vpop.eup %4940  ;;  %4952 = vpow2.f32 %v2885_v48  ;;  %v3089_v32 = vpack.c.bf16 %v7346_v8, %v7319_v7  ;;  %3104 = vmatpush.bf16.msra.mxu0 %v3073_v2  ;;  %v2897_v48 = vmul.f32 1.442695, %v2814_v58  ;;  %v8549_v2 = vld [vmem:[#allocation42_spill] sm:$0xff] }
 0x9e6   : > { %v3002_v25 = vadd.f32 %v7283_v56, %v3001_v38  ;;  %v2816_v38 = vsub.f32 %v7020_v52, %v7250_v30  ;;  %v7368_v23 = vpop.eup %4942  ;;  %4954 = vpow2.f32 %v2951_v57  ;;  %v8548_v52 = vld [vmem:[#allocation6_spill] sm:$0xff]  ;;  %v2820_v57 = vsub.f32 %v7032_v16, %v7250_v30 }
 0x9e7   : > { %v7373_v47 = vpop.eup %4944  ;;  %v2818_v44 = vsub.f32 %v8548_v52, %v7250_v30  ;;  %4956 = vpow2.f32 %v2889_v0  ;;  %3118 = vmatpush.bf16.msra.mxu1 %v3089_v32  ;;  %v2822_v22 = vsub.f32 %v8549_v2, %v7250_v30  ;;  %v3087_v58 = vpack.c.bf16 %v7368_v23, %v7356_v15 }
 0x9e8   : > { %v3003_v60 = vadd.f32 %v7288_v26, %v3002_v25  ;;  %v3025_v25 = vadd.f32 %v7351_v55, %v3024_v11  ;;  %4958 = vpow2.f32 %v2893_v12  ;;  %v2901_v0 = vmul.f32 1.442695, %v2816_v38  ;;  %v8550_v12 = vld [vmem:[#allocation37_spill] sm:$0xff] }
 0x9e9   : > { %v2824_v16 = vsub.f32 %v7042_v49, %v7250_v30  ;;  %v2828_v38 = vsub.f32 %v7050_v9, %v7250_v30  ;;  %v2830_v52 = vsub.f32 %v8550_v12, %v7250_v30  ;;  %4960 = vpow2.f32 %v2897_v48 }
 0x9ea   : > { %v3004_v20 = vadd.f32 %v7292_v62, %v3003_v60  ;;  %v3026_v3 = vadd.f32 %v7362_v36, %v3025_v25  ;;  %v4947_v60 = vpop.eup %4946  ;;  %v2905_v2 = vmul.f32 1.442695, %v2818_v44  ;;  %v2834_v9 = vsub.f32 %v7062_v50, %v7250_v30 }
 0x9eb   : > { %v7384_v25 = vpop.eup %4948  ;;  %3119 = vmatpush.bf16.msra.mxu1 %v3087_v58  ;;  %4962 = vpow2.f32 %v2901_v0  ;;  %v2909_v48 = vmul.f32 1.442695, %v2820_v57  ;;  %v2913_v12 = vmul.f32 1.442695, %v2822_v22  ;;  %v2917_v50 = vmul.f32 1.442695, %v2824_v16 }
 0x9ec   : > { %v3005_v10 = vadd.f32 %v7297_v39, %v3004_v20  ;;  %v3027_v29 = vadd.f32 %v7373_v47, %v3026_v3  ;;  %v3071_v20 = vpack.c.bf16 %v7261_v4, %v7256_v19  ;;  %v4951_v32 = vpop.eup %4950  ;;  %v2826_v3 = vsub.f32 %v7046_v53, %v7250_v30 }
 0x9ed   : > { %v7396_v4 = vpop.eup %4952  ;;  %v2832_v53 = vsub.f32 %v7058_v54, %v7250_v30  ;;  %v3085_v44 = vpack.c.bf16 %v4951_v32, %v4947_v60  ;;  %4964 = vpow2.f32 %v2905_v2  ;;  %v3067_v22 = vpack.c.bf16 %v7241_v5, %v7234_v31 }
 0x9ee   : > { %v3006_v11 = vadd.f32 %v7303_v14, %v3005_v10  ;;  %v3028_v19 = vadd.f32 %v7384_v25, %v3027_v29  ;;  %3105 = vmatpush.bf16.msra.mxu0 %v3071_v20  ;;  %v3069_v20 = vpack.c.bf16 %v7252_v17, %v7247_v24  ;;  %v8551_v24 = vld [vmem:[#allocation32_spill] sm:$0xff]  ;;  %v2921_v0 = vmul.f32 1.442695, %v2826_v3 }
 0x9ef   : > { %3120 = vmatpush.bf16.msra.mxu1 %v3085_v44  ;;  %v2858_v17 = vsub.f32 %v7169_v51, %v7250_v30  ;;  %4966 = vpow2.f32 %v2909_v48  ;;  %v2854_v31 = vsub.f32 %v7137_v18, %v7250_v30  ;;  %v2929_v5 = vmul.f32 1.442695, %v2830_v52 }
 0x9f0   : > { %v3007_v10 = vadd.f32 %v7308_v13, %v3006_v11  ;;  %v4955_v11 = vpop.eup %4954  ;;  %v3029_v29 = vadd.f32 %v7396_v4, %v3028_v19  ;;  %4968 = vpow2.f32 %v2913_v12  ;;  %v2848_v18 = vsub.f32 %v8529_v40, %v7250_v30 }
 0x9f1   : > { %v7408_v59 = vpop.eup %4956  ;;  %v3083_v61 = vpack.c.bf16 %v4955_v11, %v7314_v35  ;;  %4970 = vpow2.f32 %v2917_v50  ;;  %v2985_v48 = vmul.f32 1.442695, %v2858_v17  ;;  %v2977_v12 = vmul.f32 1.442695, %v2854_v31  ;;  %v8553_v50 = vld [vmem:[#allocation18_spill] sm:$0xff] }
 0x9f2   : > { %v3008_v49 = vadd.f32 %v7314_v35, %v3007_v10  ;;  %v2836_v10 = vsub.f32 %v7066_v45, %v7250_v30  ;;  %v3030_v54 = vadd.f32 %v7408_v59, %v3029_v29  ;;  %3106 = vmatpush.bf16.msra.mxu0 %v3069_v20  ;;  %v7415_v19 = vpop.eup %4958  ;;  %v2852_v20 = vsub.f32 %v7116_v28, %v7250_v30 }
 0x9f3   : > { %v7424_v29 = vpop.eup %4960  ;;  %v2981_v28 = vmul.f32 1.442695, %v2856_v6  ;;  %3121 = vmatpush.bf16.msra.mxu1 %v3083_v61  ;;  %4972 = vpow2.f32 %v2921_v0  ;;  %v3081_v6 = vpack.c.bf16 %v7308_v13, %v7303_v14  ;;  %v8552_v13 = vld [vmem:[#allocation40_spill] sm:$0xff]  ;;  %v2937_v0 = vmul.f32 1.442695, %v2834_v9 }
 0x9f4   : > { %v3009_v58 = vadd.f32 %v4955_v11, %v3008_v49  ;;  %v3031_v49 = vadd.f32 %v7415_v19, %v3030_v54  ;;  %v7432_v2 = vpop.eup %4962  ;;  %v2840_v11 = vsub.f32 %v7074_v41, %v7250_v30  ;;  %v2973_v52 = vmul.f32 1.442695, %v2852_v20  ;;  %v8554_v20 = vld [vmem:[#allocation16_spill] sm:$0xff] }
 0x9f5   : > { %v2846_v61 = vsub.f32 %v8554_v20, %v7250_v30  ;;  %v3070_v20 = vpack.c.bf16 %v7424_v29, %v7415_v19 }
 0x9f6   : > { %v3010_v57 = vadd.f32 %v4947_v60, %v3009_v58  ;;  %v2925_v60 = vmul.f32 1.442695, %v2828_v38  ;;  %v3032_v3 = vadd.f32 %v7424_v29, %v3031_v49  ;;  %3107 = vmatpush.bf16.msra.mxu0 %v3067_v22  ;;  %v7440_v38 = vpop.eup %4964  ;;  %v2933_v58 = vmul.f32 1.442695, %v2832_v53 }
 0x9f7   : > { %3122 = vmatpush.bf16.msra.mxu1 %v3081_v6  ;;  %v2965_v22 = vmul.f32 1.442695, %v2848_v18  ;;  %v3066_v29 = vpack.c.bf16 %v7384_v25, %v7373_v47  ;;  %v3062_v47 = vpack.c.bf16 %v7340_v46, %v7335_v42 }
 0x9f8   : > { %v3011_v16 = vadd.f32 %v4951_v32, %v3010_v57  ;;  %v3033_v35 = vadd.f32 %v7432_v2, %v3032_v3  ;;  %v3065_v32 = vpack.c.bf16 %v7227_v1, %v7220_v43  ;;  %4974 = vpow2.f32 %v2925_v60  ;;  %v7450_v43 = vpop.eup %4966  ;;  %v8556_v60 = vld [vmem:[#allocation9_spill] sm:$0xff] }
 0x9f9   : > { %v2850_v1 = vsub.f32 %v7100_v34, %v7250_v30  ;;  %4976 = vpow2.f32 %v2929_v5  ;;  %v4969_v40 = vpop.eup %4968  ;;  %v2844_v57 = vsub.f32 %v8553_v50, %v7250_v30  ;;  %v3079_v34 = vpack.c.bf16 %v7297_v39, %v7292_v62 }
 0x9fa   : > { %v3012_v51 = vadd.f32 %v7356_v15, %v3011_v16  ;;  %v3034_v44 = vadd.f32 %v7440_v38, %v3033_v35  ;;  %3108 = vmatpush.bf16.msra.mxu0 %v3065_v32  ;;  %4978 = vpow2.f32 %v2981_v28  ;;  %v4971_v17 = vpop.eup %4970  ;;  %v8557_v5 = vsub.f32 %v8551_v24, %v7250_v30 }
 0x9fb   : > { %4980 = vpow2.f32 %v2985_v48  ;;  %v4973_v53 = vpop.eup %4972  ;;  %v2969_v16 = vmul.f32 1.442695, %v2850_v1  ;;  %3123 = vmatpush.bf16.msra.mxu1 %v3079_v34  ;;  %v2957_v35 = vmul.f32 1.442695, %v2844_v57  ;;  %v8558_v48 = vunpack.c.l.b16 %v8545_v27 }
 0x9fc   : > { %v3013_v15 = vadd.f32 %v7368_v23, %v3012_v51  ;;  %v3035_v14 = vadd.f32 %v7450_v43, %v3034_v44  ;;  %v3063_v23 = vpack.c.bf16 %v8552_v13, %v7206_v63  ;;  %4982 = vpow2.f32 %v2973_v52 }
 0x9fd   : > { %v2941_v63 = vmul.f32 1.442695, %v2836_v10  ;;  %4984 = vpow2.f32 %v2977_v12  ;;  %v2945_v45 = vmul.f32 1.442695, %v8557_v5  ;;  %v3077_v10 = vpack.c.bf16 %v7288_v26, %v7283_v56  ;;  %v8560_v56 = vld [vmem:[#allocation17_spill] sm:$0xff] }
 0x9fe   : > { %v3014_v54 = vadd.f32 %v7319_v7, %v3013_v15  ;;  %v3036_v7 = vadd.f32 %v4969_v40, %v3035_v14  ;;  %3109 = vmatpush.bf16.msra.mxu0 %v3063_v23  ;;  %v7468_v9 = vpop.eup %4974  ;;  %4986 = vpow2.f32 %v2933_v58  ;;  %v3076_v28 = vpack.c.bf16 %v4973_v53, %v4971_v17 }
 0x9ff   : > { %v7473_v31 = vpop.eup %4976  ;;  %4988 = vpow2.f32 %v2937_v0  ;;  %v8559_v24 = vunpack.c.l.b16 %v7331_v37  ;;  %v2842_v26 = vsub.f32 %v8560_v56, %v7250_v30  ;;  %v2961_v15 = vmul.f32 1.442695, %v2846_v61  ;;  %3124 = vmatpush.bf16.msra.mxu1 %v3077_v10  ;;  %v8565_v56 = vld [vmem:[#allocation23_spill] sm:$0xff] }
 0xa00   : > { %v3015_v49 = vadd.f32 %v7346_v8, %v3014_v54  ;;  %v3037_v39 = vadd.f32 %v4971_v17, %v3036_v7  ;;  %v8555_v8 = vld [vmem:[#allocation11_spill] sm:$0xff]  ;;  %v7480_v51 = vpop.eup %4978  ;;  %4990 = vpow2.f32 %v2965_v22  ;;  %v8561_v58 = vunpack.c.h.b16 %v8545_v27  ;;  %v621_v7 = vpop.permute.xlu1 %620 }
 0xa01   : > { %v3061_v3 = vpack.c.bf16 %v8556_v60, %v8555_v8  ;;  %v7485_v18 = vpop.eup %4980  ;;  %v7491_v6 = vpack.c.b16 %v8559_v24, %v8558_v48  ;;  %4992 = vpow2.f32 %v2969_v16  ;;  %v8562_v12 = vunpack.c.h.b16 %v7331_v37  ;;  %v8564_v60 = vld [vmem:[#allocation25_spill] sm:$0xff] }
 0xa02   : > { %v3016_v62 = vadd.f32 %v7324_v33, %v3015_v49  ;;  %v3038_v32 = vadd.f32 %v4973_v53, %v3037_v39  ;;  %4994 = vpow2.f32 %v2941_v63  ;;  %v3092_v44 = vpack.c.bf16 %v7485_v18, %v7480_v51  ;;  %v8563_v39 = vld [vmem:[#allocation24_spill] sm:$0xff] }
 0xa03   : > { %3110 = vmatpush.bf16.msra.mxu0 %v3061_v3  ;;  %v7506_v54 = vpack.c.b16 %v8562_v12, %v8561_v58  ;;  %4996 = vpow2.f32 %v2945_v45  ;;  %v2949_v14 = vmul.f32 1.442695, %v2840_v11  ;;  %v3074_v13 = vpack.c.bf16 %v4969_v40, %v7450_v43 }
 0xa04   : > { %v7483_v33 = vadd.f32 %v7329_v21, %v3016_v62  ;;  %v7495_v21 = vpop.eup %4982  ;;  %v3039_v52 = vadd.f32 %v7468_v9, %v3038_v32  ;;  %4998 = vpow2.f32 %v2957_v35  ;;  %3145 = vmatpush.bf16.msrb.mxu1 %v3092_v44  ;;  %v2953_v27 = vmul.f32 1.442695, %v2842_v26 }
 0xa05   : > { %v7500_v1 = vpop.eup %4984  ;;  %5000 = vpow2.f32 %v2961_v15  ;;  %3125 = vmatmul.bf16.vlgmr.msra.gmra.mxu1 %v7506_v54  ;;  %v3072_v11 = vpack.c.bf16 %v7440_v38, %v7432_v2  ;;  %v3068_v62 = vpack.c.bf16 %v7408_v59, %v7396_v4  ;;  %v827_v8 = vadd.f32 %v8563_v39, %v621_v7 }
 0xa06   : > { %3111 = vmatmul.bf16.vlgmr.msra.gmra.mxu0 %v7491_v6  ;;  %v4987_v23 = vpop.eup %4986  ;;  %v3040_v17 = vadd.f32 %v7473_v31, %v3039_v52  ;;  %v3090_v41 = vpack.c.bf16 %v7500_v1, %v7495_v21  ;;  %5002 = vpow2.f32 %v2949_v14  ;;  %v896_v3 = vadd.f32 %v8564_v60, %v621_v7 }
 0xa07   : > { %3131 = vmatpush.bf16.msrb.mxu0 %v3076_v28  ;;  %v4989_v50 = vpop.eup %4988  ;;  %5004 = vpow2.f32 %v2953_v27  ;;  %v3064_v59 = vpack.c.bf16 %v7362_v36, %v7351_v55  ;;  %v3231_v26 = vunpack.c.l.b16 %v8565_v56  ;;  %v3232_v12 = vunpack.c.h.b16 %v8565_v56 }
 0xa08   : > { %v4991_v37 = vpop.eup %4990  ;;  %v3041_v57 = vadd.f32 %v4987_v23, %v3040_v17  ;;  %3146 = vmatpush.bf16.msrb.mxu1 %v3090_v41  ;;  %v3213_v19 = vpop.trf.xlu1  ;;  %v945_v28 = vpack.c.bf16 %v896_v3, %v827_v8  ;;  %v3080_v52 = vpack.c.bf16 %v4989_v50, %v4987_v23  ;;  %v3078_v14 = vpack.c.bf16 %v7473_v31, %v7468_v9 }
 0xa09   : > { %v4993_v30 = vpop.eup %4992 }
 0xa0a   : > { %v4995_v43 = vpop.eup %4994  ;;  %v3042_v40 = vadd.f32 %v4989_v50, %v3041_v57  ;;  %v3088_v49 = vpack.c.bf16 %v4993_v30, %v4991_v37  ;;  %v3233_v4 = vunpack.c.l.b16 %v945_v28  ;;  %v3234_v44 = vunpack.c.h.b16 %v945_v28 }
 0xa0b   : > { %3132 = vmatpush.bf16.msrb.mxu0 %v3074_v13  ;;  %v4997_v0 = vpop.eup %4996 }
 0xa0c   : > { %v4999_v34 = vpop.eup %4998  ;;  %v3043_v53 = vadd.f32 %v4995_v43, %v3042_v40  ;;  %3147 = vmatpush.bf16.msrb.mxu1 %v3088_v49  ;;  %v3082_v48 = vpack.c.bf16 %v4997_v0, %v4995_v43  ;;  %v3235_v58 = vpack.c.b16 %v3233_v4, %v3231_v26 }
 0xa0d   : > { %v5001_v22 = vpop.eup %5000 }
 0xa0e   : > { %v3044_v61 = vadd.f32 %v4997_v0, %v3043_v53  ;;  %v5003_v63 = vpop.eup %5002  ;;  %v3086_v2 = vpack.c.bf16 %v5001_v22, %v4999_v34 }
 0xa0f   : > { %3133 = vmatpush.bf16.msrb.mxu0 %v3072_v11  ;;  %v5005_v38 = vpop.eup %5004 }
 0xa10   : > { %v3045_v16 = vadd.f32 %v5003_v63, %v3044_v61  ;;  %3148 = vmatpush.bf16.msrb.mxu1 %v3086_v2  ;;  %v3084_v10 = vpack.c.bf16 %v5005_v38, %v5003_v63  ;;  %v7535_v55 = vpop.trf.xlu1 }
 0xa12   : > { %v3046_v5 = vadd.f32 %v5005_v38, %v3045_v16 }
 0xa13   : > { %3134 = vmatpush.bf16.msrb.mxu0 %v3070_v20 }
 0xa14   : > { %v3047_v45 = vadd.f32 %v4999_v34, %v3046_v5  ;;  %3149 = vmatpush.bf16.msrb.mxu1 %v3084_v10 }
 0xa16   : > { %v3048_v35 = vadd.f32 %v5001_v22, %v3047_v45 }
 0xa17   : > { %3135 = vmatpush.bf16.msrb.mxu0 %v3068_v62 }
 0xa18   : > { %v3049_v32 = vadd.f32 %v4991_v37, %v3048_v35  ;;  %3150 = vmatpush.bf16.msrb.mxu1 %v3082_v48  ;;  %v3215_v42 = vpop.trf.xlu1 }
 0xa1a   : > { %v3050_v24 = vadd.f32 %v4993_v30, %v3049_v32 }
 0xa1b   : > { %3136 = vmatpush.bf16.msrb.mxu0 %v3066_v29 }
 0xa1c   : > { %v3051_v15 = vadd.f32 %v7495_v21, %v3050_v24  ;;  %3151 = vmatpush.bf16.msrb.mxu1 %v3080_v52  ;;  %v3236_v21 = vpack.c.b16 %v3234_v44, %v3232_v12 }
 0xa1e   : > { %v3052_v25 = vadd.f32 %v7500_v1, %v3051_v15 }
 0xa1f   : > { %3137 = vmatpush.bf16.msrb.mxu0 %v3064_v59 }
 0xa20   : > { %v3053_v36 = vadd.f32 %v7480_v51, %v3052_v25  ;;  %3152 = vmatpush.bf16.msrb.mxu1 %v3078_v14  ;;  %v7544_v46 = vpop.trf.xlu1 }
 0xa22   : > { %v3054_v13 = vadd.f32 %v7485_v18, %v3053_v36 }
 0xa23   : > { %3138 = vmatpush.bf16.msrb.mxu0 %v3062_v47  ;;  %3153 = vmatmul.bf16.vlgmr.msrb.gmra.mxu1 %v7506_v54  ;;  %v3018_v54 = vrot.slane %v7483_v33, 4 }
 0xa24   : > { %3383 = vmatpush.bf16.msra.mxu1 %v3236_v21  ;;  %v3055_v23 = vrot.slane %v3054_v13, 4 }
 0xa25   : > { %v3019_v17 = vadd.f32 %v3018_v54, %v7483_v33 }
 0xa26   : > { %3139 = vmatmul.bf16.vlgmr.msrb.gmra.mxu0 %v7491_v6  ;;  %v3056_v50 = vadd.f32 %v3055_v23, %v3054_v13 }
 0xa27   : > { %3294 = vmatpush.bf16.msra.mxu0 %v3235_v58  ;;  %v3020_v27 = vrot.slane %v3019_v17, 2 }
 0xa28   : > { %v3217_v51 = vpop.trf.xlu1  ;;  %v3057_v37 = vrot.slane %v3056_v50, 2 }
 0xa29   : > { %v3021_v41 = vadd.f32 %v3020_v27, %v3019_v17 }
 0xa2a   : > { %v3058_v30 = vadd.f32 %v3057_v37, %v3056_v50 }
 0xa2b   : > { %v3022_v11 = vrot.slane %v3021_v41, 1 }
 0xa2c   : > { %v3059_v43 = vrot.slane %v3058_v30, 1 }
 0xa2d   : > { %v3023_v0 = vadd.f32 %v3022_v11, %v3021_v41 }
 0xa2e   : > { %v3060_v34 = vadd.f32 %v3059_v43, %v3058_v30 }
 0xa2f   : > { %5006 = vrcp.f32 %v3023_v0  ;;  %vm3164_vm9 = vweird.f32 %v3023_v0  ;;  %v3170_v5 = vand.u32 2147483648, %v3023_v0 }
 0xa30   : > { %v7549_v9 = vpop.trf.xlu1  ;;  %5008 = vrcp.f32 %v3060_v34  ;;  %v3184_v45 = vand.u32 2147483648, %v3060_v34  ;;  %vm3178_vm11 = vweird.f32 %v3060_v34  ;;  %v3182_v28 = vand.u32 2147483647, %v3060_v34 }
 0xa31   : > { %v3171_v4 = vor.u32 1.1754944e-38, %v3170_v5 }
 0xa32   : > { %v3185_v56 = vor.u32 1.1754944e-38, %v3184_v45  ;;  %vm3183_vm14 = vcmp.eq.f32.partialorder %v3182_v28, 8.507059e+37 }
 0xa33   : > { %4450 = vmatmul.msk.bf16.vlgmr.msra.gmra.mxu1 %vm1006_vm4, %v3213_v19 }
 0xa35   : > { %v5007_v33 = vpop.eup %5006 }
 0xa36   : > { %4434 = vmatmul.msk.bf16.vlgmr.msra.gmra.mxu0 %vm1006_vm4, %v3213_v19  ;;  %v5009_v22 = vpop.eup %5008  ;;  %v3160_v20 = vmul.f32 %v5007_v33, %v3023_v0  ;;  %vm3165_vm7 = vweird.f32 %v5007_v33  ;;  %v3168_v19 = vand.u32 2147483647, %v3023_v0 }
 0xa37   : > { %v3174_v61 = vmul.f32 %v5009_v22, %v3060_v34  ;;  %vm3179_vm8 = vweird.f32 %v5009_v22  ;;  %vm7571_vm10 = vmor %vm3164_vm9, %vm3165_vm7 }
 0xa38   : > { %v3219_v31 = vpop.trf.xlu1  ;;  %v3161_v63 = vsub.f32 1.0, %v3160_v20  ;;  %vm3180_vm12 = vmor %vm3178_vm11, %vm3179_vm8  ;;  %vm3169_vm13 = vcmp.eq.f32.partialorder %v3168_v19, 8.507059e+37 }
 0xa39   : > { %v3175_v16 = vsub.f32 1.0, %v3174_v61 }
 0xa3a   : > { %v3162_v62 = vmul.f32 %v5007_v33, %v3161_v63 }
 0xa3b   : > { %v3176_v39 = vmul.f32 %v5009_v22, %v3175_v16 }
 0xa3c   : > { %v3163_v60 = vadd.f32 %v5007_v33, %v3162_v62 }
 0xa3d   : > { %v3177_v3 = vadd.f32 %v5009_v22, %v3176_v39 }
 0xa3e   : > { %v3167_v48 = vsel %vm7571_vm10, %v5007_v33, %v3163_v60 }
 0xa3f   : > { %v3181_v59 = vsel %vm3180_vm12, %v5009_v22, %v3177_v3  ;;  %v3172_v15 = vsel %vm3169_vm13, %v3171_v4, %v3167_v48 }
 0xa40   : > { %v7553_v18 = vpop.trf.xlu1  ;;  %v3186_v52 = vsel %vm3183_vm14, %v3185_v56, %v3181_v59 }
 0xa43   : > { %4451 = vmatmul.msk.bf16.gmra.mxu1 %vm1006_vm4, %v3215_v42 }
 0xa46   : > { %4435 = vmatmul.msk.bf16.gmra.mxu0 %vm1006_vm4, %v3215_v42 }
 0xa48   : > { %v3221_v6 = vpop.trf.xlu1 }
 0xa50   : > { %v7557_v1 = vpop.trf.xlu1 }
 0xa53   : > { %4452 = vmatmul.msk.bf16.gmra.mxu1 %vm1006_vm4, %v3217_v51 }
 0xa56   : > { %4436 = vmatmul.msk.bf16.gmra.mxu0 %vm1006_vm4, %v3217_v51 }
 0xa58   : > { %v3223_v57 = vpop.trf.xlu1 }
 0xa60   : > { %v7564_v40 = vpop.trf.xlu1 }
 0xa63   : > { %4453 = vmatmul.msk.bf16.gmra.mxu1 %vm1006_vm4, %v3219_v31 }
 0xa66   : > { %4437 = vmatmul.msk.bf16.gmra.mxu0 %vm1006_vm4, %v3219_v31 }
 0xa68   : > { %v3225_v53 = vpop.trf.xlu1 }
 0xa70   : > { %v7569_v2 = vpop.trf.xlu1 }
 0xa73   : > { %4454 = vmatmul.msk.bf16.gmra.mxu1 %vm1006_vm4, %v3221_v6 }
 0xa76   : > { %4438 = vmatmul.msk.bf16.gmra.mxu0 %vm1006_vm4, %v3221_v6 }
 0xa78   : > { %v3227_v35 = vpop.trf.xlu1 }
 0xa82   : > { %v3126_v7 = vpop.f32.mrf.mxu1 }
 0xa83   : > { %4455 = vmatmul.msk.bf16.gmra.mxu1 %vm1006_vm4, %v3223_v57  ;;  %v3112_v49 = vpop.f32.mrf.mxu0 }
 0xa84   : > { %v3127_v32 = vadd.f32 %v3126_v7, %v3112_v49 }
 0xa86   : > { %4439 = vmatmul.msk.bf16.gmra.mxu0 %vm1006_vm4, %v3223_v57  ;;  %v3187_v44 = vmul.f32 %v3172_v15, %v3127_v32 }
 0xa8a   : > { %v3128_v8 = vpop.f32.mrf.mxu1 }
 0xa8b   : > { %v3114_v38 = vpop.f32.mrf.mxu0 }
 0xa8c   : > { %v3129_v12 = vadd.f32 %v3128_v8, %v3114_v38 }
 0xa8e   : > { %v3189_v21 = vmul.f32 %v3172_v15, %v3129_v12 }
 0xa93   : > { %4456 = vmatmul.msk.bf16.gmra.mxu1 %vm1006_vm4, %v3225_v53 }
 0xa96   : > { %4440 = vmatmul.msk.bf16.gmra.mxu0 %vm1006_vm4, %v3225_v53 }
 0xaa0   : > { %v3154_v24 = vpop.f32.mrf.mxu1 }
 0xaa3   : > { %v3140_v29 = vpop.f32.mrf.mxu0  ;;  %4457 = vmatmul.msk.bf16.gmra.mxu1 %vm1006_vm4, %v3227_v35 }
 0xaa4   : > { %v3155_v26 = vadd.f32 %v3154_v24, %v3140_v29 }
 0xaa6   : > { %4441 = vmatmul.msk.bf16.gmra.mxu0 %vm1006_vm4, %v3227_v35  ;;  %v3188_v47 = vmul.f32 %v3186_v52, %v3155_v26 }
 0xaa8   : > { %v3191_v25 = vpack.c.bf16 %v3188_v47, %v3187_v44  ;;  %v3156_v36 = vpop.f32.mrf.mxu1 }
 0xaaa   : > { %3193 = vst [vmem:[#allocation2 + $0x20] sm:$0xff] %v3191_v25 }
 0xaab   : > { %v3142_v58 = vpop.f32.mrf.mxu0 }
 0xaac   : > { %v3157_v14 = vadd.f32 %v3156_v36, %v3142_v58 }
 0xaae   : > { %v3190_v13 = vmul.f32 %v3186_v52, %v3157_v14 }
 0xab0   : > { %v3192_v42 = vpack.c.bf16 %v3190_v13, %v3189_v21  ;;  %v7581_v31 = vpop.f32.mrf.mxu1 }
 0xab2   : > { %3194 = vst [vmem:[#allocation2 + $0x28] sm:$0xff] %v3192_v42 }
 0xab3   : > { %v7579_v51 = vpop.f32.mrf.mxu0  ;;  %4458 = vmatmul.msk.bf16.gmra.mxu1 %vm1006_vm4, %v7535_v55 }
 0xab6   : > { %4442 = vmatmul.msk.bf16.gmra.mxu0 %vm1006_vm4, %v7535_v55 }
 0xab8   : > { %v7589_v54 = vpop.f32.mrf.mxu1 }
 0xab9   : > { %8568 = vst [vmem:[#allocation41_spill] sm:$0xff] %v7589_v54 }
 0xabb   : > { %v7587_v6 = vpop.f32.mrf.mxu0 }
 0xac0   : > { %v7593_v17 = vpop.f32.mrf.mxu1 }
 0xac1   : > { %8570 = vst [vmem:[#allocation33_spill] sm:$0xff] %v7593_v17 }
 0xac3   : > { %v7591_v23 = vpop.f32.mrf.mxu0  ;;  %4459 = vmatmul.msk.bf16.gmra.mxu1 %vm1006_vm4, %v7544_v46 }
 0xac4   : > { %8569 = vst [vmem:[#allocation43_spill] sm:$0xff] %v7591_v23  ;;  %v3465_v25 = vmax.f32 %v7579_v51, %v7591_v23 }
 0xac6   : > { %4443 = vmatmul.msk.bf16.gmra.mxu0 %vm1006_vm4, %v7544_v46 }
 0xac8   : > { %v7601_v27 = vpop.f32.mrf.mxu1 }
 0xac9   : > { %8572 = vst [vmem:[#allocation35_spill] sm:$0xff] %v7601_v27 }
 0xacb   : > { %v7599_v50 = vpop.f32.mrf.mxu0 }
 0xacc   : > { %8571 = vst [vmem:[#allocation46_spill] sm:$0xff] %v7599_v50  ;;  %v3466_v58 = vmax.f32 %v7587_v6, %v7599_v50 }
 0xad0   : > { %v7605_v55 = vpop.f32.mrf.mxu1 }
 0xad3   : > { %v7603_v37 = vpop.f32.mrf.mxu0  ;;  %4460 = vmatmul.msk.bf16.gmra.mxu1 %vm1006_vm4, %v7549_v9 }
 0xad4   : > { %8573 = vst [vmem:[#allocation49_spill] sm:$0xff] %v7603_v37  ;;  %v3467_v12 = vmax.f32 %v3465_v25, %v7603_v37 }
 0xad6   : > { %4444 = vmatmul.msk.bf16.gmra.mxu0 %vm1006_vm4, %v7549_v9 }
 0xad8   : > { %v7613_v41 = vpop.f32.mrf.mxu1 }
 0xadb   : > { %v7611_v57 = vpop.f32.mrf.mxu0 }
 0xadc   : > { %8574 = vst [vmem:[#allocation50_spill] sm:$0xff] %v7611_v57  ;;  %v3468_v36 = vmax.f32 %v3466_v58, %v7611_v57 }
 0xae0   : > { %v7617_v46 = vpop.f32.mrf.mxu1 }
 0xae3   : > { %v7615_v30 = vpop.f32.mrf.mxu0  ;;  %4461 = vmatmul.msk.bf16.gmra.mxu1 %vm1006_vm4, %v7553_v18 }
 0xae4   : > { %8575 = vst [vmem:[#allocation44_spill] sm:$0xff] %v7615_v30  ;;  %v3469_v13 = vmax.f32 %v3467_v12, %v7615_v30 }
 0xae6   : > { %4445 = vmatmul.msk.bf16.gmra.mxu0 %vm1006_vm4, %v7553_v18 }
 0xae8   : > { %v7625_v43 = vpop.f32.mrf.mxu1 }
 0xae9   : > { %8576 = vst [vmem:[#allocation8_spill] sm:$0xff] %v7625_v43 }
 0xaeb   : > { %v7623_v11 = vpop.f32.mrf.mxu0 }
 0xaec   : > { %v3470_v42 = vmax.f32 %v3468_v36, %v7623_v11 }
 0xaf0   : > { %v7629_v9 = vpop.f32.mrf.mxu1 }
 0xaf3   : > { %v7627_v0 = vpop.f32.mrf.mxu0  ;;  %4462 = vmatmul.msk.bf16.gmra.mxu1 %vm1006_vm4, %v7557_v1 }
 0xaf6   : > { %4446 = vmatmul.msk.bf16.gmra.mxu0 %vm1006_vm4, %v7557_v1 }
 0xaf8   : > { %v7637_v33 = vpop.f32.mrf.mxu1 }
 0xaf9   : > { %8577 = vst [vmem:[#allocation20_spill] sm:$0xff] %v7637_v33 }
 0xafb   : > { %v7635_v34 = vpop.f32.mrf.mxu0 }
 0xb00   : > { %v7641_v18 = vpop.f32.mrf.mxu1 }
 0xb03   : > { %v7639_v53 = vpop.f32.mrf.mxu0  ;;  %4463 = vmatmul.msk.bf16.gmra.mxu1 %vm1006_vm4, %v7564_v40 }
 0xb06   : > { %4447 = vmatmul.msk.bf16.gmra.mxu0 %vm1006_vm4, %v7564_v40  ;;  %v3228_v40 = vpop.trf.xlu1 }
 0xb08   : > { %v7649_v22 = vpop.f32.mrf.mxu1 }
 0xb09   : > { %8578 = vst [vmem:[#allocation21_spill] sm:$0xff] %v7649_v22 }
 0xb0b   : > { %v7647_v49 = vpop.f32.mrf.mxu0 }
 0xb10   : > { %v7653_v1 = vpop.f32.mrf.mxu1 }
 0xb13   : > { %v7651_v7 = vpop.f32.mrf.mxu0  ;;  %4464 = vmatmul.msk.bf16.gmra.mxu1 %vm1006_vm4, %v7569_v2 }
 0xb16   : > { %4448 = vmatmul.msk.bf16.gmra.mxu0 %vm1006_vm4, %v7569_v2 }
 0xb18   : > { %v7661_v61 = vpop.f32.mrf.mxu1 }
 0xb19   : > { %8579 = vst [vmem:[#allocation19_spill] sm:$0xff] %v7661_v61 }
 0xb1b   : > { %v7659_v20 = vpop.f32.mrf.mxu0 }
 0xb20   : > { %v7665_v16 = vpop.f32.mrf.mxu1 }
 0xb23   : > { %v7663_v63 = vpop.f32.mrf.mxu0  ;;  %4465 = vmatmul.msk.bf16.gmra.mxu1 %vm1006_vm4, %v3228_v40 }
 0xb26   : > { %4449 = vmatmul.msk.bf16.gmra.mxu0 %vm1006_vm4, %v3228_v40  ;;  %v3471_v40 = vmax.f32 %v3469_v13, %v7627_v0 }
 0xb28   : > { %v7671_v62 = vpop.f32.mrf.mxu1  ;;  %v3473_v23 = vmax.f32 %v3471_v40, %v7639_v53 }
 0xb2a   : > { %v3475_v25 = vmax.f32 %v3473_v23, %v7651_v7  ;;  %v3503_v23 = vmax.f32 %v7589_v54, %v7601_v27 }
 0xb2b   : > { %v7669_v38 = vpop.f32.mrf.mxu0 }
 0xb2c   : > { %v3477_v37 = vmax.f32 %v3475_v25, %v7663_v63 }
 0xb30   : > { %v7675_v2 = vpop.f32.mrf.mxu1 }
 0xb33   : > { %v7673_v39 = vpop.f32.mrf.mxu0 }
 0xb34   : > { %v3479_v36 = vmax.f32 %v3477_v37, %v7673_v39  ;;  %v3505_v37 = vmax.f32 %v3503_v23, %v7613_v41 }
 0xb38   : > { %v7679_v60 = vpop.f32.mrf.mxu1 }
 0xb39   : > { %8580 = vst [vmem:[#allocation10_spill] sm:$0xff] %v7679_v60 }
 0xb3b   : > { %v7677_v8 = vpop.f32.mrf.mxu0 }
 0xb40   : > { %v7683_v5 = vpop.f32.mrf.mxu1 }
 0xb43   : > { %v7681_v3 = vpop.f32.mrf.mxu0 }
 0xb48   : > { %v7687_v10 = vpop.f32.mrf.mxu1 }
 0xb4b   : > { %v7685_v45 = vpop.f32.mrf.mxu0 }
 0xb4c   : > { %8581 = vst [vmem:[#allocation7_spill] sm:$0xff] %v7685_v45 }
 0xb50   : > { %v7691_v29 = vpop.f32.mrf.mxu1 }
 0xb53   : > { %v7689_v19 = vpop.f32.mrf.mxu0 }
 0xb58   : > { %v7695_v35 = vpop.f32.mrf.mxu1 }
 0xb59   : > { %8582 = vst [vmem:[#allocation15_spill] sm:$0xff] %v7695_v35 }
 0xb5b   : > { %v7693_v28 = vpop.f32.mrf.mxu0 }
 0xb60   : > { %v7699_v48 = vpop.f32.mrf.mxu1 }
 0xb63   : > { %v7697_v32 = vpop.f32.mrf.mxu0 }
 0xb68   : > { %v7703_v4 = vpop.f32.mrf.mxu1 }
 0xb69   : > { %8583 = vst [vmem:[#allocation48_spill] sm:$0xff] %v7703_v4 }
 0xb6b   : > { %v7701_v59 = vpop.f32.mrf.mxu0 }
 0xb70   : > { %v7707_v56 = vpop.f32.mrf.mxu1 }
 0xb71   : > { %8584 = vst [vmem:[#allocation38_spill] sm:$0xff] %v7707_v56 }
 0xb73   : > { %v7705_v24 = vpop.f32.mrf.mxu0 }
 0xb78   : > { %v7711_v15 = vpop.f32.mrf.mxu1 }
 0xb79   : > { %8585 = vst [vmem:[#allocation45_spill] sm:$0xff] %v7711_v15 }
 0xb7b   : > { %v7709_v26 = vpop.f32.mrf.mxu0 }
 0xb80   : > { %v7715_v44 = vpop.f32.mrf.mxu1 }
 0xb81   : > { %8586 = vst [vmem:[#allocation39_spill] sm:$0xff] %v7715_v44  ;;  %v3472_v44 = vmax.f32 %v3470_v42, %v7635_v34  ;;  %v3481_v42 = vmax.f32 %v3479_v36, %v7681_v3 }
 0xb83   : > { %v7713_v52 = vpop.f32.mrf.mxu0  ;;  %v3474_v50 = vmax.f32 %v3472_v44, %v7647_v49 }
 0xb85   : > { %v3476_v58 = vmax.f32 %v3474_v50, %v7659_v20  ;;  %v3483_v50 = vmax.f32 %v3481_v42, %v7689_v19 }
 0xb87   : > { %v3478_v12 = vmax.f32 %v3476_v58, %v7669_v38  ;;  %v3502_v58 = vmax.f32 %v7581_v31, %v7593_v17 }
 0xb88   : > { %v7725_v14 = vpop.f32.mrf.mxu1 }
 0xb89   : > { %v3480_v13 = vmax.f32 %v3478_v12, %v7677_v8  ;;  %v3485_v12 = vmax.f32 %v3483_v50, %v7697_v32 }
 0xb8b   : > { %v7717_v47 = vpop.f32.mrf.mxu0  ;;  %v3482_v44 = vmax.f32 %v3480_v13, %v7685_v45  ;;  %v3504_v13 = vmax.f32 %v3502_v58, %v7605_v55  ;;  %v3507_v45 = vmax.f32 %v3505_v37, %v7625_v43  ;;  %v3487_v27 = vmax.f32 %v3485_v12, %v7705_v24 }
 0xb8d   : > { %v3484_v40 = vmax.f32 %v3482_v44, %v7693_v28  ;;  %v3506_v54 = vmax.f32 %v3504_v13, %v7617_v46  ;;  %v3509_v17 = vmax.f32 %v3507_v45, %v7637_v33  ;;  %v3489_v23 = vmax.f32 %v3487_v27, %v7713_v52 }
 0xb8f   : > { %v3486_v36 = vmax.f32 %v3484_v40, %v7701_v59  ;;  %v3508_v40 = vmax.f32 %v3506_v54, %v7629_v9  ;;  %v3511_v58 = vmax.f32 %v3509_v17, %v7649_v22 }
 0xb90   : > { %v7741_v30 = vpop.f32.mrf.mxu1 }
 0xb91   : > { %v3488_v42 = vmax.f32 %v3486_v36, %v7709_v26  ;;  %v3510_v36 = vmax.f32 %v3508_v40, %v7641_v18  ;;  %v3513_v13 = vmax.f32 %v3511_v58, %v7661_v61 }
 0xb93   : > { %v7727_v21 = vpop.f32.mrf.mxu0  ;;  %v3490_v50 = vmax.f32 %v3488_v42, %v7717_v47  ;;  %v3512_v42 = vmax.f32 %v3510_v36, %v7653_v1  ;;  %v3515_v54 = vmax.f32 %v3513_v13, %v7671_v62 }
 0xb94   : > { %v3491_v37 = vmax.f32 %v3489_v23, %v7727_v21 }
 0xb95   : > { %v3514_v17 = vmax.f32 %v3512_v42, %v7665_v16  ;;  %v3517_v23 = vmax.f32 %v3515_v54, %v7679_v60 }
 0xb97   : > { %v3516_v40 = vmax.f32 %v3514_v17, %v7675_v2  ;;  %v3519_v58 = vmax.f32 %v3517_v23, %v7687_v10 }
 0xb98   : > { %v7762_v44 = vpop.f32.mrf.mxu1 }
 0xb9b   : > { %v7737_v57 = vpop.f32.mrf.mxu0 }
 0xb9c   : > { %v3492_v12 = vmax.f32 %v3490_v50, %v7737_v57 }
 0xba0   : > { %v7782_v22 = vpop.f32.mrf.mxu1 }
 0xba3   : > { %v7751_v25 = vpop.f32.mrf.mxu0 }
 0xba4   : > { %v3493_v45 = vmax.f32 %v3491_v37, %v7751_v25  ;;  %v3518_v37 = vmax.f32 %v3516_v40, %v7683_v5 }
 0xba6   : > { %v3520_v13 = vmax.f32 %v3518_v37, %v7691_v29 }
 0xba8   : > { %v3522_v42 = vmax.f32 %v3520_v13, %v7699_v48 }
 0xbaa   : > { %v3524_v17 = vmax.f32 %v3522_v42, %v7707_v56  ;;  %v8592_v56 = vld [vmem:[#allocation44_spill] sm:$0xff] }
 0xbab   : > { %v7772_v43 = vpop.f32.mrf.mxu0 }
 0xbac   : > { %v3494_v27 = vmax.f32 %v3492_v12, %v7772_v43  ;;  %v3521_v12 = vmax.f32 %v3519_v58, %v7695_v35 }
 0xbae   : > { %v3495_v33 = vmax.f32 %v3493_v45, %v3494_v27  ;;  %v3523_v45 = vmax.f32 %v3521_v12, %v7703_v4 }
 0xbb0   : > { %v3496_v50 = vrot.slane %v3495_v33, 4  ;;  %v3525_v54 = vmax.f32 %v3523_v45, %v7711_v15  ;;  %v8588_v45 = vld [vmem:[#allocation43_spill] sm:$0xff] }
 0xbb2   : > { %v3497_v61 = vmax.f32 %v3495_v33, %v3496_v50  ;;  %v3527_v23 = vmax.f32 %v3525_v54, %v7725_v14  ;;  %v7794_v33 = vpop.f32.mrf.mxu1  ;;  %v8587_v50 = vld [vmem:[#allocation39_spill] sm:$0xff] }
 0xbb3   : > { %v3526_v40 = vmax.f32 %v3524_v17, %v8587_v50  ;;  %v8589_v17 = vld [vmem:[#allocation46_spill] sm:$0xff] }
 0xbb4   : > { %v3498_v36 = vrot.slane %v3497_v61, 2  ;;  %v3529_v58 = vmax.f32 %v3527_v23, %v7762_v44 }
 0xbb5   : > { %v3528_v37 = vmax.f32 %v3526_v40, %v7741_v30  ;;  %v8590_v40 = vld [vmem:[#allocation49_spill] sm:$0xff] }
 0xbb6   : > { %v3499_v27 = vmax.f32 %v3497_v61, %v3498_v36  ;;  %v3531_v61 = vmax.f32 %v3529_v58, %v7794_v33 }
 0xbb7   : > { %v3530_v12 = vmax.f32 %v3528_v37, %v7782_v22 }
 0xbb8   : > { %v3500_v60 = vrot.slane %v3499_v27, 1 }
 0xbb9   : > { %v3532_v54 = vmax.f32 %v3530_v12, %v3531_v61 }
 0xbba   : > { %v7798_v35 = vmax.f32 %v3499_v27, %v3500_v60 }
 0xbbb   : > { %v3533_v37 = vrot.slane %v3532_v54, 4 }
 0xbbc   : > { %v3539_v36 = vsub.f32 %v7579_v51, %v7798_v35  ;;  %v3541_v13 = vsub.f32 %v7587_v6, %v7798_v35  ;;  %v3543_v42 = vsub.f32 %v8588_v45, %v7798_v35  ;;  %v3545_v60 = vsub.f32 %v8589_v17, %v7798_v35  ;;  %v8591_v51 = vld [vmem:[#allocation50_spill] sm:$0xff] }
 0xbbd   : > { %v3547_v58 = vsub.f32 %v8590_v40, %v7798_v35  ;;  %v3549_v15 = vsub.f32 %v8591_v51, %v7798_v35  ;;  %v3551_v45 = vsub.f32 %v8592_v56, %v7798_v35  ;;  %v3534_v12 = vmax.f32 %v3532_v54, %v3533_v37 }
 0xbbe   : > { %v3603_v27 = vmul.f32 1.442695, %v3539_v36  ;;  %v3607_v23 = vmul.f32 1.442695, %v3541_v13  ;;  %v3611_v4 = vmul.f32 1.442695, %v3543_v42  ;;  %v3553_v36 = vsub.f32 %v7623_v11, %v7798_v35 }
 0xbbf   : > { %v3615_v6 = vmul.f32 1.442695, %v3545_v60  ;;  %v3619_v61 = vmul.f32 1.442695, %v3547_v58  ;;  %v3623_v13 = vmul.f32 1.442695, %v3549_v15  ;;  %v3555_v42 = vsub.f32 %v7627_v0, %v7798_v35 }
 0xbc0   : > { %5010 = vpow2.f32 %v3603_v27  ;;  %v3557_v60 = vsub.f32 %v7635_v34, %v7798_v35  ;;  %v3627_v56 = vmul.f32 1.442695, %v3551_v45  ;;  %v3535_v54 = vrot.slane %v3534_v12, 2 }
 0xbc1   : > { %5012 = vpow2.f32 %v3607_v23  ;;  %v3561_v23 = vsub.f32 %v7647_v49, %v7798_v35  ;;  %v3631_v0 = vmul.f32 1.442695, %v3553_v36  ;;  %v3563_v40 = vsub.f32 %v7651_v7, %v7798_v35 }
 0xbc2   : > { %5014 = vpow2.f32 %v3611_v4  ;;  %v3559_v4 = vsub.f32 %v7639_v53, %v7798_v35  ;;  %v3635_v34 = vmul.f32 1.442695, %v3555_v42  ;;  %v3565_v53 = vsub.f32 %v7659_v20, %v7798_v35 }
 0xbc3   : > { %5016 = vpow2.f32 %v3615_v6  ;;  %v3639_v51 = vmul.f32 1.442695, %v3557_v60  ;;  %v3567_v6 = vsub.f32 %v7663_v63, %v7798_v35  ;;  %v3569_v7 = vsub.f32 %v7669_v38, %v7798_v35 }
 0xbc4   : > { %5018 = vpow2.f32 %v3619_v61  ;;  %v3643_v45 = vmul.f32 1.442695, %v3559_v4  ;;  %v3536_v61 = vmax.f32 %v3534_v12, %v3535_v54  ;;  %v3571_v42 = vsub.f32 %v7673_v39, %v7798_v35 }
 0xbc5   : > { %5020 = vpow2.f32 %v3623_v13  ;;  %v3647_v13 = vmul.f32 1.442695, %v3561_v23  ;;  %v3651_v20 = vmul.f32 1.442695, %v3563_v40  ;;  %v3573_v63 = vsub.f32 %v7677_v8, %v7798_v35  ;;  %v8596_v23 = vld [vmem:[#allocation7_spill] sm:$0xff] }
 0xbc6   : > { %v7819_v17 = vpop.eup %5010  ;;  %5022 = vpow2.f32 %v3627_v56  ;;  %v3575_v12 = vsub.f32 %v7681_v3, %v7798_v35  ;;  %v3655_v4 = vmul.f32 1.442695, %v3565_v53  ;;  %v3659_v38 = vmul.f32 1.442695, %v3567_v6 }
 0xbc7   : > { %8593 = vst [vmem:[#allocation47_spill] sm:$0xff] %v7819_v17  ;;  %v7823_v27 = vpop.eup %5012  ;;  %5024 = vpow2.f32 %v3631_v0  ;;  %v3537_v54 = vrot.slane %v3536_v61, 1  ;;  %v3577_v0 = vsub.f32 %v8596_v23, %v7798_v35  ;;  %v3663_v40 = vmul.f32 1.442695, %v3569_v7 }
 0xbc8   : > { %8594 = vst [vmem:[#allocation14_spill] sm:$0xff] %v7823_v27  ;;  %v3731_v11 = vadd.f32 %v7823_v27, %v7819_v17  ;;  %v7831_v15 = vpop.eup %5014  ;;  %5026 = vpow2.f32 %v3635_v34  ;;  %v3579_v8 = vsub.f32 %v7689_v19, %v7798_v35  ;;  %v3667_v34 = vmul.f32 1.442695, %v3571_v42 }
 0xbc9   : > { %v7838_v37 = vpop.eup %5016  ;;  %5028 = vpow2.f32 %v3639_v51  ;;  %v3581_v53 = vsub.f32 %v7693_v28, %v7798_v35  ;;  %v3583_v51 = vsub.f32 %v7697_v32, %v7798_v35  ;;  %v3671_v6 = vmul.f32 1.442695, %v3573_v63 }
 0xbca   : > { %v3732_v58 = vadd.f32 %v7831_v15, %v3731_v11  ;;  %8595 = vst [vmem:[#allocation13_spill] sm:$0xff] %v7838_v37  ;;  %v7845_v36 = vpop.eup %5018  ;;  %5030 = vpow2.f32 %v3643_v45  ;;  %v3675_v7 = vmul.f32 1.442695, %v3575_v12  ;;  %v3679_v28 = vmul.f32 1.442695, %v3577_v0 }
 0xbcb   : > { %v7852_v56 = vpop.eup %5020  ;;  %5032 = vpow2.f32 %v3647_v13  ;;  %v7875_v13 = vmax.f32 %v3536_v61, %v3537_v54  ;;  %v3599_v32 = vsub.f32 %v7751_v25, %v7798_v35  ;;  %v3683_v63 = vmul.f32 1.442695, %v3579_v8  ;;  %v8597_v61 = vld [vmem:[#allocation29_spill] sm:$0xff]  ;;  %v8598_v8 = vld [vmem:[#allocation28_spill] sm:$0xff] }
 0xbcc   : > { %v3733_v49 = vadd.f32 %v7838_v37, %v3732_v58  ;;  %v7859_v39 = vpop.eup %5022  ;;  %5034 = vpow2.f32 %v3651_v20  ;;  %v3595_v20 = vsub.f32 %v7727_v21, %v7798_v35  ;;  %v3687_v21 = vmul.f32 1.442695, %v3581_v53 }
 0xbcd   : > { %v7866_v58 = vpop.eup %5024  ;;  %5036 = vpow2.f32 %v3655_v4  ;;  %v3691_v23 = vmul.f32 1.442695, %v3583_v51  ;;  %v3540_v25 = vsub.f32 %v7581_v31, %v7875_v13  ;;  %v3597_v53 = vsub.f32 %v7737_v57, %v7798_v35 }
 0xbce   : > { %v3734_v60 = vadd.f32 %v7845_v36, %v3733_v49  ;;  %v7872_v45 = vpop.eup %5026  ;;  %v696_v49 = vpop.permute.xlu1 %695  ;;  %5038 = vpow2.f32 %v3659_v38  ;;  %v3723_v51 = vmul.f32 1.442695, %v3599_v32  ;;  %v3593_v27 = vsub.f32 %v7717_v47, %v7798_v35 }
 0xbcf   : > { %v7877_v42 = vpop.eup %5028  ;;  %5040 = vpow2.f32 %v3663_v40  ;;  %v865_v38 = vadd.f32 %v8597_v61, %v696_v49  ;;  %v701_v61 = vpop.permute.xlu0 %700  ;;  %v3719_v17 = vmul.f32 1.442695, %v3597_v53 }
 0xbd0   : > { %v3735_v11 = vadd.f32 %v7852_v56, %v3734_v60  ;;  %v7881_v60 = vpop.eup %5030  ;;  %5042 = vpow2.f32 %v3667_v34  ;;  %v934_v34 = vadd.f32 %v8598_v8, %v696_v49  ;;  %v8600_v49 = vld [vmem:[#allocation33_spill] sm:$0xff]  ;;  %v3591_v8 = vsub.f32 %v7713_v52, %v7798_v35 }
 0xbd1   : > { %v7886_v4 = vpop.eup %5032  ;;  %5044 = vpow2.f32 %v3671_v6  ;;  %v3711_v37 = vmul.f32 1.442695, %v3593_v27 }
 0xbd2   : > { %v3736_v3 = vadd.f32 %v7859_v39, %v3735_v11  ;;  %v3601_v11 = vsub.f32 %v7772_v43, %v7798_v35  ;;  %v7891_v54 = vpop.eup %5034  ;;  %5046 = vpow2.f32 %v3675_v7 }
 0xbd3   : > { %v7896_v40 = vpop.eup %5036  ;;  %5048 = vpow2.f32 %v3679_v28  ;;  %v3544_v28 = vsub.f32 %v8600_v49, %v7875_v13 }
 0xbd4   : > { %v3737_v19 = vadd.f32 %v7866_v58, %v3736_v3  ;;  %v3715_v3 = vmul.f32 1.442695, %v3595_v20  ;;  %v7901_v6 = vpop.eup %5038  ;;  %5050 = vpow2.f32 %v3683_v63  ;;  %v3727_v31 = vmul.f32 1.442695, %v3601_v11  ;;  %v8601_v11 = vld [vmem:[#allocation35_spill] sm:$0xff] }
 0xbd5   : > { %5052 = vpow2.f32 %v3687_v21  ;;  %v3605_v63 = vmul.f32 1.442695, %v3540_v25  ;;  %v3546_v21 = vsub.f32 %v8601_v11, %v7875_v13  ;;  %v8602_v25 = vld [vmem:[#allocation31_spill] sm:$0xff]  ;;  %v3707_v11 = vmul.f32 1.442695, %v3591_v8 }
 0xbd6   : > { %v3738_v12 = vadd.f32 %v7872_v45, %v3737_v19  ;;  %v8599_v19 = vld [vmem:[#allocation41_spill] sm:$0xff]  ;;  %5054 = vpow2.f32 %v3691_v23 }
 0xbd7   : > { %v3542_v43 = vsub.f32 %v8599_v19, %v7875_v13  ;;  %5056 = vpow2.f32 %v3715_v3 }
 0xbd8   : > { %v3739_v0 = vadd.f32 %v7877_v42, %v3738_v12  ;;  %v7906_v12 = vpop.eup %5040  ;;  %5058 = vpow2.f32 %v3723_v51  ;;  %v8603_v51 = vld [vmem:[#allocation30_spill] sm:$0xff] }
 0xbd9   : > { %v7910_v20 = vpop.eup %5042  ;;  %v3609_v19 = vmul.f32 1.442695, %v3542_v43  ;;  %5060 = vpow2.f32 %v3727_v31  ;;  %v3587_v43 = vsub.f32 %v7705_v24, %v7798_v35  ;;  %v3550_v31 = vsub.f32 %v7613_v41, %v7875_v13 }
 0xbda   : > { %v3740_v7 = vadd.f32 %v7881_v60, %v3739_v0  ;;  %v7915_v32 = vpop.eup %5044  ;;  %v7917_v0 = vpack.c.bf16 %v934_v34, %v865_v38  ;;  %v3548_v38 = vsub.f32 %v7605_v55, %v7875_v13  ;;  %v3613_v34 = vmul.f32 1.442695, %v3544_v28 }
 0xbdb   : > { %v7921_v49 = vpop.eup %5046  ;;  %5062 = vpow2.f32 %v3605_v63  ;;  %v3589_v28 = vsub.f32 %v7709_v26, %v7798_v35 }
 0xbdc   : > { %v3741_v57 = vadd.f32 %v7886_v4, %v3740_v7  ;;  %v7926_v23 = vpop.eup %5048  ;;  %v867_v7 = vadd.f32 %v8602_v25, %v701_v61  ;;  %5064 = vpow2.f32 %v3609_v19  ;;  %v3617_v25 = vmul.f32 1.442695, %v3546_v21 }
 0xbdd   : > { %v7931_v3 = vpop.eup %5050  ;;  %5066 = vpow2.f32 %v3719_v17  ;;  %v3621_v41 = vmul.f32 1.442695, %v3548_v38  ;;  %v3585_v21 = vsub.f32 %v7701_v59, %v7798_v35  ;;  %v3703_v38 = vmul.f32 1.442695, %v3589_v28 }
 0xbde   : > { %v3742_v52 = vadd.f32 %v7891_v54, %v3741_v57  ;;  %v7936_v53 = vpop.eup %5052  ;;  %v936_v57 = vadd.f32 %v8603_v51, %v701_v61  ;;  %v3552_v61 = vsub.f32 %v7617_v46, %v7875_v13  ;;  %5068 = vpow2.f32 %v3613_v34 }
 0xbdf   : > { %v7941_v55 = vpop.eup %5054  ;;  %5070 = vpow2.f32 %v3707_v11  ;;  %v3625_v46 = vmul.f32 1.442695, %v3550_v31  ;;  %v3819_v35 = vpack.c.bf16 %v7906_v12, %v7901_v6  ;;  %v3695_v31 = vmul.f32 1.442695, %v3585_v21 }
 0xbe0   : > { %v3743_v47 = vadd.f32 %v7896_v40, %v3742_v52  ;;  %v7946_v8 = vpop.eup %5056  ;;  %v3699_v52 = vmul.f32 1.442695, %v3587_v43  ;;  %v7958_v27 = vpack.c.bf16 %v936_v57, %v867_v7  ;;  %5072 = vpow2.f32 %v3617_v25 }
 0xbe1   : > { %v7951_v19 = vpop.eup %5058  ;;  %5074 = vpow2.f32 %v3711_v37  ;;  %v3556_v7 = vsub.f32 %v7629_v9, %v7875_v13  ;;  %v3629_v43 = vmul.f32 1.442695, %v3552_v61  ;;  %3847 = vmatpush.bf16.msrb.mxu2 %v3819_v35  ;;  %v8605_v9 = vld [vmem:[#allocation20_spill] sm:$0xff]  ;;  %v3817_v21 = vpack.c.bf16 %v7896_v40, %v7891_v54 }
 0xbe2   : > { %v3744_v24 = vadd.f32 %v7901_v6, %v3743_v47  ;;  %v7956_v17 = vpop.eup %5060  ;;  %v8604_v47 = vld [vmem:[#allocation8_spill] sm:$0xff]  ;;  %5076 = vpow2.f32 %v3621_v41  ;;  %v3558_v28 = vsub.f32 %v8605_v9, %v7875_v13 }
 0xbe3   : > { %v3554_v51 = vsub.f32 %v8604_v47, %v7875_v13  ;;  %v7962_v34 = vpop.eup %5062  ;;  %v3835_v11 = vpack.c.bf16 %v7956_v17, %v7951_v19  ;;  %5078 = vpow2.f32 %v3699_v52  ;;  %v3637_v47 = vmul.f32 1.442695, %v3556_v7 }
 0xbe4   : > { %v3745_v26 = vadd.f32 %v7906_v12, %v3744_v24  ;;  %v7967_v59 = vpop.eup %5064  ;;  %5080 = vpow2.f32 %v3625_v46 }
 0xbe5   : > { %v7973_v57 = vpop.eup %5066  ;;  %v3768_v25 = vadd.f32 %v7967_v59, %v7962_v34  ;;  %v3633_v24 = vmul.f32 1.442695, %v3554_v51  ;;  %3861 = vmatpush.bf16.msrb.mxu3 %v3835_v11  ;;  %5082 = vpow2.f32 %v3703_v38  ;;  %3848 = vmatpush.bf16.msrb.mxu2 %v3817_v21  ;;  %v8607_v21 = vld [vmem:[#allocation19_spill] sm:$0xff]  ;;  %v3600_v38 = vsub.f32 %v7782_v22, %v7875_v13 }
 0xbe6   : > { %v3746_v63 = vadd.f32 %v7910_v20, %v3745_v26  ;;  %v7978_v6 = vpop.eup %5068  ;;  %v3560_v26 = vsub.f32 %v7641_v18, %v7875_v13  ;;  %5084 = vpow2.f32 %v3629_v43  ;;  %v3833_v51 = vpack.c.bf16 %v7973_v57, %v7946_v8  ;;  %v8606_v18 = vld [vmem:[#allocation21_spill] sm:$0xff] }
 0xbe7   : > { %v7983_v61 = vpop.eup %5070  ;;  %5086 = vpow2.f32 %v3695_v31  ;;  %v3562_v7 = vsub.f32 %v8606_v18, %v7875_v13  ;;  %v3641_v43 = vmul.f32 1.442695, %v3558_v28  ;;  %v3564_v31 = vsub.f32 %v7653_v1, %v7875_v13 }
 0xbe8   : > { %v3747_v37 = vadd.f32 %v7915_v32, %v3746_v63  ;;  %v3769_v63 = vadd.f32 %v7978_v6, %v3768_v25  ;;  %v7989_v52 = vpop.eup %5072  ;;  %5088 = vpow2.f32 %v3633_v24  ;;  %v3566_v40 = vsub.f32 %v8607_v21, %v7875_v13 }
 0xbe9   : > { %v7995_v46 = vpop.eup %5074  ;;  %3862 = vmatpush.bf16.msrb.mxu3 %v3833_v51  ;;  %5090 = vpow2.f32 %v3637_v47  ;;  %v3645_v24 = vmul.f32 1.442695, %v3560_v26  ;;  %v3568_v1 = vsub.f32 %v7665_v16, %v7875_v13  ;;  %v3572_v26 = vsub.f32 %v7675_v2, %v7875_v13  ;;  %v8608_v47 = vld [vmem:[#allocation10_spill] sm:$0xff] }
 0xbea   : > { %v3748_v41 = vadd.f32 %v7921_v49, %v3747_v37  ;;  %v3770_v11 = vadd.f32 %v7989_v52, %v3769_v63  ;;  %v8000_v54 = vpop.eup %5076  ;;  %v3831_v28 = vpack.c.bf16 %v7995_v46, %v7983_v61  ;;  %v3574_v18 = vsub.f32 %v8608_v47, %v7875_v13 }
 0xbeb   : > { %v5079_v37 = vpop.eup %5078  ;;  %5092 = vpow2.f32 %v3641_v43  ;;  %v3649_v21 = vmul.f32 1.442695, %v3562_v7  ;;  %v3578_v2 = vsub.f32 %v7687_v10, %v7875_v13  ;;  %v3653_v43 = vmul.f32 1.442695, %v3564_v31 }
 0xbec   : > { %v3749_v35 = vadd.f32 %v7926_v23, %v3748_v41  ;;  %v3771_v9 = vadd.f32 %v8000_v54, %v3770_v11  ;;  %v3815_v41 = vpack.c.bf16 %v7886_v4, %v7881_v60  ;;  %v8011_v63 = vpop.eup %5080  ;;  %v3570_v11 = vsub.f32 %v7671_v62, %v7875_v13 }
 0xbed   : > { %v5083_v51 = vpop.eup %5082  ;;  %3863 = vmatpush.bf16.msrb.mxu3 %v3831_v28  ;;  %v3576_v62 = vsub.f32 %v7683_v5, %v7875_v13  ;;  %5094 = vpow2.f32 %v3645_v24  ;;  %v3657_v47 = vmul.f32 1.442695, %v3566_v40  ;;  %v3661_v10 = vmul.f32 1.442695, %v3568_v1 }
 0xbee   : > { %v3750_v25 = vadd.f32 %v7931_v3, %v3749_v35  ;;  %v3772_v60 = vadd.f32 %v8011_v63, %v3771_v9  ;;  %3849 = vmatpush.bf16.msrb.mxu2 %v3815_v41  ;;  %v8023_v4 = vpop.eup %5084  ;;  %v3813_v41 = vpack.c.bf16 %v7877_v42, %v7872_v45  ;;  %v3829_v7 = vpack.c.bf16 %v5083_v51, %v5079_v37  ;;  %v8609_v45 = vld [vmem:[#allocation15_spill] sm:$0xff] }
 0xbef   : > { %5096 = vpow2.f32 %v3649_v21  ;;  %v3665_v24 = vmul.f32 1.442695, %v3570_v11  ;;  %v3811_v40 = vpack.c.bf16 %v7866_v58, %v7859_v39  ;;  %v3602_v42 = vsub.f32 %v7794_v33, %v7875_v13 }
 0xbf0   : > { %v3751_v35 = vadd.f32 %v7936_v53, %v3750_v25  ;;  %v5087_v25 = vpop.eup %5086  ;;  %v3773_v9 = vadd.f32 %v8023_v4, %v3772_v60  ;;  %5098 = vpow2.f32 %v3653_v43  ;;  %v3598_v39 = vsub.f32 %v7762_v44, %v7875_v13 }
 0xbf1   : > { %v8035_v12 = vpop.eup %5088  ;;  %3864 = vmatpush.bf16.msrb.mxu3 %v3829_v7  ;;  %v3827_v22 = vpack.c.bf16 %v5087_v25, %v7941_v55  ;;  %5100 = vpow2.f32 %v3657_v47  ;;  %v3673_v58 = vmul.f32 1.442695, %v3574_v18  ;;  %v3592_v44 = vsub.f32 %v8587_v50, %v7875_v13 }
 0xbf2   : > { %v3752_v16 = vadd.f32 %v7941_v55, %v3751_v35  ;;  %v3580_v35 = vsub.f32 %v7691_v29, %v7875_v13  ;;  %v3774_v5 = vadd.f32 %v8035_v12, %v3773_v9  ;;  %3850 = vmatpush.bf16.msrb.mxu2 %v3813_v41  ;;  %v8042_v60 = vpop.eup %5090  ;;  %v3596_v41 = vsub.f32 %v7741_v30, %v7875_v13 }
 0xbf3   : > { %v8051_v9 = vpop.eup %5092  ;;  %5102 = vpow2.f32 %v3661_v10  ;;  %v3725_v30 = vmul.f32 1.442695, %v3600_v38  ;;  %v3729_v43 = vmul.f32 1.442695, %v3602_v42  ;;  %v3825_v38 = vpack.c.bf16 %v7936_v53, %v7931_v3  ;;  %v8610_v53 = vld [vmem:[#allocation13_spill] sm:$0xff]  ;;  %v8611_v10 = vld [vmem:[#allocation38_spill] sm:$0xff] }
 0xbf4   : > { %v3753_v28 = vadd.f32 %v5087_v25, %v3752_v16  ;;  %v3775_v16 = vadd.f32 %v8042_v60, %v3774_v5  ;;  %v8059_v21 = vpop.eup %5094  ;;  %5104 = vpow2.f32 %v3665_v24  ;;  %v3584_v25 = vsub.f32 %v7699_v48, %v7875_v13 }
 0xbf5   : > { %3865 = vmatpush.bf16.msrb.mxu3 %v3827_v22  ;;  %v3717_v18 = vmul.f32 1.442695, %v3596_v41  ;;  %v3721_v47 = vmul.f32 1.442695, %v3598_v39  ;;  %v3681_v24 = vmul.f32 1.442695, %v3578_v2 }
 0xbf6   : > { %v3754_v31 = vadd.f32 %v5079_v37, %v3753_v28  ;;  %v3669_v37 = vmul.f32 1.442695, %v3572_v26  ;;  %v3776_v11 = vadd.f32 %v8051_v9, %v3775_v16  ;;  %3851 = vmatpush.bf16.msrb.mxu2 %v3811_v40  ;;  %v8067_v26 = vpop.eup %5096  ;;  %v3677_v28 = vmul.f32 1.442695, %v3576_v62  ;;  %v8612_v41 = vld [vmem:[#allocation45_spill] sm:$0xff] }
 0xbf7   : > { %v3709_v40 = vmul.f32 1.442695, %v3592_v44  ;;  %v3590_v22 = vsub.f32 %v8612_v41, %v7875_v13 }
 0xbf8   : > { %v3755_v1 = vadd.f32 %v5083_v51, %v3754_v31  ;;  %v3777_v55 = vadd.f32 %v8059_v21, %v3776_v11  ;;  %v3809_v51 = vpack.c.bf16 %v7852_v56, %v7845_v36  ;;  %5106 = vpow2.f32 %v3669_v37  ;;  %v8077_v36 = vpop.eup %5098  ;;  %v8614_v37 = vld [vmem:[#allocation14_spill] sm:$0xff] }
 0xbf9   : > { %v3594_v56 = vsub.f32 %v7725_v14, %v7875_v13  ;;  %5108 = vpow2.f32 %v3673_v58  ;;  %3866 = vmatpush.bf16.msrb.mxu3 %v3825_v38  ;;  %v5101_v50 = vpop.eup %5100  ;;  %v3588_v31 = vsub.f32 %v8611_v10, %v7875_v13  ;;  %v3823_v14 = vpack.c.bf16 %v7926_v23, %v7921_v49 }
 0xbfa   : > { %v3756_v33 = vadd.f32 %v7983_v61, %v3755_v1  ;;  %v3778_v7 = vadd.f32 %v8067_v26, %v3777_v55  ;;  %3852 = vmatpush.bf16.msrb.mxu2 %v3809_v51  ;;  %5110 = vpow2.f32 %v3725_v30  ;;  %v5103_v42 = vpop.eup %5102  ;;  %v8615_v58 = vsub.f32 %v8609_v45, %v7875_v13 }
 0xbfb   : > { %5112 = vpow2.f32 %v3729_v43  ;;  %v5105_v62 = vpop.eup %5104  ;;  %v3713_v1 = vmul.f32 1.442695, %v3594_v56  ;;  %v3701_v55 = vmul.f32 1.442695, %v3588_v31  ;;  %v8616_v43 = vunpack.c.l.b16 %v7917_v0 }
 0xbfc   : > { %v3757_v61 = vadd.f32 %v7995_v46, %v3756_v33  ;;  %v3779_v3 = vadd.f32 %v8077_v36, %v3778_v7  ;;  %v3807_v46 = vpack.c.bf16 %v8610_v53, %v7831_v15  ;;  %5114 = vpow2.f32 %v3717_v18 }
 0xbfd   : > { %v3685_v15 = vmul.f32 1.442695, %v3580_v35  ;;  %5116 = vpow2.f32 %v3721_v47  ;;  %3867 = vmatpush.bf16.msrb.mxu3 %v3823_v14  ;;  %v3689_v29 = vmul.f32 1.442695, %v8615_v58  ;;  %v3821_v35 = vpack.c.bf16 %v7915_v32, %v7910_v20  ;;  %v8618_v20 = vld [vmem:[#allocation48_spill] sm:$0xff] }
 0xbfe   : > { %v3758_v5 = vadd.f32 %v7946_v8, %v3757_v61  ;;  %v3780_v8 = vadd.f32 %v5101_v50, %v3779_v3  ;;  %3853 = vmatpush.bf16.msrb.mxu2 %v3807_v46  ;;  %v8095_v2 = vpop.eup %5106  ;;  %5118 = vpow2.f32 %v3677_v28  ;;  %v3820_v30 = vpack.c.bf16 %v5105_v62, %v5103_v42 }
 0xbff   : > { %v8100_v39 = vpop.eup %5108  ;;  %5120 = vpow2.f32 %v3681_v24  ;;  %v8617_v45 = vunpack.c.l.b16 %v7958_v27  ;;  %v3586_v32 = vsub.f32 %v8618_v20, %v7875_v13  ;;  %v3705_v61 = vmul.f32 1.442695, %v3590_v22 }
 0xc00   : > { %v3759_v16 = vadd.f32 %v7973_v57, %v3758_v5  ;;  %v3781_v23 = vadd.f32 %v5103_v42, %v3780_v8  ;;  %v8613_v57 = vld [vmem:[#allocation47_spill] sm:$0xff]  ;;  %v8107_v33 = vpop.eup %5110  ;;  %5122 = vpow2.f32 %v3709_v40  ;;  %v8619_v28 = vunpack.c.h.b16 %v7917_v0 }
 0xc01   : > { %v3805_v11 = vpack.c.bf16 %v8614_v37, %v8613_v57  ;;  %v8112_v44 = vpop.eup %5112  ;;  %v8118_v38 = vpack.c.b16 %v8617_v45, %v8616_v43  ;;  %5124 = vpow2.f32 %v3713_v1  ;;  %3868 = vmatpush.bf16.msrb.mxu3 %v3821_v35  ;;  %v8620_v47 = vunpack.c.h.b16 %v7958_v27 }
 0xc02   : > { %v3760_v49 = vadd.f32 %v7951_v19, %v3759_v16  ;;  %v3782_v51 = vadd.f32 %v5105_v62, %v3781_v23  ;;  %5126 = vpow2.f32 %v3685_v15  ;;  %v3836_v7 = vpack.c.bf16 %v8112_v44, %v8107_v33 }
 0xc03   : > { %3854 = vmatpush.bf16.msrb.mxu2 %v3805_v11  ;;  %v8129_v5 = vpack.c.b16 %v8620_v47, %v8619_v28  ;;  %5128 = vpow2.f32 %v3689_v29  ;;  %v3693_v3 = vmul.f32 1.442695, %v3584_v25  ;;  %v3818_v53 = vpack.c.bf16 %v5101_v50, %v8077_v36 }
 0xc04   : > { %v8110_v19 = vadd.f32 %v7956_v17, %v3760_v49  ;;  %v5115_v17 = vpop.eup %5114  ;;  %v3783_v18 = vadd.f32 %v8095_v2, %v3782_v51  ;;  %5130 = vpow2.f32 %v3701_v55  ;;  %v3697_v0 = vmul.f32 1.442695, %v3586_v32 }
 0xc05   : > { %v5117_v56 = vpop.eup %5116  ;;  %3889 = vmatpush.bf16.msra.mxu3 %v3836_v7  ;;  %5132 = vpow2.f32 %v3705_v61  ;;  %v3816_v13 = vpack.c.bf16 %v8067_v26, %v8059_v21  ;;  %v3814_v8 = vpack.c.bf16 %v8051_v9, %v8042_v60  ;;  %v3812_v26 = vpack.c.bf16 %v8035_v12, %v8023_v4 }
 0xc06   : > { %3855 = vmatmul.bf16.vlgmr.msrb.gmra.mxu2 %v8118_v38  ;;  %v5119_v46 = vpop.eup %5118  ;;  %v3784_v42 = vadd.f32 %v8100_v39, %v3783_v18  ;;  %3869 = vmatmul.bf16.vlgmr.msrb.gmra.mxu3 %v8129_v5  ;;  %v3834_v24 = vpack.c.bf16 %v5117_v56, %v5115_v17  ;;  %5134 = vpow2.f32 %v3693_v3  ;;  %v3810_v37 = vpack.c.bf16 %v8011_v63, %v8000_v54 }
 0xc07   : > { %3875 = vmatpush.bf16.msra.mxu2 %v3820_v30  ;;  %v5121_v10 = vpop.eup %5120  ;;  %5136 = vpow2.f32 %v3697_v0  ;;  %v3808_v58 = vpack.c.bf16 %v7989_v52, %v7978_v6  ;;  %v3806_v35 = vpack.c.bf16 %v7967_v59, %v7962_v34  ;;  %v3822_v63 = vpack.c.bf16 %v8100_v39, %v8095_v2  ;;  %v5145_v0 = vld [vmem:[%s5318_s17 + $0x18] sm:$0xff] }
 0xc08   : > { %v5123_v27 = vpop.eup %5122  ;;  %v3785_v31 = vadd.f32 %v5119_v46, %v3784_v42  ;;  %v3824_v4 = vpack.c.bf16 %v5121_v10, %v5119_v46  ;;  %v3762_v6 = vrot.slane %v8110_v19, 4 }
 0xc09   : > { %v5125_v48 = vpop.eup %5124  ;;  %3890 = vmatpush.bf16.msra.mxu3 %v3834_v24 }
 0xc0a   : > { %v5127_v25 = vpop.eup %5126  ;;  %v3786_v36 = vadd.f32 %v5121_v10, %v3785_v31  ;;  %v3832_v16 = vpack.c.bf16 %v5125_v48, %v5123_v27  ;;  %v3763_v34 = vadd.f32 %v3762_v6, %v8110_v19  ;;  %v4494_v6 = vld [vmem:[#allocation2 + $0x18] sm:$0xf0] }
 0xc0b   : > { %3876 = vmatpush.bf16.msra.mxu2 %v3818_v53  ;;  %v5129_v50 = vpop.eup %5128 }
 0xc0c   : > { %v5131_v14 = vpop.eup %5130  ;;  %v3787_v62 = vadd.f32 %v5127_v25, %v3786_v36  ;;  %v3826_v9 = vpack.c.bf16 %v5129_v50, %v5127_v25  ;;  %v3764_v51 = vrot.slane %v3763_v34, 2 }
 0xc0d   : > { %v5133_v40 = vpop.eup %5132  ;;  %3891 = vmatpush.bf16.msra.mxu3 %v3832_v16 }
 0xc0e   : > { %v3788_v41 = vadd.f32 %v5129_v50, %v3787_v62  ;;  %v5135_v22 = vpop.eup %5134  ;;  %v3830_v1 = vpack.c.bf16 %v5133_v40, %v5131_v14  ;;  %v3765_v45 = vadd.f32 %v3764_v51, %v3763_v34  ;;  %v4546_v34 = vld [vmem:[#allocation2 + $0x14] sm:$0xf] }
 0xc0f   : > { %3877 = vmatpush.bf16.msra.mxu2 %v3816_v13  ;;  %v5137_v21 = vpop.eup %5136  ;;  %v4497_v51 = vor.u32 %v4546_v34, %v4494_v6 }
 0xc10   : > { %v3789_v15 = vadd.f32 %v5135_v22, %v3788_v41  ;;  %v3828_v57 = vpack.c.bf16 %v5137_v21, %v5135_v22  ;;  %v3766_v20 = vrot.slane %v3765_v45, 1 }
 0xc11   : > { %3892 = vmatpush.bf16.msra.mxu3 %v3830_v1 }
 0xc12   : > { %v3790_v49 = vadd.f32 %v5137_v21, %v3789_v15  ;;  %v3767_v2 = vadd.f32 %v3766_v20, %v3765_v45  ;;  %v4486_v45 = vld [vmem:[#allocation2 + $0x8] sm:$0xf0]  ;;  %v4544_v20 = vld [vmem:[#allocation2 + $0x4] sm:$0xf] }
 0xc13   : > { %3878 = vmatpush.bf16.msra.mxu2 %v3814_v8 }
 0xc14   : > { %v3791_v23 = vadd.f32 %v5131_v14, %v3790_v49  ;;  %5138 = vrcp.f32 %v3767_v2  ;;  %vm3908_vm0 = vweird.f32 %v3767_v2  ;;  %v3914_v42 = vand.u32 2147483648, %v3767_v2 }
 0xc15   : > { %3893 = vmatpush.bf16.msra.mxu3 %v3828_v57 }
 0xc16   : > { %v3792_v11 = vadd.f32 %v5133_v40, %v3791_v23  ;;  %v3915_v36 = vor.u32 1.1754944e-38, %v3914_v42  ;;  %v5144_v42 = vld [vmem:[%s5318_s17 + $0x10] sm:$0xff] }
 0xc17   : > { %3879 = vmatpush.bf16.msra.mxu2 %v3812_v26 }
 0xc18   : > { %v3793_v60 = vadd.f32 %v5123_v27, %v3792_v11  ;;  %v3912_v27 = vand.u32 2147483647, %v3767_v2 }
 0xc19   : > { %3894 = vmatpush.bf16.msra.mxu3 %v3826_v9 }
 0xc1a   : > { %v3794_v29 = vadd.f32 %v5125_v48, %v3793_v60  ;;  %vm3913_vm6 = vcmp.eq.f32.partialorder %v3912_v27, 8.507059e+37 }
 0xc1b   : > { %3880 = vmatpush.bf16.msra.mxu2 %v3810_v37 }
 0xc1c   : > { %v3795_v12 = vadd.f32 %v5115_v17, %v3794_v29 }
 0xc1d   : > { %3895 = vmatpush.bf16.msra.mxu3 %v3824_v4  ;;  %v4502_v4 = vld [vmem:[#allocation2 + $0x28] sm:$0xf0] }
 0xc1e   : > { %v3796_v30 = vadd.f32 %v5117_v56, %v3795_v12  ;;  %v4549_v12 = vld [vmem:[#allocation2 + $0x24] sm:$0xf0] }
 0xc1f   : > { %3881 = vmatpush.bf16.msra.mxu2 %v3808_v58 }
 0xc20   : > { %v3797_v54 = vadd.f32 %v8107_v33, %v3796_v30  ;;  %v4548_v30 = vld [vmem:[#allocation2 + $0x24] sm:$0xf] }
 0xc21   : > { %3896 = vmatpush.bf16.msra.mxu3 %v3822_v63  ;;  %v4505_v63 = vor.u32 %v4548_v30, %v4502_v4 }
 0xc22   : > { %v3798_v55 = vadd.f32 %v8112_v44, %v3797_v54  ;;  %v5139_v44 = vpop.eup %5138 }
 0xc23   : > { %3882 = vmatpush.bf16.msra.mxu2 %v3806_v35  ;;  %v3904_v18 = vmul.f32 %v5139_v44, %v3767_v2  ;;  %vm3909_vm4 = vweird.f32 %v5139_v44  ;;  %v4500_v35 = vld [vmem:[#allocation2 + $0x20] sm:$0xf]  ;;  %v4489_v2 = vor.u32 %v4544_v20, %v4486_v45  ;;  %v5155_v20 = vld [vmem:[%s5318_s17 + $0x68] sm:$0xff] }
 0xc24   : > { %3897 = vmatmul.bf16.vlgmr.msra.gmra.mxu3 %v8129_v5  ;;  %v3799_v52 = vrot.slane %v3798_v55, 4  ;;  %vm8158_vm1 = vmor %vm3908_vm0, %vm3909_vm4  ;;  %v4501_v54 = vor.u32 %v4549_v12, %v4500_v35  ;;  %v5154_v45 = vld [vmem:[%s5318_s17 + $0x60] sm:$0xff] }
 0xc25   : > { %v3905_v56 = vsub.f32 1.0, %v3904_v18 }
 0xc26   : > { %3883 = vmatmul.bf16.vlgmr.msra.gmra.mxu2 %v8118_v38  ;;  %v3800_v59 = vadd.f32 %v3799_v52, %v3798_v55  ;;  %v4547_v55 = vld [vmem:[#allocation2 + $0x14] sm:$0xf0]  ;;  %v4492_v52 = vld [vmem:[#allocation2 + $0x10] sm:$0xf] }
 0xc27   : > { %v3906_v47 = vmul.f32 %v5139_v44, %v3905_v56 }
 0xc28   : > { %v3801_v43 = vrot.slane %v3800_v59, 2 }
 0xc29   : > { %v3907_v53 = vadd.f32 %v5139_v44, %v3906_v47 }
 0xc2a   : > { %v3802_v33 = vadd.f32 %v3801_v43, %v3800_v59  ;;  %v4493_v59 = vor.u32 %v4547_v55, %v4492_v52  ;;  %v4545_v43 = vld [vmem:[#allocation2 + $0x4] sm:$0xf0]  ;;  %v5153_v55 = vld [vmem:[%s5318_s17 + $0x58] sm:$0xff] }
 0xc2b   : > { %v3911_v13 = vsel %vm8158_vm1, %v5139_v44, %v3907_v53  ;;  %v4541_v44 = vld [vmem:[%s8260_s5 + $0x8] sm:$0xff] }
 0xc2c   : > { %v3803_v32 = vrot.slane %v3802_v33, 1  ;;  %v3916_v16 = vsel %vm3913_vm6, %v3915_v36, %v3911_v13  ;;  %v5146_v36 = vld [vmem:[%s5318_s17 + $0x20] sm:$0xff] }
 0xc2e   : > { %v3804_v39 = vadd.f32 %v3803_v32, %v3802_v33  ;;  %v4484_v33 = vld [vmem:[#allocation2] sm:$0xf] }
 0xc2f   : > { %v4485_v32 = vor.u32 %v4545_v43, %v4484_v33 }
 0xc30   : > { %5140 = vrcp.f32 %v3804_v39  ;;  %v3928_v10 = vand.u32 2147483648, %v3804_v39  ;;  %vm3922_vm2 = vweird.f32 %v3804_v39  ;;  %v3926_v24 = vand.u32 2147483647, %v3804_v39 }
 0xc32   : > { %v3929_v14 = vor.u32 1.1754944e-38, %v3928_v10  ;;  %vm3927_vm7 = vcmp.eq.f32.partialorder %v3926_v24, 8.507059e+37 }
 0xc36   : > { %v5141_v61 = vpop.eup %5140 }
 0xc37   : > { %v3918_v7 = vmul.f32 %v5141_v61, %v3804_v39  ;;  %vm3923_vm15 = vweird.f32 %v5141_v61  ;;  %v4540_v39 = vld [vmem:[%s8260_s5] sm:$0xff] }
 0xc38   : > { %vm3924_vm5 = vmor %vm3922_vm2, %vm3923_vm15 }
 0xc39   : > { %v3919_v28 = vsub.f32 1.0, %v3918_v7  ;;  %v5142_v7 = vld [vmem:[%s5318_s17] sm:$0xff] }
 0xc3b   : > { %v3920_v5 = vmul.f32 %v5141_v61, %v3919_v28  ;;  %v5143_v28 = vld [vmem:[%s5318_s17 + $0x8] sm:$0xff] }
 0xc3d   : > { %v3921_v46 = vadd.f32 %v5141_v61, %v3920_v5 }
 0xc3f   : > { %v3925_v25 = vsel %vm3924_vm5, %v5141_v61, %v3921_v46  ;;  %v4543_v61 = vld [vmem:[%s8260_s5 + $0x18] sm:$0xff] }
 0xc40   : > { %v3930_v40 = vsel %vm3927_vm7, %v3929_v14, %v3925_v25  ;;  %v5147_v14 = vld [vmem:[%s5318_s17 + $0x28] sm:$0xff] }
 0xc89   : > { %v3856_v38 = vpop.f32.mrf.mxu2  ;;  %v3870_v17 = vpop.f32.mrf.mxu3 }
 0xc8a   : > { %v3871_v48 = vadd.f32 %v3870_v17, %v3856_v38  ;;  %v4542_v38 = vld [vmem:[%s8260_s5 + $0x10] sm:$0xff]  ;;  %v4096_v17 = vpop.permute.xlu2 %4095 }
 0xc8b   : > { %v4133_v56 = vadd.f32 %v5142_v7, %v4096_v17  ;;  %v5157_v7 = vld [vmem:[%s5318_s17 + $0x78] sm:$0xff] }
 0xc8c   : > { %v3931_v8 = vmul.f32 %v3916_v16, %v3871_v48 }
 0xc91   : > { %v3858_v19 = vpop.f32.mrf.mxu2  ;;  %v3872_v3 = vpop.f32.mrf.mxu3 }
 0xc92   : > { %v3873_v1 = vadd.f32 %v3872_v3, %v3858_v19  ;;  %v4101_v18 = vpop.permute.xlu2 %4100  ;;  %v4134_v19 = vadd.f32 %v5143_v28, %v4096_v17  ;;  %v5156_v17 = vld [vmem:[%s5318_s17 + $0x70] sm:$0xff] }
 0xc93   : > { %v4135_v10 = vadd.f32 %v5144_v42, %v4101_v18  ;;  %v4136_v27 = vadd.f32 %v5145_v0, %v4101_v18 }
 0xc94   : > { %v3933_v49 = vmul.f32 %v3916_v16, %v3873_v1 }
 0xc9a   : > { %v4106_v3 = vpop.permute.xlu2 %4105 }
 0xca2   : > { %v4111_v25 = vpop.permute.xlu2 %4110 }
 0xca7   : > { %v3898_v50 = vpop.f32.mrf.mxu3 }
 0xca9   : > { %v3884_v31 = vpop.f32.mrf.mxu2 }
 0xcaa   : > { %v3899_v62 = vadd.f32 %v3898_v50, %v3884_v31  ;;  %v4137_v50 = vadd.f32 %v5146_v36, %v4106_v3 }
 0xcac   : > { %v3932_v41 = vmul.f32 %v3930_v40, %v3899_v62  ;;  %v4138_v62 = vadd.f32 %v5147_v14, %v4106_v3 }
 0xcae   : > { %v3935_v22 = vpack.c.bf16 %v3932_v41, %v3931_v8 }
 0xcaf   : > { %v3900_v21 = vpop.f32.mrf.mxu3 }
 0xcb0   : > { %3937 = vst [vmem:[#allocation2 + $0x30] sm:$0xff] %v3935_v22  ;;  %v4116_v22 = vpop.permute.xlu2 %4115 }
 0xcb1   : > { %v3886_v15 = vpop.f32.mrf.mxu2 }
 0xcb2   : > { %v3901_v26 = vadd.f32 %v3900_v21, %v3886_v15  ;;  %v5148_v15 = vld [vmem:[%s5318_s17 + $0x30] sm:$0xff]  ;;  %v5149_v21 = vld [vmem:[%s5318_s17 + $0x38] sm:$0xff] }
 0xcb3   : > { %v4139_v1 = vadd.f32 %v5148_v15, %v4111_v25 }
 0xcb4   : > { %v3934_v23 = vmul.f32 %v3930_v40, %v3901_v26  ;;  %v4140_v26 = vadd.f32 %v5149_v21, %v4111_v25 }
 0xcb6   : > { %v3936_v57 = vpack.c.bf16 %v3934_v23, %v3933_v49 }
 0xcb7   : > { %v4508_v37 = vld [vmem:[#allocation2 + $0x30] sm:$0xf]  ;;  %v4550_v60 = vld [vmem:[#allocation2 + $0x34] sm:$0xf] }
 0xcb8   : > { %3938 = vst [vmem:[#allocation2 + $0x38] sm:$0xff] %v3936_v57 }
 0xcbf   : > { %v4551_v11 = vld [vmem:[#allocation2 + $0x34] sm:$0xf0]  ;;  %v4510_v9 = vld [vmem:[#allocation2 + $0x38] sm:$0xf0] }
 0xcc0   : > { %v4509_v58 = vor.u32 %v4551_v11, %v4508_v37  ;;  %v4513_v29 = vor.u32 %v4550_v60, %v4510_v9  ;;  %v5150_v11 = vld [vmem:[%s5318_s17 + $0x40] sm:$0xff]  ;;  %v5151_v9 = vld [vmem:[%s5318_s17 + $0x48] sm:$0xff] }
 0xcc1   : > { %v4141_v60 = vadd.f32 %v5150_v11, %v4116_v22 }
 0xcc2   : > { %4031 = vmatpush.bf16.msrb.mxu2 %v4509_v58  ;;  %4060 = vmatpush.bf16.msrb.mxu3 %v4513_v29  ;;  %v4142_v58 = vadd.f32 %v5151_v9, %v4116_v22  ;;  %v4121_v29 = vpop.permute.xlu2 %4120 }
 0xcc3   : > { %v4144_v6 = vadd.f32 %v5153_v55, %v4121_v29 }
 0xcc6   : > { %4032 = vmatpush.bf16.msrb.mxu2 %v4501_v54  ;;  %4061 = vmatpush.bf16.msrb.mxu3 %v4505_v63  ;;  %v5152_v54 = vld [vmem:[%s5318_s17 + $0x50] sm:$0xff] }
 0xcc7   : > { %v4143_v63 = vadd.f32 %v5152_v54, %v4121_v29 }
 0xcca   : > { %4033 = vmatpush.bf16.msrb.mxu2 %v4493_v59  ;;  %4062 = vmatpush.bf16.msrb.mxu3 %v4497_v51  ;;  %v4126_v43 = vpop.permute.xlu2 %4125 }
 0xccb   : > { %v4145_v33 = vadd.f32 %v5154_v45, %v4126_v43 }
 0xcce   : > { %4034 = vmatpush.bf16.msrb.mxu2 %v4485_v32  ;;  %4063 = vmatpush.bf16.msrb.mxu3 %v4489_v2  ;;  %v4146_v32 = vadd.f32 %v5155_v20, %v4126_v43 }
 0xcd1   : > { %4514 = vmatmul.msk.bf16.vlgmr.msrb.gmra.mxu2 %vm763_vm3, %v4540_v39  ;;  %4518 = vmatmul.msk.bf16.vlgmr.msrb.gmra.mxu3 %vm763_vm3, %v4540_v39 }
 0xce1   : > { %4515 = vmatmul.msk.bf16.gmra.mxu2 %vm763_vm3, %v4541_v44  ;;  %4519 = vmatmul.msk.bf16.gmra.mxu3 %vm763_vm3, %v4541_v44 }
 0xcf1   : > { %4516 = vmatmul.msk.bf16.gmra.mxu2 %vm763_vm3, %v4542_v38  ;;  %4520 = vmatmul.msk.bf16.gmra.mxu3 %vm763_vm3, %v4542_v38 }
 0xd01   : > { %4517 = vmatmul.msk.bf16.gmra.mxu2 %vm763_vm3, %v4543_v61  ;;  %4521 = vmatmul.msk.bf16.gmra.mxu3 %vm763_vm3, %v4543_v61  ;;  %v4131_v61 = vpop.permute.xlu2 %4130 }
 0xd02   : > { %v4147_v18 = vadd.f32 %v5156_v17, %v4131_v61 }
 0xd54   : > { %v4036_v47 = vpop.f32.mrf.mxu2  ;;  %v4065_v5 = vpop.f32.mrf.mxu3 }
 0xd55   : > { %v4149_v53 = vadd.f32 %v4133_v56, %v4036_v47  ;;  %v4150_v46 = vadd.f32 %v4134_v19, %v4065_v5  ;;  %v4148_v56 = vadd.f32 %v5157_v7, %v4131_v61 }
 0xd57   : > { %4165 = vst [vmem:[%s8189_s29] sm:$0xff] %v4149_v53 }
 0xd58   : > { %4166 = vst [vmem:[%s8189_s29 + $0x8] sm:$0xff] %v4150_v46 }
 0xd5c   : > { %v4038_v31 = vpop.f32.mrf.mxu2  ;;  %v4067_v24 = vpop.f32.mrf.mxu3 }
 0xd5d   : > { %v4151_v48 = vadd.f32 %v4135_v10, %v4038_v31  ;;  %v4152_v13 = vadd.f32 %v4136_v27, %v4067_v24 }
 0xd5f   : > { %4167 = vst [vmem:[%s8189_s29 + $0x10] sm:$0xff] %v4151_v48 }
 0xd60   : > { %4168 = vst [vmem:[%s8189_s29 + $0x18] sm:$0xff] %v4152_v13 }
 0xd64   : > { %v4041_v16 = vpop.f32.mrf.mxu2  ;;  %v4070_v40 = vpop.f32.mrf.mxu3 }
 0xd65   : > { %v4153_v8 = vadd.f32 %v4137_v50, %v4041_v16  ;;  %v4154_v41 = vadd.f32 %v4138_v62, %v4070_v40 }
 0xd67   : > { %4169 = vst [vmem:[%s8189_s29 + $0x20] sm:$0xff] %v4153_v8 }
 0xd68   : > { %4170 = vst [vmem:[%s8189_s29 + $0x28] sm:$0xff] %v4154_v41 }
 0xd6c   : > { %v4043_v49 = vpop.f32.mrf.mxu2  ;;  %v4072_v23 = vpop.f32.mrf.mxu3 }
 0xd6d   : > { %v4155_v57 = vadd.f32 %v4139_v1, %v4043_v49  ;;  %v4156_v37 = vadd.f32 %v4140_v26, %v4072_v23 }
 0xd6f   : > { %4171 = vst [vmem:[%s8189_s29 + $0x30] sm:$0xff] %v4155_v57 }
 0xd70   : > { %4172 = vst [vmem:[%s8189_s29 + $0x38] sm:$0xff] %v4156_v37 }
 0xd74   : > { %v4046_v12 = vpop.f32.mrf.mxu2  ;;  %v4075_v4 = vpop.f32.mrf.mxu3 }
 0xd75   : > { %v4157_v35 = vadd.f32 %v4141_v60, %v4046_v12  ;;  %v4158_v30 = vadd.f32 %v4142_v58, %v4075_v4 }
 0xd77   : > { %4173 = vst [vmem:[%s8189_s29 + $0x40] sm:$0xff] %v4157_v35 }
 0xd78   : > { %4174 = vst [vmem:[%s8189_s29 + $0x48] sm:$0xff] %v4158_v30 }
 0xd7c   : > { %v4048_v52 = vpop.f32.mrf.mxu2  ;;  %v4077_v34 = vpop.f32.mrf.mxu3 }
 0xd7d   : > { %v4159_v59 = vadd.f32 %v4143_v63, %v4048_v52  ;;  %v4160_v51 = vadd.f32 %v4144_v6, %v4077_v34 }
 0xd7f   : > { %4175 = vst [vmem:[%s8189_s29 + $0x50] sm:$0xff] %v4159_v59 }
 0xd80   : > { %4176 = vst [vmem:[%s8189_s29 + $0x58] sm:$0xff] %v4160_v51 }
 0xd84   : > { %v4051_v2 = vpop.f32.mrf.mxu2  ;;  %v4080_v39 = vpop.f32.mrf.mxu3 }
 0xd85   : > { %v4161_v44 = vadd.f32 %v4145_v33, %v4051_v2  ;;  %v4162_v38 = vadd.f32 %v4146_v32, %v4080_v39 }
 0xd87   : > { %4177 = vst [vmem:[%s8189_s29 + $0x60] sm:$0xff] %v4161_v44 }
 0xd88   : > { %4178 = vst [vmem:[%s8189_s29 + $0x68] sm:$0xff] %v4162_v38 }
 0xd8c   : > { %v4053_v28 = vpop.f32.mrf.mxu2  ;;  %v4082_v19 = vpop.f32.mrf.mxu3 }
 0xd8d   : > { %v4163_v47 = vadd.f32 %v4147_v18, %v4053_v28  ;;  %v4164_v5 = vadd.f32 %v4148_v56, %v4082_v19 }
 0xd8f   : > { %4179 = vst [vmem:[%s8189_s29 + $0x70] sm:$0xff] %v4163_v47 }
 0xd90   : > { %4180 = vst [vmem:[%s8189_s29 + $0x78] sm:$0xff] %v4164_v5 }
 0xd91   : > { %5185 = shalt.err (!%p5182_p3)
}
 0xd92   : > { %s5223_s22 = smov 256   ;;  %s5224_s29 = smov 16  }
 0xd93   : > { %4567 = dma.vmem_to_hbm [thread:$0]  (%p5303_p5), %s4195_s15, 2048, %s4197_s16, %s4182_s28, %s5223_s22, %s5223_s22, %s5224_s29  }
 0xd94 PF: > { %p4573_p4 = scmp.ge.s32.totalorder %s5220_s27, 2  ;;  %s4211_s9 = sand.u32 1, %s5208_s24  }
 0xd95   : > { %s4212_s13 = scalar_lea.sflag [#allocation4], %s4211_s9 }
 0xd96   : > { %p4570_p7 = pnand %p4573_p4, %p5307_p6 }
 0xd98   : > { %p4571_p8 = pneg %p4570_p7 }
 0xd9a   : > { %5203 = dma.done.wait (%p4571_p8), %s4212_s13, 2048  }
 0xd9b   : > { %5205 = vsyncadd (%p4571_p8), %s4212_s13, 4294965248  ;;  %p17_p9 = scmp.ge.s32.totalorder %s5290_s30, 4   ;;  %s8623_s24 = smov %s5212_s25 }
 0xd9c   : > { %s8624_s25 = smov %s5216_s26  ;;  %s8625_s26 = smov %s5301_s10 }
 0xd9d   : > { %s8626_s27 = smov %s5290_s30  ;;  %19 = sbr.rel (!%p17_p9) target bundleno = 3 (0x3), region = 83 }
 0xda2   :  { %4218 = vsyncpa [#allocation4], 1 }
 0xda3   :  { %4220 = vsyncpa [#allocation4 + $0x1], 1 }

</bundles_post_ra>
